<compile_context>
chip_gen: v5e
topology: v5e:2x2
jax: 0.10.0
libtpu: 0.0.40
codegen_flags: <defaults>
</compile_context>

<pallas_src>
import functools

import numpy as np
import jax
import jax.numpy as jnp
from jax.experimental import pallas as pl
from jax.experimental.pallas import tpu as pltpu

# ----------------- configuration (scaled down; real values in comments) ------------
UP_SIZE = (24, 24)      # real model: (192, 192)
C_STEM = 16             # real: 16
C_HIGH = 96             # real: 960 (embed_size of OutputHead)
HEAD_HIDDEN = 32

_TN_HEAD = 256                   # preferred lane (output-pixel) tile of the head kernel
_VMEM_LIMIT = 32 * 1024 * 1024   # explicit scoped-VMEM budget (safe on v5e/v6e/v7x)


# ----------------------------- helpers (trace-time static) -------------------------
def _act(y, act):
    if act == "relu":
        return jnp.maximum(y, 0.0)
    if act == "hardswish":
        return y * jnp.clip(y + 3.0, 0.0, 6.0) * (1.0 / 6.0)
    if act == "hardsigmoid":
        return jnp.clip(y + 3.0, 0.0, 6.0) * (1.0 / 6.0)
    return y


def _round_up(n, m):
    return ((n + m - 1) // m) * m


def _pick_tile(dim, pref, align):
    """Largest tile <= pref that divides dim and is a multiple of align, else full dim."""
    if dim <= pref:
        return dim
    t = (pref // align) * align
    while t >= align:
        if dim % t == 0:
            return t
        t -= align
    return dim


def _full_spec(shape, ngrid):
    zeros = (0,) * len(shape)
    if ngrid == 1:
        return pl.BlockSpec(shape, lambda b: zeros)
    return pl.BlockSpec(shape, lambda b, c: zeros)


def _im2col3x3(x, stride):
    """x: (B,H,W,C) -> (B, Ho*Wo, 9*C) patches.  XLA glue; only for the 3-ch stem."""
    B, H, W, C = x.shape
    Ho = (H - 1) // stride + 1
    Wo = (W - 1) // stride + 1
    xp = jnp.pad(x, ((0, 0), (1, 1), (1, 1), (0, 0)))
    cols = []
    for dy in range(3):
        for dx in range(3):
            cols.append(xp[:, dy:dy + stride * (Ho - 1) + 1:stride,
                            dx:dx + stride * (Wo - 1) + 1:stride, :])
    patches = jnp.concatenate(cols, axis=-1)          # (B, Ho, Wo, 9*C)
    return patches.reshape(B, Ho * Wo, 9 * C), Ho, Wo


# ----------------------------- fused inverted-residual block -----------------------
def _ir_kernel(*refs, H, W, stride, act, use_se, has_pre, wpad):
    refs = list(refs)
    x_ref = refs.pop(0)
    lm_ref = refs.pop(0)                  # (H*W, 1) mask: 1.0 where image col != 0
    rm_ref = refs.pop(0)                  # (H*W, 1) mask: 1.0 where image col != W-1
    if has_pre:
        prew, preb = refs.pop(0), refs.pop(0)
    expw, expb = refs.pop(0), refs.pop(0)
    dww, dwb = refs.pop(0), refs.pop(0)
    sel = refs.pop(0) if stride != 1 else None
    if use_se:
        se1w, se1b, se2w, se2b = refs.pop(0), refs.pop(0), refs.pop(0), refs.pop(0)
    projw, projb = refs.pop(0), refs.pop(0)
    o_ref = refs.pop(0)
    pbuf = refs.pop(0)                    # flat (wpad + H*W + wpad, Cexp) f32 scratch

    HW = H * W
    Cexp = pbuf.shape[1]

    # --- optional fused stem conv (block 1): patches @ stem_w + hardswish ---
    x = x_ref[0]                                      # (HW, Cin) bf16
    if has_pre:
        x = _act(jnp.dot(x, prew[...], preferred_element_type=jnp.float32)
                 + preb[...], "hardswish").astype(jnp.bfloat16)

    # --- expand 1x1: ONE MXU matmul over the whole block ---
    er = _act(jnp.dot(x, expw[...], preferred_element_type=jnp.float32)
              + expb[...], act)                       # (HW, Cexp) f32

    # --- flat padded scratch: zero only the (tiny, aligned) row-pad regions, then one
    #     contiguous 8-sublane-aligned store of the expanded map ---
    zpad = jnp.zeros((wpad, Cexp), jnp.float32)
    pbuf[0:wpad, :] = zpad
    pbuf[wpad + HW:wpad + HW + wpad, :] = zpad
    pbuf[wpad:wpad + HW, :] = er

    # --- depthwise 3x3: 9 whole-image contiguous taps (VPU), edge columns masked ---
    wk = dww[...]                                     # (9, Cexp) f32
    acc = None
    for dx in range(3):
        part = None
        for dy in range(3):
            k = 3 * dy + dx
            start = wpad + (dy - 1) * W + (dx - 1)    # static offset in flat layout
            t = pbuf[start:start + HW, :] * wk[k:k + 1, :]
            part = t if part is None else part + t
        if dx == 0:
            part = part * lm_ref[...]                 # mask wrapped left-neighbour reads
        elif dx == 2:
            part = part * rm_ref[...]                 # mask wrapped right-neighbour reads
        acc = part if acc is None else acc + part
    h = _act(acc + dwb[...], act)                     # (HW, Cexp) f32, stride-1 dw output

    # --- stride-2: one batched 0/1 selection matmul (row+col subsample, MXU) ---
    if stride != 1:
        h = jnp.dot(sel[...], h.astype(jnp.bfloat16),
                    preferred_element_type=jnp.float32)      # (Ho*Wo, Cexp)

    # --- squeeze-excite, entirely in VMEM ---
    if use_se:
        pool = jnp.mean(h, axis=0, keepdims=True)     # (1, Cexp)
        s = jnp.dot(pool.astype(jnp.bfloat16), se1w[...],
                    preferred_element_type=jnp.float32) + se1b[...]
        s = jnp.maximum(s, 0.0)
        s = jnp.dot(s.astype(jnp.bfloat16), se2w[...],
                    preferred_element_type=jnp.float32) + se2b[...]
        s = jnp.clip(s + 3.0, 0.0, 6.0) * (1.0 / 6.0)  # hard-sigmoid
        h = h * s

    # --- project 1x1 (MXU), linear; lane-dense (channels padded to 128) store ---
    out = jnp.dot(h.astype(jnp.bfloat16), projw[...],
                  preferred_element_type=jnp.float32) + projb[...]
    o_ref[0] = out.astype(o_ref.dtype)


def fused_inverted_residual(x_flat, H, W, p, stride, act, use_se, pre=None):
    """x_flat: (B, H*W, Cin) bf16 -> (B, Ho*Wo, Cout) bf16 in one pallas_call."""
    B, HW, Cin = x_flat.shape
    Cexp = p["exp_w"].shape[1]
    Cout = p["proj_w"].shape[1]
    Ho = (H - 1) // stride + 1
    Wo = (W - 1) // stride + 1
    wpad = _round_up(W + 1, 8)            # flat row-pad (keeps the data store aligned)

    # column-edge masks for the flat (row-major) depthwise taps
    col = np.arange(HW, dtype=np.int64) % W
    lmask = jnp.asarray((col != 0).astype(np.float32)[:, None])        # (HW, 1)
    rmask = jnp.asarray((col != W - 1).astype(np.float32)[:, None])    # (HW, 1)

    args = [x_flat, lmask, rmask]
    if pre is not None:
        args += [pre["w"], pre["b"]]
    args += [p["exp_w"], p["exp_b"], p["dw_w"], p["dw_b"]]
    if stride != 1:
        rs = np.eye(H, dtype=np.float32)[::stride][:Ho]
        cs = np.eye(W, dtype=np.float32)[::stride][:Wo]
        args += [jnp.asarray(np.kron(rs, cs), jnp.bfloat16)]           # (Ho*Wo, H*W)
    if use_se:
        args += [p["se1_w"], p["se1_b"], p["se2_w"], p["se2_b"]]
    args += [p["proj_w"], p["proj_b"]]

    in_specs = [pl.BlockSpec((1, HW, Cin), lambda b: (b, 0, 0))]
    in_specs += [_full_spec(a.shape, 1) for a in args[1:]]

    out = pl.pallas_call(
        functools.partial(_ir_kernel, H=H, W=W, stride=stride, act=act,
                          use_se=use_se, has_pre=pre is not None, wpad=wpad),
        out_shape=jax.ShapeDtypeStruct((B, Ho * Wo, Cout), jnp.bfloat16),
        grid=(B,),
        in_specs=in_specs,
        out_specs=pl.BlockSpec((1, Ho * Wo, Cout), lambda b: (b, 0, 0)),
        scratch_shapes=[
            pltpu.VMEM((2 * wpad + HW, Cexp), jnp.float32),   # flat padded expanded map
        ],
        compiler_params=pltpu.CompilerParams(
            dimension_semantics=("parallel",),
            vmem_limit_bytes=_VMEM_LIMIT),
    )(*args)
    return out, Ho, Wo


# ------------------- fused 'high' conv + bilinear resize + depth head --------------
def _bilinear_matrix(n_in, n_out):
    """Exact PyTorch F.interpolate(mode='bilinear', align_corners=False) weights."""
    scale = n_in / n_out
    d = (np.arange(n_out, dtype=np.float64) + 0.5) * scale - 0.5
    d = np.maximum(d, 0.0)
    i0 = np.minimum(np.floor(d).astype(np.int64), n_in - 1)
    i1 = np.minimum(i0 + 1, n_in - 1)
    w1 = d - i0
    m = np.zeros((n_out, n_in), np.float32)
    m[np.arange(n_out), i0] += (1.0 - w1)
    m[np.arange(n_out), i1] += w1
    return m


def _high_head_kernel(ft_ref, hw_ref, hb_ref, m2t_ref, w1_ref, b1_ref,
                      w2_ref, b2_ref, o_ref, hi_ref):
    # 'high' features computed once per batch element, kept in a bf16 VMEM scratch.
    # TODO(synk): on v7x with B==1, recompute hi per chunk and mark both axes parallel
    # to use the second TensorCore.
    @pl.when(pl.program_id(1) == 0)
    def _():
        hi = jnp.dot(hw_ref[...], ft_ref[0],
                     preferred_element_type=jnp.float32) + hb_ref[...]
        hi_ref[...] = _act(hi, "hardswish").astype(hi_ref.dtype)

    # bilinear upsample of this lane chunk: bf16 x bf16 MXU matmul, f32 accumulate
    up = jnp.dot(hi_ref[...], m2t_ref[...],
                 preferred_element_type=jnp.float32)          # (C_HIGH, TN) f32
    # depth head (Conv1x1 -> ReLU -> Conv1x1) in transposed layout: the final store
    # is a lane-dense (1, TN) row.
    z = jnp.dot(w1_ref[...], up.astype(jnp.bfloat16),
                preferred_element_type=jnp.float32) + b1_ref[...]
    z = jnp.maximum(z, 0.0)
    y = jnp.dot(w2_ref[...], z.astype(jnp.bfloat16),
                preferred_element_type=jnp.float32) + b2_ref[...]
    o_ref[0] = y.astype(o_ref.dtype)


def fused_high_resize_head(feats, H, W, params, hout, wout):
    """(B, H*W, Cb) bf16 backbone features -> (B, hout, wout) f32 depth map."""
    B, S, Cb = feats.shape
    ft = jnp.transpose(feats, (0, 2, 1))                       # (B, Cb, S) tiny glue
    m2t = jnp.asarray(
        np.kron(_bilinear_matrix(H, hout), _bilinear_matrix(W, wout)).T,
        jnp.bfloat16)                                          # (S, mout) bf16
    mout = hout * wout
    tn = _pick_tile(mout, _TN_HEAD, 128)                       # divides mout exactly
    grid = (B, mout // tn)

    args = [ft, params["high_wT"], params["high_b"], m2t,
            params["head1_wT"], params["head1_b"],
            params["head2_wT"], params["head2_b"]]
    in_specs = [pl.BlockSpec((1, Cb, S), lambda b, c: (b, 0, 0)),
                _full_spec(params["high_wT"].shape, 2),
                _full_spec(params["high_b"].shape, 2),
                pl.BlockSpec((S, tn), lambda b, c: (0, c)),
                _full_spec(params["head1_wT"].shape, 2),
                _full_spec(params["head1_b"].shape, 2),
                _full_spec(params["head2_wT"].shape, 2),
                _full_spec(params["head2_b"].shape, 2)]

    out = pl.pallas_call(
        _high_head_kernel,
        out_shape=jax.ShapeDtypeStruct((B, 1, mout), jnp.float32),   # full-sublane blocks
        grid=grid,
        in_specs=in_specs,
        out_specs=pl.BlockSpec((1, 1, tn), lambda b, c: (b, 0, c)),
        scratch_shapes=[pltpu.VMEM((params["high_wT"].shape[0], S), jnp.bfloat16)],
        compiler_params=pltpu.CompilerParams(
            dimension_semantics=("parallel", "arbitrary"),
            vmem_limit_bytes=_VMEM_LIMIT),
    )(*args)
    return out.reshape(B, hout, wout)


# ----------------------------- parameters ------------------------------------------
def _init(key, shape, dtype, scale=0.1):
    return (scale * jax.random.normal(key, shape, jnp.float32)).astype(dtype)


def _zpad(a, rows, cols):
    """Zero-pad a 2-D param to (rows, cols); padded channels are exact zeros, so the
    padded model is mathematically identical to the unpadded one."""
    r, c = a.shape
    return jnp.pad(a, ((0, rows - r), (0, cols - c)))


def _r128(n):
    return _round_up(n, 128)


def make_params(key):
    ks = iter(jax.random.split(key, 64))

    def wgt(shape):   # MXU weights: bf16 storage (native MXU input dtype)
        return _init(next(ks), shape, jnp.bfloat16)

    def vec(shape):   # biases / VPU-side params: f32 (v5e has no bf16 VPU path)
        return _init(next(ks), shape, jnp.float32)

    p = {"stem_w": wgt((27, C_STEM)), "stem_b": vec((1, C_STEM))}

    def ir_block(cin_l, cin_p, cexp, cout, use_se):
        ce, co = _r128(cexp), _r128(cout)                      # lane-fill channel widths
        d = {"exp_w": _zpad(wgt((cin_l, cexp)), cin_p, ce),
             "exp_b": _zpad(vec((1, cexp)), 1, ce),
             "dw_w": _zpad(vec((9, cexp)), 9, ce),
             "dw_b": _zpad(vec((1, cexp)), 1, ce),
             "proj_w": _zpad(wgt((cexp, cout)), ce, co),
             "proj_b": _zpad(vec((1, cout)), 1, co)}
        if use_se:
            cse = max(8, cexp // 4)
            cs = _r128(cse)
            d.update({"se1_w": _zpad(wgt((cexp, cse)), ce, cs),
                      "se1_b": _zpad(vec((1, cse)), 1, cs),
                      "se2_w": _zpad(wgt((cse, cexp)), cs, ce),
                      "se2_b": _zpad(vec((1, cexp)), 1, ce)})
        return d, co

    p["b1"], c1 = ir_block(C_STEM, C_STEM, 64, 24, True)        # real: 16->64->24, SE
    p["b2"], c2 = ir_block(24, c1, 72, 40, False)               # real: 24->72->40
    p["b3"], c3 = ir_block(40, c2, 120, 80, True)               # real: 40->120->80, SE

    # final 1x1 conv to the 'high' features + depth head, stored pre-transposed for
    # the lane-dense fused resize+head kernel.
    p["high_wT"] = _zpad(wgt((C_HIGH, 80)), C_HIGH, c3)
    p["high_b"] = vec((C_HIGH, 1))
    p["head1_wT"] = wgt((HEAD_HIDDEN, C_HIGH))
    p["head1_b"] = vec((HEAD_HIDDEN, 1))
    p["head2_wT"] = wgt((1, HEAD_HIDDEN))
    p["head2_b"] = vec((1, 1))
    return p


# ----------------------------- model forward ---------------------------------------
def lraspp_forward(params, x_nchw):
    # PyTorch NCHW input -> NHWC (channels on the lane axis), bf16 storage.
    x = jnp.transpose(x_nchw, (0, 2, 3, 1)).astype(jnp.bfloat16)

    # --- backbone (abridged MobileNetV3-Large, stride-16 'high' features) ---
    patches, H, W = _im2col3x3(x, stride=2)                    # stem patches (B, HW, 27)
    h, H, W = fused_inverted_residual(
        patches, H, W, params["b1"], 2, "relu", True,
        pre={"w": params["stem_w"], "b": params["stem_b"]})    # stem fused as prologue
    h, H, W = fused_inverted_residual(h, H, W, params["b2"], 2, "hardswish", False)
    h, H, W = fused_inverted_residual(h, H, W, params["b3"], 2, "hardswish", True)

    # --- high 1x1 conv + F.interpolate(size=UP_SIZE, bilinear, align_corners=False)
    #     + depth head, fused into one kernel; output is already (B, Hout, Wout) ---
    return fused_high_resize_head(h, H, W, params, UP_SIZE[0], UP_SIZE[1])


# ----------------------------- main -------------------------------------------------
if __name__ == "__main__":
    key = jax.random.PRNGKey(0)
    kx, kp = jax.random.split(key)
    # small demo shape consistent with an RGB image input (spatial divisible by 16)
    x = jax.random.normal(kx, (2, 3, 32, 32), jnp.float32)   # NCHW like PyTorch
    params = make_params(kp)

    fwd = jax.jit(lraspp_forward)
    out = fwd(params, x)
    jax.block_until_ready(out)
    assert out.shape == (2, UP_SIZE[0], UP_SIZE[1]), out.shape
    assert out.dtype == jnp.float32, out.dtype
    print("KERNEL_OK")
</pallas_src>

<mosaic_0001>
module attributes {stable_mosaic.version = 11 : i64} {
  func.func @_ir_kernel(%arg0: i32, %arg1: memref<1x256x27xbf16, #tpu.memory_space<vmem>>, %arg2: memref<256x1xf32, #tpu.memory_space<vmem>>, %arg3: memref<256x1xf32, #tpu.memory_space<vmem>>, %arg4: memref<27x16xbf16, #tpu.memory_space<vmem>>, %arg5: memref<1x16xf32, #tpu.memory_space<vmem>>, %arg6: memref<16x128xbf16, #tpu.memory_space<vmem>>, %arg7: memref<1x128xf32, #tpu.memory_space<vmem>>, %arg8: memref<9x128xf32, #tpu.memory_space<vmem>>, %arg9: memref<1x128xf32, #tpu.memory_space<vmem>>, %arg10: memref<64x256xbf16, #tpu.memory_space<vmem>>, %arg11: memref<128x128xbf16, #tpu.memory_space<vmem>>, %arg12: memref<1x128xf32, #tpu.memory_space<vmem>>, %arg13: memref<128x128xbf16, #tpu.memory_space<vmem>>, %arg14: memref<1x128xf32, #tpu.memory_space<vmem>>, %arg15: memref<128x128xbf16, #tpu.memory_space<vmem>>, %arg16: memref<1x128xf32, #tpu.memory_space<vmem>>, %arg17: memref<1x64x128xbf16, #tpu.memory_space<vmem>>, %arg18: memref<304x128xf32, #tpu.memory_space<vmem>>) attributes {dimension_semantics = [#tpu.dimension_semantics<parallel>], iteration_bounds = array<i64: 2>, scalar_prefetch = 0 : i64, scratch_operands = 1 : i64, tpu.core_type = #tpu.core_type<tc>, window_params = [{transform_indices = @transform_0, window_bounds = array<i64: 1, 256, 27>}, {pipeline_mode = #tpu.pipeline_mode<synchronous>, transform_indices = @transform_1, window_bounds = array<i64: 256, 1>}, {pipeline_mode = #tpu.pipeline_mode<synchronous>, transform_indices = @transform_2, window_bounds = array<i64: 256, 1>}, {pipeline_mode = #tpu.pipeline_mode<synchronous>, transform_indices = @transform_3, window_bounds = array<i64: 27, 16>}, {pipeline_mode = #tpu.pipeline_mode<synchronous>, transform_indices = @transform_4, window_bounds = array<i64: 1, 16>}, {pipeline_mode = #tpu.pipeline_mode<synchronous>, transform_indices = @transform_5, window_bounds = array<i64: 16, 128>}, {pipeline_mode = #tpu.pipeline_mode<synchronous>, transform_indices = @transform_6, window_bounds = array<i64: 1, 128>}, {pipeline_mode = #tpu.pipeline_mode<synchronous>, transform_indices = @transform_7, window_bounds = array<i64: 9, 128>}, {pipeline_mode = #tpu.pipeline_mode<synchronous>, transform_indices = @transform_8, window_bounds = array<i64: 1, 128>}, {pipeline_mode = #tpu.pipeline_mode<synchronous>, transform_indices = @transform_9, window_bounds = array<i64: 64, 256>}, {pipeline_mode = #tpu.pipeline_mode<synchronous>, transform_indices = @transform_10, window_bounds = array<i64: 128, 128>}, {pipeline_mode = #tpu.pipeline_mode<synchronous>, transform_indices = @transform_11, window_bounds = array<i64: 1, 128>}, {pipeline_mode = #tpu.pipeline_mode<synchronous>, transform_indices = @transform_12, window_bounds = array<i64: 128, 128>}, {pipeline_mode = #tpu.pipeline_mode<synchronous>, transform_indices = @transform_13, window_bounds = array<i64: 1, 128>}, {pipeline_mode = #tpu.pipeline_mode<synchronous>, transform_indices = @transform_14, window_bounds = array<i64: 128, 128>}, {pipeline_mode = #tpu.pipeline_mode<synchronous>, transform_indices = @transform_15, window_bounds = array<i64: 1, 128>}, {transform_indices = @transform_16, window_bounds = array<i64: 1, 64, 128>}]} {
    %c0 = arith.constant 0 : index
    %c0_0 = arith.constant 0 : index
    %c0_1 = arith.constant 0 : index
    %0 = vector.load %arg1[%c0, %c0_0, %c0_1] : memref<1x256x27xbf16, #tpu.memory_space<vmem>>, vector<1x256x27xbf16>
    %1 = vector.shape_cast %0 : vector<1x256x27xbf16> to vector<256x27xbf16>
    %c0_2 = arith.constant 0 : index
    %c0_3 = arith.constant 0 : index
    %2 = vector.load %arg4[%c0_2, %c0_3] : memref<27x16xbf16, #tpu.memory_space<vmem>>, vector<27x16xbf16>
    %cst = arith.constant dense<0.000000e+00> : vector<256x16xf32>
    %3 = tpu.matmul %1, %2, %cst {dimension_numbers = #tpu.dot_dimension_numbers<[1], [0], [0], [1], [0, 0, 1, 1], [], []>} : vector<256x27xbf16>, vector<27x16xbf16>, vector<256x16xf32> -> vector<256x16xf32>
    %c0_4 = arith.constant 0 : index
    %c0_5 = arith.constant 0 : index
    %4 = vector.load %arg5[%c0_4, %c0_5] : memref<1x16xf32, #tpu.memory_space<vmem>>, vector<1x16xf32>
    %5 = vector.broadcast %4 : vector<1x16xf32> to vector<256x16xf32>
    %6 = arith.addf %3, %5 : vector<256x16xf32>
    %cst_6 = arith.constant 3.000000e+00 : f32
    %7 = vector.broadcast %cst_6 : f32 to vector<256x16xf32>
    %8 = arith.addf %6, %7 : vector<256x16xf32>
    %cst_7 = arith.constant 0.000000e+00 : f32
    %cst_8 = arith.constant 6.000000e+00 : f32
    %9 = vector.broadcast %cst_7 : f32 to vector<256x16xf32>
    %10 = arith.maximumf %9, %8 : vector<256x16xf32>
    %11 = vector.broadcast %cst_8 : f32 to vector<256x16xf32>
    %12 = arith.minimumf %11, %10 : vector<256x16xf32>
    %13 = arith.mulf %6, %12 : vector<256x16xf32>
    %cst_9 = arith.constant 0.166666672 : f32
    %14 = vector.broadcast %cst_9 : f32 to vector<256x16xf32>
    %15 = arith.mulf %13, %14 : vector<256x16xf32>
    %16 = arith.truncf %15 : vector<256x16xf32> to vector<256x16xbf16>
    %c0_10 = arith.constant 0 : index
    %c0_11 = arith.constant 0 : index
    %17 = vector.load %arg6[%c0_10, %c0_11] : memref<16x128xbf16, #tpu.memory_space<vmem>>, vector<16x128xbf16>
    %cst_12 = arith.constant dense<0.000000e+00> : vector<256x128xf32>
    %18 = tpu.matmul %16, %17, %cst_12 {dimension_numbers = #tpu.dot_dimension_numbers<[1], [0], [0], [1], [0, 0, 1, 1], [], []>} : vector<256x16xbf16>, vector<16x128xbf16>, vector<256x128xf32> -> vector<256x128xf32>
    %c0_13 = arith.constant 0 : index
    %c0_14 = arith.constant 0 : index
    %19 = vector.load %arg7[%c0_13, %c0_14] : memref<1x128xf32, #tpu.memory_space<vmem>>, vector<1x128xf32>
    %20 = vector.broadcast %19 : vector<1x128xf32> to vector<256x128xf32>
    %21 = arith.addf %18, %20 : vector<256x128xf32>
    %cst_15 = arith.constant 0.000000e+00 : f32
    %22 = vector.broadcast %cst_15 : f32 to vector<256x128xf32>
    %23 = arith.maximumf %21, %22 : vector<256x128xf32>
    %cst_16 = arith.constant 0.000000e+00 : f32
    %24 = vector.broadcast %cst_16 : f32 to vector<24x128xf32>
    %c0_17 = arith.constant 0 : index
    %c0_18 = arith.constant 0 : index
    %25 = vector.load %arg18[%c0_17, %c0_18] : memref<304x128xf32, #tpu.memory_space<vmem>>, vector<24x128xf32>
    tpu.vector_store %arg18[%c0_17, %c0_18], %24 {strides = array<i32>} : memref<304x128xf32, #tpu.memory_space<vmem>>, vector<24x128xf32>,
    %c280 = arith.constant 280 : index
    %c0_19 = arith.constant 0 : index
    %26 = vector.load %arg18[%c280, %c0_19] : memref<304x128xf32, #tpu.memory_space<vmem>>, vector<24x128xf32>
    tpu.vector_store %arg18[%c280, %c0_19], %24 {strides = array<i32>} : memref<304x128xf32, #tpu.memory_space<vmem>>, vector<24x128xf32>,
    %c24 = arith.constant 24 : index
    %c0_20 = arith.constant 0 : index
    %27 = vector.load %arg18[%c24, %c0_20] : memref<304x128xf32, #tpu.memory_space<vmem>>, vector<256x128xf32>
    tpu.vector_store %arg18[%c24, %c0_20], %23 {strides = array<i32>} : memref<304x128xf32, #tpu.memory_space<vmem>>, vector<256x128xf32>,
    %c0_21 = arith.constant 0 : index
    %c0_22 = arith.constant 0 : index
    %28 = vector.load %arg8[%c0_21, %c0_22] : memref<9x128xf32, #tpu.memory_space<vmem>>, vector<9x128xf32>
    %c7 = arith.constant 7 : index
    %c0_23 = arith.constant 0 : index
    %29 = vector.load %arg18[%c7, %c0_23] : memref<304x128xf32, #tpu.memory_space<vmem>>, vector<256x128xf32>
    %30 = vector.extract_strided_slice %28 {offsets = [0, 0], sizes = [1, 128], strides = [1, 1]} : vector<9x128xf32> to vector<1x128xf32>
    %31 = vector.broadcast %30 : vector<1x128xf32> to vector<256x128xf32>
    %32 = arith.mulf %29, %31 : vector<256x128xf32>
    %c23 = arith.constant 23 : index
    %c0_24 = arith.constant 0 : index
    %33 = vector.load %arg18[%c23, %c0_24] : memref<304x128xf32, #tpu.memory_space<vmem>>, vector<256x128xf32>
    %34 = vector.extract_strided_slice %28 {offsets = [3, 0], sizes = [1, 128], strides = [1, 1]} : vector<9x128xf32> to vector<1x128xf32>
    %35 = vector.broadcast %34 : vector<1x128xf32> to vector<256x128xf32>
    %36 = arith.mulf %33, %35 : vector<256x128xf32>
    %37 = arith.addf %32, %36 : vector<256x128xf32>
    %c39 = arith.constant 39 : index
    %c0_25 = arith.constant 0 : index
    %38 = vector.load %arg18[%c39, %c0_25] : memref<304x128xf32, #tpu.memory_space<vmem>>, vector<256x128xf32>
    %39 = vector.extract_strided_slice %28 {offsets = [6, 0], sizes = [1, 128], strides = [1, 1]} : vector<9x128xf32> to vector<1x128xf32>
    %40 = vector.broadcast %39 : vector<1x128xf32> to vector<256x128xf32>
    %41 = arith.mulf %38, %40 : vector<256x128xf32>
    %42 = arith.addf %37, %41 : vector<256x128xf32>
    %c0_26 = arith.constant 0 : index
    %c0_27 = arith.constant 0 : index
    %43 = vector.load %arg2[%c0_26, %c0_27] : memref<256x1xf32, #tpu.memory_space<vmem>>, vector<256x1xf32>
    %44 = vector.broadcast %43 : vector<256x1xf32> to vector<256x128xf32>
    %45 = arith.mulf %42, %44 : vector<256x128xf32>
    %c8 = arith.constant 8 : index
    %c0_28 = arith.constant 0 : index
    %46 = vector.load %arg18[%c8, %c0_28] : memref<304x128xf32, #tpu.memory_space<vmem>>, vector<256x128xf32>
    %47 = vector.extract_strided_slice %28 {offsets = [1, 0], sizes = [1, 128], strides = [1, 1]} : vector<9x128xf32> to vector<1x128xf32>
    %48 = vector.broadcast %47 : vector<1x128xf32> to vector<256x128xf32>
    %49 = arith.mulf %46, %48 : vector<256x128xf32>
    %c24_29 = arith.constant 24 : index
    %c0_30 = arith.constant 0 : index
    %50 = vector.load %arg18[%c24_29, %c0_30] : memref<304x128xf32, #tpu.memory_space<vmem>>, vector<256x128xf32>
    %51 = vector.extract_strided_slice %28 {offsets = [4, 0], sizes = [1, 128], strides = [1, 1]} : vector<9x128xf32> to vector<1x128xf32>
    %52 = vector.broadcast %51 : vector<1x128xf32> to vector<256x128xf32>
    %53 = arith.mulf %50, %52 : vector<256x128xf32>
    %54 = arith.addf %49, %53 : vector<256x128xf32>
    %c40 = arith.constant 40 : index
    %c0_31 = arith.constant 0 : index
    %55 = vector.load %arg18[%c40, %c0_31] : memref<304x128xf32, #tpu.memory_space<vmem>>, vector<256x128xf32>
    %56 = vector.extract_strided_slice %28 {offsets = [7, 0], sizes = [1, 128], strides = [1, 1]} : vector<9x128xf32> to vector<1x128xf32>
    %57 = vector.broadcast %56 : vector<1x128xf32> to vector<256x128xf32>
    %58 = arith.mulf %55, %57 : vector<256x128xf32>
    %59 = arith.addf %54, %58 : vector<256x128xf32>
    %60 = arith.addf %45, %59 : vector<256x128xf32>
    %c9 = arith.constant 9 : index
    %c0_32 = arith.constant 0 : index
    %61 = vector.load %arg18[%c9, %c0_32] : memref<304x128xf32, #tpu.memory_space<vmem>>, vector<256x128xf32>
    %62 = vector.extract_strided_slice %28 {offsets = [2, 0], sizes = [1, 128], strides = [1, 1]} : vector<9x128xf32> to vector<1x128xf32>
    %63 = vector.broadcast %62 : vector<1x128xf32> to vector<256x128xf32>
    %64 = arith.mulf %61, %63 : vector<256x128xf32>
    %c25 = arith.constant 25 : index
    %c0_33 = arith.constant 0 : index
    %65 = vector.load %arg18[%c25, %c0_33] : memref<304x128xf32, #tpu.memory_space<vmem>>, vector<256x128xf32>
    %66 = vector.extract_strided_slice %28 {offsets = [5, 0], sizes = [1, 128], strides = [1, 1]} : vector<9x128xf32> to vector<1x128xf32>
    %67 = vector.broadcast %66 : vector<1x128xf32> to vector<256x128xf32>
    %68 = arith.mulf %65, %67 : vector<256x128xf32>
    %69 = arith.addf %64, %68 : vector<256x128xf32>
    %c41 = arith.constant 41 : index
    %c0_34 = arith.constant 0 : index
    %70 = vector.load %arg18[%c41, %c0_34] : memref<304x128xf32, #tpu.memory_space<vmem>>, vector<256x128xf32>
    %71 = vector.extract_strided_slice %28 {offsets = [8, 0], sizes = [1, 128], strides = [1, 1]} : vector<9x128xf32> to vector<1x128xf32>
    %72 = vector.broadcast %71 : vector<1x128xf32> to vector<256x128xf32>
    %73 = arith.mulf %70, %72 : vector<256x128xf32>
    %74 = arith.addf %69, %73 : vector<256x128xf32>
    %c0_35 = arith.constant 0 : index
    %c0_36 = arith.constant 0 : index
    %75 = vector.load %arg3[%c0_35, %c0_36] : memref<256x1xf32, #tpu.memory_space<vmem>>, vector<256x1xf32>
    %76 = vector.broadcast %75 : vector<256x1xf32> to vector<256x128xf32>
    %77 = arith.mulf %74, %76 : vector<256x128xf32>
    %78 = arith.addf %60, %77 : vector<256x128xf32>
    %c0_37 = arith.constant 0 : index
    %c0_38 = arith.constant 0 : index
    %79 = vector.load %arg9[%c0_37, %c0_38] : memref<1x128xf32, #tpu.memory_space<vmem>>, vector<1x128xf32>
    %80 = vector.broadcast %79 : vector<1x128xf32> to vector<256x128xf32>
    %81 = arith.addf %78, %80 : vector<256x128xf32>
    %cst_39 = arith.constant 0.000000e+00 : f32
    %82 = vector.broadcast %cst_39 : f32 to vector<256x128xf32>
    %83 = arith.maximumf %81, %82 : vector<256x128xf32>
    %c0_40 = arith.constant 0 : index
    %c0_41 = arith.constant 0 : index
    %84 = vector.load %arg10[%c0_40, %c0_41] : memref<64x256xbf16, #tpu.memory_space<vmem>>, vector<64x256xbf16>
    %85 = arith.truncf %83 : vector<256x128xf32> to vector<256x128xbf16>
    %cst_42 = arith.constant dense<0.000000e+00> : vector<64x128xf32>
    %86 = tpu.matmul %84, %85, %cst_42 {dimension_numbers = #tpu.dot_dimension_numbers<[1], [0], [0], [1], [0, 0, 1, 1], [], []>} : vector<64x256xbf16>, vector<256x128xbf16>, vector<64x128xf32> -> vector<64x128xf32>
    %cst_43 = arith.constant dense<0.000000e+00> : vector<128xf32>
    %87 = vector.multi_reduction <add>, %86, %cst_43 [0] : vector<64x128xf32> to vector<128xf32>
    %88 = vector.shape_cast %87 : vector<128xf32> to vector<1x128xf32>
    %cst_44 = arith.constant 6.400000e+01 : f32
    %89 = vector.broadcast %cst_44 : f32 to vector<1x128xf32>
    %90 = arith.divf %88, %89 : vector<1x128xf32>
    %91 = arith.truncf %90 : vector<1x128xf32> to vector<1x128xbf16>
    %c0_45 = arith.constant 0 : index
    %c0_46 = arith.constant 0 : index
    %92 = vector.load %arg11[%c0_45, %c0_46] : memref<128x128xbf16, #tpu.memory_space<vmem>>, vector<128x128xbf16>
    %cst_47 = arith.constant dense<0.000000e+00> : vector<1x128xf32>
    %93 = tpu.matmul %91, %92, %cst_47 {dimension_numbers = #tpu.dot_dimension_numbers<[1], [0], [0], [1], [0, 0, 1, 1], [], []>} : vector<1x128xbf16>, vector<128x128xbf16>, vector<1x128xf32> -> vector<1x128xf32>
    %c0_48 = arith.constant 0 : index
    %c0_49 = arith.constant 0 : index
    %94 = vector.load %arg12[%c0_48, %c0_49] : memref<1x128xf32, #tpu.memory_space<vmem>>, vector<1x128xf32>
    %95 = arith.addf %93, %94 : vector<1x128xf32>
    %cst_50 = arith.constant 0.000000e+00 : f32
    %96 = vector.broadcast %cst_50 : f32 to vector<1x128xf32>
    %97 = arith.maximumf %95, %96 : vector<1x128xf32>
    %98 = arith.truncf %97 : vector<1x128xf32> to vector<1x128xbf16>
    %c0_51 = arith.constant 0 : index
    %c0_52 = arith.constant 0 : index
    %99 = vector.load %arg13[%c0_51, %c0_52] : memref<128x128xbf16, #tpu.memory_space<vmem>>, vector<128x128xbf16>
    %cst_53 = arith.constant dense<0.000000e+00> : vector<1x128xf32>
    %100 = tpu.matmul %98, %99, %cst_53 {dimension_numbers = #tpu.dot_dimension_numbers<[1], [0], [0], [1], [0, 0, 1, 1], [], []>} : vector<1x128xbf16>, vector<128x128xbf16>, vector<1x128xf32> -> vector<1x128xf32>
    %c0_54 = arith.constant 0 : index
    %c0_55 = arith.constant 0 : index
    %101 = vector.load %arg14[%c0_54, %c0_55] : memref<1x128xf32, #tpu.memory_space<vmem>>, vector<1x128xf32>
    %102 = arith.addf %100, %101 : vector<1x128xf32>
    %cst_56 = arith.constant 3.000000e+00 : f32
    %103 = vector.broadcast %cst_56 : f32 to vector<1x128xf32>
    %104 = arith.addf %102, %103 : vector<1x128xf32>
    %cst_57 = arith.constant 0.000000e+00 : f32
    %cst_58 = arith.constant 6.000000e+00 : f32
    %105 = vector.broadcast %cst_57 : f32 to vector<1x128xf32>
    %106 = arith.maximumf %105, %104 : vector<1x128xf32>
    %107 = vector.broadcast %cst_58 : f32 to vector<1x128xf32>
    %108 = arith.minimumf %107, %106 : vector<1x128xf32>
    %cst_59 = arith.constant 0.166666672 : f32
    %109 = vector.broadcast %cst_59 : f32 to vector<1x128xf32>
    %110 = arith.mulf %108, %109 : vector<1x128xf32>
    %111 = vector.broadcast %110 : vector<1x128xf32> to vector<64x128xf32>
    %112 = arith.mulf %86, %111 : vector<64x128xf32>
    %113 = arith.truncf %112 : vector<64x128xf32> to vector<64x128xbf16>
    %c0_60 = arith.constant 0 : index
    %c0_61 = arith.constant 0 : index
    %114 = vector.load %arg15[%c0_60, %c0_61] : memref<128x128xbf16, #tpu.memory_space<vmem>>, vector<128x128xbf16>
    %cst_62 = arith.constant dense<0.000000e+00> : vector<64x128xf32>
    %115 = tpu.matmul %113, %114, %cst_62 {dimension_numbers = #tpu.dot_dimension_numbers<[1], [0], [0], [1], [0, 0, 1, 1], [], []>} : vector<64x128xbf16>, vector<128x128xbf16>, vector<64x128xf32> -> vector<64x128xf32>
    %c0_63 = arith.constant 0 : index
    %c0_64 = arith.constant 0 : index
    %116 = vector.load %arg16[%c0_63, %c0_64] : memref<1x128xf32, #tpu.memory_space<vmem>>, vector<1x128xf32>
    %117 = vector.broadcast %116 : vector<1x128xf32> to vector<64x128xf32>
    %118 = arith.addf %115, %117 : vector<64x128xf32>
    %119 = arith.truncf %118 : vector<64x128xf32> to vector<64x128xbf16>
    %c0_65 = arith.constant 0 : index
    %c0_66 = arith.constant 0 : index
    %c0_67 = arith.constant 0 : index
    %120 = vector.load %arg17[%c0_65, %c0_66, %c0_67] : memref<1x64x128xbf16, #tpu.memory_space<vmem>>, vector<1x64x128xbf16>
    %121 = vector.shape_cast %120 : vector<1x64x128xbf16> to vector<64x128xbf16>
    %122 = vector.shape_cast %119 : vector<64x128xbf16> to vector<1x64x128xbf16>
    tpu.vector_store %arg17[%c0_65, %c0_66, %c0_67], %122 {strides = array<i32>} : memref<1x64x128xbf16, #tpu.memory_space<vmem>>, vector<1x64x128xbf16>,
    return
  }
  func.func @transform_0(%arg0: i32) -> (i32, i32, i32) {
    %c0_i32 = arith.constant 0 : i32
    %c0_i32_0 = arith.constant 0 : i32
    %c0_i32_1 = arith.constant 0 : i32
    return %arg0, %c0_i32, %c0_i32_0 : i32, i32, i32
  }
  func.func @transform_1(%arg0: i32) -> (i32, i32) {
    %c0_i32 = arith.constant 0 : i32
    %c0_i32_0 = arith.constant 0 : i32
    %c0_i32_1 = arith.constant 0 : i32
    return %c0_i32, %c0_i32_0 : i32, i32
  }
  func.func @transform_2(%arg0: i32) -> (i32, i32) {
    %c0_i32 = arith.constant 0 : i32
    %c0_i32_0 = arith.constant 0 : i32
    %c0_i32_1 = arith.constant 0 : i32
    return %c0_i32, %c0_i32_0 : i32, i32
  }
  func.func @transform_3(%arg0: i32) -> (i32, i32) {
    %c0_i32 = arith.constant 0 : i32
    %c0_i32_0 = arith.constant 0 : i32
    %c0_i32_1 = arith.constant 0 : i32
    return %c0_i32, %c0_i32_0 : i32, i32
  }
  func.func @transform_4(%arg0: i32) -> (i32, i32) {
    %c0_i32 = arith.constant 0 : i32
    %c0_i32_0 = arith.constant 0 : i32
    %c0_i32_1 = arith.constant 0 : i32
    return %c0_i32, %c0_i32_0 : i32, i32
  }
  func.func @transform_5(%arg0: i32) -> (i32, i32) {
    %c0_i32 = arith.constant 0 : i32
    %c0_i32_0 = arith.constant 0 : i32
    %c0_i32_1 = arith.constant 0 : i32
    return %c0_i32, %c0_i32_0 : i32, i32
  }
  func.func @transform_6(%arg0: i32) -> (i32, i32) {
    %c0_i32 = arith.constant 0 : i32
    %c0_i32_0 = arith.constant 0 : i32
    %c0_i32_1 = arith.constant 0 : i32
    return %c0_i32, %c0_i32_0 : i32, i32
  }
  func.func @transform_7(%arg0: i32) -> (i32, i32) {
    %c0_i32 = arith.constant 0 : i32
    %c0_i32_0 = arith.constant 0 : i32
    %c0_i32_1 = arith.constant 0 : i32
    return %c0_i32, %c0_i32_0 : i32, i32
  }
  func.func @transform_8(%arg0: i32) -> (i32, i32) {
    %c0_i32 = arith.constant 0 : i32
    %c0_i32_0 = arith.constant 0 : i32
    %c0_i32_1 = arith.constant 0 : i32
    return %c0_i32, %c0_i32_0 : i32, i32
  }
  func.func @transform_9(%arg0: i32) -> (i32, i32) {
    %c0_i32 = arith.constant 0 : i32
    %c0_i32_0 = arith.constant 0 : i32
    %c0_i32_1 = arith.constant 0 : i32
    return %c0_i32, %c0_i32_0 : i32, i32
  }
  func.func @transform_10(%arg0: i32) -> (i32, i32) {
    %c0_i32 = arith.constant 0 : i32
    %c0_i32_0 = arith.constant 0 : i32
    %c0_i32_1 = arith.constant 0 : i32
    return %c0_i32, %c0_i32_0 : i32, i32
  }
  func.func @transform_11(%arg0: i32) -> (i32, i32) {
    %c0_i32 = arith.constant 0 : i32
    %c0_i32_0 = arith.constant 0 : i32
    %c0_i32_1 = arith.constant 0 : i32
    return %c0_i32, %c0_i32_0 : i32, i32
  }
  func.func @transform_12(%arg0: i32) -> (i32, i32) {
    %c0_i32 = arith.constant 0 : i32
    %c0_i32_0 = arith.constant 0 : i32
    %c0_i32_1 = arith.constant 0 : i32
    return %c0_i32, %c0_i32_0 : i32, i32
  }
  func.func @transform_13(%arg0: i32) -> (i32, i32) {
    %c0_i32 = arith.constant 0 : i32
    %c0_i32_0 = arith.constant 0 : i32
    %c0_i32_1 = arith.constant 0 : i32
    return %c0_i32, %c0_i32_0 : i32, i32
  }
  func.func @transform_14(%arg0: i32) -> (i32, i32) {
    %c0_i32 = arith.constant 0 : i32
    %c0_i32_0 = arith.constant 0 : i32
    %c0_i32_1 = arith.constant 0 : i32
    return %c0_i32, %c0_i32_0 : i32, i32
  }
  func.func @transform_15(%arg0: i32) -> (i32, i32) {
    %c0_i32 = arith.constant 0 : i32
    %c0_i32_0 = arith.constant 0 : i32
    %c0_i32_1 = arith.constant 0 : i32
    return %c0_i32, %c0_i32_0 : i32, i32
  }
  func.func @transform_16(%arg0: i32) -> (i32, i32, i32) {
    %c0_i32 = arith.constant 0 : i32
    %c0_i32_0 = arith.constant 0 : i32
    %c0_i32_1 = arith.constant 0 : i32
    return %arg0, %c0_i32, %c0_i32_0 : i32, i32, i32
  }
}

module attributes {stable_mosaic.version = 11 : i64} {
  func.func @_ir_kernel(%arg0: i32, %arg1: memref<1x64x128xbf16, #tpu.memory_space<vmem>>, %arg2: memref<64x1xf32, #tpu.memory_space<vmem>>, %arg3: memref<64x1xf32, #tpu.memory_space<vmem>>, %arg4: memref<128x128xbf16, #tpu.memory_space<vmem>>, %arg5: memref<1x128xf32, #tpu.memory_space<vmem>>, %arg6: memref<9x128xf32, #tpu.memory_space<vmem>>, %arg7: memref<1x128xf32, #tpu.memory_space<vmem>>, %arg8: memref<16x64xbf16, #tpu.memory_space<vmem>>, %arg9: memref<128x128xbf16, #tpu.memory_space<vmem>>, %arg10: memref<1x128xf32, #tpu.memory_space<vmem>>, %arg11: memref<1x16x128xbf16, #tpu.memory_space<vmem>>, %arg12: memref<96x128xf32, #tpu.memory_space<vmem>>) attributes {dimension_semantics = [#tpu.dimension_semantics<parallel>], iteration_bounds = array<i64: 2>, scalar_prefetch = 0 : i64, scratch_operands = 1 : i64, tpu.core_type = #tpu.core_type<tc>, window_params = [{transform_indices = @transform_0, window_bounds = array<i64: 1, 64, 128>}, {pipeline_mode = #tpu.pipeline_mode<synchronous>, transform_indices = @transform_1, window_bounds = array<i64: 64, 1>}, {pipeline_mode = #tpu.pipeline_mode<synchronous>, transform_indices = @transform_2, window_bounds = array<i64: 64, 1>}, {pipeline_mode = #tpu.pipeline_mode<synchronous>, transform_indices = @transform_3, window_bounds = array<i64: 128, 128>}, {pipeline_mode = #tpu.pipeline_mode<synchronous>, transform_indices = @transform_4, window_bounds = array<i64: 1, 128>}, {pipeline_mode = #tpu.pipeline_mode<synchronous>, transform_indices = @transform_5, window_bounds = array<i64: 9, 128>}, {pipeline_mode = #tpu.pipeline_mode<synchronous>, transform_indices = @transform_6, window_bounds = array<i64: 1, 128>}, {pipeline_mode = #tpu.pipeline_mode<synchronous>, transform_indices = @transform_7, window_bounds = array<i64: 16, 64>}, {pipeline_mode = #tpu.pipeline_mode<synchronous>, transform_indices = @transform_8, window_bounds = array<i64: 128, 128>}, {pipeline_mode = #tpu.pipeline_mode<synchronous>, transform_indices = @transform_9, window_bounds = array<i64: 1, 128>}, {transform_indices = @transform_10, window_bounds = array<i64: 1, 16, 128>}]} {
    %c0 = arith.constant 0 : index
    %c0_0 = arith.constant 0 : index
    %c0_1 = arith.constant 0 : index
    %0 = vector.load %arg1[%c0, %c0_0, %c0_1] : memref<1x64x128xbf16, #tpu.memory_space<vmem>>, vector<1x64x128xbf16>
    %1 = vector.shape_cast %0 : vector<1x64x128xbf16> to vector<64x128xbf16>
    %c0_2 = arith.constant 0 : index
    %c0_3 = arith.constant 0 : index
    %2 = vector.load %arg4[%c0_2, %c0_3] : memref<128x128xbf16, #tpu.memory_space<vmem>>, vector<128x128xbf16>
    %cst = arith.constant dense<0.000000e+00> : vector<64x128xf32>
    %3 = tpu.matmul %1, %2, %cst {dimension_numbers = #tpu.dot_dimension_numbers<[1], [0], [0], [1], [0, 0, 1, 1], [], []>} : vector<64x128xbf16>, vector<128x128xbf16>, vector<64x128xf32> -> vector<64x128xf32>
    %c0_4 = arith.constant 0 : index
    %c0_5 = arith.constant 0 : index
    %4 = vector.load %arg5[%c0_4, %c0_5] : memref<1x128xf32, #tpu.memory_space<vmem>>, vector<1x128xf32>
    %5 = vector.broadcast %4 : vector<1x128xf32> to vector<64x128xf32>
    %6 = arith.addf %3, %5 : vector<64x128xf32>
    %cst_6 = arith.constant 3.000000e+00 : f32
    %7 = vector.broadcast %cst_6 : f32 to vector<64x128xf32>
    %8 = arith.addf %6, %7 : vector<64x128xf32>
    %cst_7 = arith.constant 0.000000e+00 : f32
    %cst_8 = arith.constant 6.000000e+00 : f32
    %9 = vector.broadcast %cst_7 : f32 to vector<64x128xf32>
    %10 = arith.maximumf %9, %8 : vector<64x128xf32>
    %11 = vector.broadcast %cst_8 : f32 to vector<64x128xf32>
    %12 = arith.minimumf %11, %10 : vector<64x128xf32>
    %13 = arith.mulf %6, %12 : vector<64x128xf32>
    %cst_9 = arith.constant 0.166666672 : f32
    %14 = vector.broadcast %cst_9 : f32 to vector<64x128xf32>
    %15 = arith.mulf %13, %14 : vector<64x128xf32>
    %cst_10 = arith.constant 0.000000e+00 : f32
    %16 = vector.broadcast %cst_10 : f32 to vector<16x128xf32>
    %c0_11 = arith.constant 0 : index
    %c0_12 = arith.constant 0 : index
    %17 = vector.load %arg12[%c0_11, %c0_12] : memref<96x128xf32, #tpu.memory_space<vmem>>, vector<16x128xf32>
    tpu.vector_store %arg12[%c0_11, %c0_12], %16 {strides = array<i32>} : memref<96x128xf32, #tpu.memory_space<vmem>>, vector<16x128xf32>,
    %c80 = arith.constant 80 : index
    %c0_13 = arith.constant 0 : index
    %18 = vector.load %arg12[%c80, %c0_13] : memref<96x128xf32, #tpu.memory_space<vmem>>, vector<16x128xf32>
    tpu.vector_store %arg12[%c80, %c0_13], %16 {strides = array<i32>} : memref<96x128xf32, #tpu.memory_space<vmem>>, vector<16x128xf32>,
    %c16 = arith.constant 16 : index
    %c0_14 = arith.constant 0 : index
    %19 = vector.load %arg12[%c16, %c0_14] : memref<96x128xf32, #tpu.memory_space<vmem>>, vector<64x128xf32>
    tpu.vector_store %arg12[%c16, %c0_14], %15 {strides = array<i32>} : memref<96x128xf32, #tpu.memory_space<vmem>>, vector<64x128xf32>,
    %c0_15 = arith.constant 0 : index
    %c0_16 = arith.constant 0 : index
    %20 = vector.load %arg6[%c0_15, %c0_16] : memref<9x128xf32, #tpu.memory_space<vmem>>, vector<9x128xf32>
    %c7 = arith.constant 7 : index
    %c0_17 = arith.constant 0 : index
    %21 = vector.load %arg12[%c7, %c0_17] : memref<96x128xf32, #tpu.memory_space<vmem>>, vector<64x128xf32>
    %22 = vector.extract_strided_slice %20 {offsets = [0, 0], sizes = [1, 128], strides = [1, 1]} : vector<9x128xf32> to vector<1x128xf32>
    %23 = vector.broadcast %22 : vector<1x128xf32> to vector<64x128xf32>
    %24 = arith.mulf %21, %23 : vector<64x128xf32>
    %c15 = arith.constant 15 : index
    %c0_18 = arith.constant 0 : index
    %25 = vector.load %arg12[%c15, %c0_18] : memref<96x128xf32, #tpu.memory_space<vmem>>, vector<64x128xf32>
    %26 = vector.extract_strided_slice %20 {offsets = [3, 0], sizes = [1, 128], strides = [1, 1]} : vector<9x128xf32> to vector<1x128xf32>
    %27 = vector.broadcast %26 : vector<1x128xf32> to vector<64x128xf32>
    %28 = arith.mulf %25, %27 : vector<64x128xf32>
    %29 = arith.addf %24, %28 : vector<64x128xf32>
    %c23 = arith.constant 23 : index
    %c0_19 = arith.constant 0 : index
    %30 = vector.load %arg12[%c23, %c0_19] : memref<96x128xf32, #tpu.memory_space<vmem>>, vector<64x128xf32>
    %31 = vector.extract_strided_slice %20 {offsets = [6, 0], sizes = [1, 128], strides = [1, 1]} : vector<9x128xf32> to vector<1x128xf32>
    %32 = vector.broadcast %31 : vector<1x128xf32> to vector<64x128xf32>
    %33 = arith.mulf %30, %32 : vector<64x128xf32>
    %34 = arith.addf %29, %33 : vector<64x128xf32>
    %c0_20 = arith.constant 0 : index
    %c0_21 = arith.constant 0 : index
    %35 = vector.load %arg2[%c0_20, %c0_21] : memref<64x1xf32, #tpu.memory_space<vmem>>, vector<64x1xf32>
    %36 = vector.broadcast %35 : vector<64x1xf32> to vector<64x128xf32>
    %37 = arith.mulf %34, %36 : vector<64x128xf32>
    %c8 = arith.constant 8 : index
    %c0_22 = arith.constant 0 : index
    %38 = vector.load %arg12[%c8, %c0_22] : memref<96x128xf32, #tpu.memory_space<vmem>>, vector<64x128xf32>
    %39 = vector.extract_strided_slice %20 {offsets = [1, 0], sizes = [1, 128], strides = [1, 1]} : vector<9x128xf32> to vector<1x128xf32>
    %40 = vector.broadcast %39 : vector<1x128xf32> to vector<64x128xf32>
    %41 = arith.mulf %38, %40 : vector<64x128xf32>
    %c16_23 = arith.constant 16 : index
    %c0_24 = arith.constant 0 : index
    %42 = vector.load %arg12[%c16_23, %c0_24] : memref<96x128xf32, #tpu.memory_space<vmem>>, vector<64x128xf32>
    %43 = vector.extract_strided_slice %20 {offsets = [4, 0], sizes = [1, 128], strides = [1, 1]} : vector<9x128xf32> to vector<1x128xf32>
    %44 = vector.broadcast %43 : vector<1x128xf32> to vector<64x128xf32>
    %45 = arith.mulf %42, %44 : vector<64x128xf32>
    %46 = arith.addf %41, %45 : vector<64x128xf32>
    %c24 = arith.constant 24 : index
    %c0_25 = arith.constant 0 : index
    %47 = vector.load %arg12[%c24, %c0_25] : memref<96x128xf32, #tpu.memory_space<vmem>>, vector<64x128xf32>
    %48 = vector.extract_strided_slice %20 {offsets = [7, 0], sizes = [1, 128], strides = [1, 1]} : vector<9x128xf32> to vector<1x128xf32>
    %49 = vector.broadcast %48 : vector<1x128xf32> to vector<64x128xf32>
    %50 = arith.mulf %47, %49 : vector<64x128xf32>
    %51 = arith.addf %46, %50 : vector<64x128xf32>
    %52 = arith.addf %37, %51 : vector<64x128xf32>
    %c9 = arith.constant 9 : index
    %c0_26 = arith.constant 0 : index
    %53 = vector.load %arg12[%c9, %c0_26] : memref<96x128xf32, #tpu.memory_space<vmem>>, vector<64x128xf32>
    %54 = vector.extract_strided_slice %20 {offsets = [2, 0], sizes = [1, 128], strides = [1, 1]} : vector<9x128xf32> to vector<1x128xf32>
    %55 = vector.broadcast %54 : vector<1x128xf32> to vector<64x128xf32>
    %56 = arith.mulf %53, %55 : vector<64x128xf32>
    %c17 = arith.constant 17 : index
    %c0_27 = arith.constant 0 : index
    %57 = vector.load %arg12[%c17, %c0_27] : memref<96x128xf32, #tpu.memory_space<vmem>>, vector<64x128xf32>
    %58 = vector.extract_strided_slice %20 {offsets = [5, 0], sizes = [1, 128], strides = [1, 1]} : vector<9x128xf32> to vector<1x128xf32>
    %59 = vector.broadcast %58 : vector<1x128xf32> to vector<64x128xf32>
    %60 = arith.mulf %57, %59 : vector<64x128xf32>
    %61 = arith.addf %56, %60 : vector<64x128xf32>
    %c25 = arith.constant 25 : index
    %c0_28 = arith.constant 0 : index
    %62 = vector.load %arg12[%c25, %c0_28] : memref<96x128xf32, #tpu.memory_space<vmem>>, vector<64x128xf32>
    %63 = vector.extract_strided_slice %20 {offsets = [8, 0], sizes = [1, 128], strides = [1, 1]} : vector<9x128xf32> to vector<1x128xf32>
    %64 = vector.broadcast %63 : vector<1x128xf32> to vector<64x128xf32>
    %65 = arith.mulf %62, %64 : vector<64x128xf32>
    %66 = arith.addf %61, %65 : vector<64x128xf32>
    %c0_29 = arith.constant 0 : index
    %c0_30 = arith.constant 0 : index
    %67 = vector.load %arg3[%c0_29, %c0_30] : memref<64x1xf32, #tpu.memory_space<vmem>>, vector<64x1xf32>
    %68 = vector.broadcast %67 : vector<64x1xf32> to vector<64x128xf32>
    %69 = arith.mulf %66, %68 : vector<64x128xf32>
    %70 = arith.addf %52, %69 : vector<64x128xf32>
    %c0_31 = arith.constant 0 : index
    %c0_32 = arith.constant 0 : index
    %71 = vector.load %arg7[%c0_31, %c0_32] : memref<1x128xf32, #tpu.memory_space<vmem>>, vector<1x128xf32>
    %72 = vector.broadcast %71 : vector<1x128xf32> to vector<64x128xf32>
    %73 = arith.addf %70, %72 : vector<64x128xf32>
    %cst_33 = arith.constant 3.000000e+00 : f32
    %74 = vector.broadcast %cst_33 : f32 to vector<64x128xf32>
    %75 = arith.addf %73, %74 : vector<64x128xf32>
    %cst_34 = arith.constant 0.000000e+00 : f32
    %cst_35 = arith.constant 6.000000e+00 : f32
    %76 = vector.broadcast %cst_34 : f32 to vector<64x128xf32>
    %77 = arith.maximumf %76, %75 : vector<64x128xf32>
    %78 = vector.broadcast %cst_35 : f32 to vector<64x128xf32>
    %79 = arith.minimumf %78, %77 : vector<64x128xf32>
    %80 = arith.mulf %73, %79 : vector<64x128xf32>
    %cst_36 = arith.constant 0.166666672 : f32
    %81 = vector.broadcast %cst_36 : f32 to vector<64x128xf32>
    %82 = arith.mulf %80, %81 : vector<64x128xf32>
    %c0_37 = arith.constant 0 : index
    %c0_38 = arith.constant 0 : index
    %83 = vector.load %arg8[%c0_37, %c0_38] : memref<16x64xbf16, #tpu.memory_space<vmem>>, vector<16x64xbf16>
    %84 = arith.truncf %82 : vector<64x128xf32> to vector<64x128xbf16>
    %cst_39 = arith.constant dense<0.000000e+00> : vector<16x128xf32>
    %85 = tpu.matmul %83, %84, %cst_39 {dimension_numbers = #tpu.dot_dimension_numbers<[1], [0], [0], [1], [0, 0, 1, 1], [], []>} : vector<16x64xbf16>, vector<64x128xbf16>, vector<16x128xf32> -> vector<16x128xf32>
    %86 = arith.truncf %85 : vector<16x128xf32> to vector<16x128xbf16>
    %c0_40 = arith.constant 0 : index
    %c0_41 = arith.constant 0 : index
    %87 = vector.load %arg9[%c0_40, %c0_41] : memref<128x128xbf16, #tpu.memory_space<vmem>>, vector<128x128xbf16>
    %cst_42 = arith.constant dense<0.000000e+00> : vector<16x128xf32>
    %88 = tpu.matmul %86, %87, %cst_42 {dimension_numbers = #tpu.dot_dimension_numbers<[1], [0], [0], [1], [0, 0, 1, 1], [], []>} : vector<16x128xbf16>, vector<128x128xbf16>, vector<16x128xf32> -> vector<16x128xf32>
    %c0_43 = arith.constant 0 : index
    %c0_44 = arith.constant 0 : index
    %89 = vector.load %arg10[%c0_43, %c0_44] : memref<1x128xf32, #tpu.memory_space<vmem>>, vector<1x128xf32>
    %90 = vector.broadcast %89 : vector<1x128xf32> to vector<16x128xf32>
    %91 = arith.addf %88, %90 : vector<16x128xf32>
    %92 = arith.truncf %91 : vector<16x128xf32> to vector<16x128xbf16>
    %c0_45 = arith.constant 0 : index
    %c0_46 = arith.constant 0 : index
    %c0_47 = arith.constant 0 : index
    %93 = vector.load %arg11[%c0_45, %c0_46, %c0_47] : memref<1x16x128xbf16, #tpu.memory_space<vmem>>, vector<1x16x128xbf16>
    %94 = vector.shape_cast %93 : vector<1x16x128xbf16> to vector<16x128xbf16>
    %95 = vector.shape_cast %92 : vector<16x128xbf16> to vector<1x16x128xbf16>
    tpu.vector_store %arg11[%c0_45, %c0_46, %c0_47], %95 {strides = array<i32>} : memref<1x16x128xbf16, #tpu.memory_space<vmem>>, vector<1x16x128xbf16>,
    return
  }
  func.func @transform_0(%arg0: i32) -> (i32, i32, i32) {
    %c0_i32 = arith.constant 0 : i32
    %c0_i32_0 = arith.constant 0 : i32
    %c0_i32_1 = arith.constant 0 : i32
    return %arg0, %c0_i32, %c0_i32_0 : i32, i32, i32
  }
  func.func @transform_1(%arg0: i32) -> (i32, i32) {
    %c0_i32 = arith.constant 0 : i32
    %c0_i32_0 = arith.constant 0 : i32
    %c0_i32_1 = arith.constant 0 : i32
    return %c0_i32, %c0_i32_0 : i32, i32
  }
  func.func @transform_2(%arg0: i32) -> (i32, i32) {
    %c0_i32 = arith.constant 0 : i32
    %c0_i32_0 = arith.constant 0 : i32
    %c0_i32_1 = arith.constant 0 : i32
    return %c0_i32, %c0_i32_0 : i32, i32
  }
  func.func @transform_3(%arg0: i32) -> (i32, i32) {
    %c0_i32 = arith.constant 0 : i32
    %c0_i32_0 = arith.constant 0 : i32
    %c0_i32_1 = arith.constant 0 : i32
    return %c0_i32, %c0_i32_0 : i32, i32
  }
  func.func @transform_4(%arg0: i32) -> (i32, i32) {
    %c0_i32 = arith.constant 0 : i32
    %c0_i32_0 = arith.constant 0 : i32
    %c0_i32_1 = arith.constant 0 : i32
    return %c0_i32, %c0_i32_0 : i32, i32
  }
  func.func @transform_5(%arg0: i32) -> (i32, i32) {
    %c0_i32 = arith.constant 0 : i32
    %c0_i32_0 = arith.constant 0 : i32
    %c0_i32_1 = arith.constant 0 : i32
    return %c0_i32, %c0_i32_0 : i32, i32
  }
  func.func @transform_6(%arg0: i32) -> (i32, i32) {
    %c0_i32 = arith.constant 0 : i32
    %c0_i32_0 = arith.constant 0 : i32
    %c0_i32_1 = arith.constant 0 : i32
    return %c0_i32, %c0_i32_0 : i32, i32
  }
  func.func @transform_7(%arg0: i32) -> (i32, i32) {
    %c0_i32 = arith.constant 0 : i32
    %c0_i32_0 = arith.constant 0 : i32
    %c0_i32_1 = arith.constant 0 : i32
    return %c0_i32, %c0_i32_0 : i32, i32
  }
  func.func @transform_8(%arg0: i32) -> (i32, i32) {
    %c0_i32 = arith.constant 0 : i32
    %c0_i32_0 = arith.constant 0 : i32
    %c0_i32_1 = arith.constant 0 : i32
    return %c0_i32, %c0_i32_0 : i32, i32
  }
  func.func @transform_9(%arg0: i32) -> (i32, i32) {
    %c0_i32 = arith.constant 0 : i32
    %c0_i32_0 = arith.constant 0 : i32
    %c0_i32_1 = arith.constant 0 : i32
    return %c0_i32, %c0_i32_0 : i32, i32
  }
  func.func @transform_10(%arg0: i32) -> (i32, i32, i32) {
    %c0_i32 = arith.constant 0 : i32
    %c0_i32_0 = arith.constant 0 : i32
    %c0_i32_1 = arith.constant 0 : i32
    return %arg0, %c0_i32, %c0_i32_0 : i32, i32, i32
  }
}

module attributes {stable_mosaic.version = 11 : i64} {
  func.func @_ir_kernel(%arg0: i32, %arg1: memref<1x16x128xbf16, #tpu.memory_space<vmem>>, %arg2: memref<16x1xf32, #tpu.memory_space<vmem>>, %arg3: memref<16x1xf32, #tpu.memory_space<vmem>>, %arg4: memref<128x128xbf16, #tpu.memory_space<vmem>>, %arg5: memref<1x128xf32, #tpu.memory_space<vmem>>, %arg6: memref<9x128xf32, #tpu.memory_space<vmem>>, %arg7: memref<1x128xf32, #tpu.memory_space<vmem>>, %arg8: memref<4x16xbf16, #tpu.memory_space<vmem>>, %arg9: memref<128x128xbf16, #tpu.memory_space<vmem>>, %arg10: memref<1x128xf32, #tpu.memory_space<vmem>>, %arg11: memref<128x128xbf16, #tpu.memory_space<vmem>>, %arg12: memref<1x128xf32, #tpu.memory_space<vmem>>, %arg13: memref<128x128xbf16, #tpu.memory_space<vmem>>, %arg14: memref<1x128xf32, #tpu.memory_space<vmem>>, %arg15: memref<1x4x128xbf16, #tpu.memory_space<vmem>>, %arg16: memref<32x128xf32, #tpu.memory_space<vmem>>) attributes {dimension_semantics = [#tpu.dimension_semantics<parallel>], iteration_bounds = array<i64: 2>, scalar_prefetch = 0 : i64, scratch_operands = 1 : i64, tpu.core_type = #tpu.core_type<tc>, window_params = [{transform_indices = @transform_0, window_bounds = array<i64: 1, 16, 128>}, {pipeline_mode = #tpu.pipeline_mode<synchronous>, transform_indices = @transform_1, window_bounds = array<i64: 16, 1>}, {pipeline_mode = #tpu.pipeline_mode<synchronous>, transform_indices = @transform_2, window_bounds = array<i64: 16, 1>}, {pipeline_mode = #tpu.pipeline_mode<synchronous>, transform_indices = @transform_3, window_bounds = array<i64: 128, 128>}, {pipeline_mode = #tpu.pipeline_mode<synchronous>, transform_indices = @transform_4, window_bounds = array<i64: 1, 128>}, {pipeline_mode = #tpu.pipeline_mode<synchronous>, transform_indices = @transform_5, window_bounds = array<i64: 9, 128>}, {pipeline_mode = #tpu.pipeline_mode<synchronous>, transform_indices = @transform_6, window_bounds = array<i64: 1, 128>}, {pipeline_mode = #tpu.pipeline_mode<synchronous>, transform_indices = @transform_7, window_bounds = array<i64: 4, 16>}, {pipeline_mode = #tpu.pipeline_mode<synchronous>, transform_indices = @transform_8, window_bounds = array<i64: 128, 128>}, {pipeline_mode = #tpu.pipeline_mode<synchronous>, transform_indices = @transform_9, window_bounds = array<i64: 1, 128>}, {pipeline_mode = #tpu.pipeline_mode<synchronous>, transform_indices = @transform_10, window_bounds = array<i64: 128, 128>}, {pipeline_mode = #tpu.pipeline_mode<synchronous>, transform_indices = @transform_11, window_bounds = array<i64: 1, 128>}, {pipeline_mode = #tpu.pipeline_mode<synchronous>, transform_indices = @transform_12, window_bounds = array<i64: 128, 128>}, {pipeline_mode = #tpu.pipeline_mode<synchronous>, transform_indices = @transform_13, window_bounds = array<i64: 1, 128>}, {transform_indices = @transform_14, window_bounds = array<i64: 1, 4, 128>}]} {
    %c0 = arith.constant 0 : index
    %c0_0 = arith.constant 0 : index
    %c0_1 = arith.constant 0 : index
    %0 = vector.load %arg1[%c0, %c0_0, %c0_1] : memref<1x16x128xbf16, #tpu.memory_space<vmem>>, vector<1x16x128xbf16>
    %1 = vector.shape_cast %0 : vector<1x16x128xbf16> to vector<16x128xbf16>
    %c0_2 = arith.constant 0 : index
    %c0_3 = arith.constant 0 : index
    %2 = vector.load %arg4[%c0_2, %c0_3] : memref<128x128xbf16, #tpu.memory_space<vmem>>, vector<128x128xbf16>
    %cst = arith.constant dense<0.000000e+00> : vector<16x128xf32>
    %3 = tpu.matmul %1, %2, %cst {dimension_numbers = #tpu.dot_dimension_numbers<[1], [0], [0], [1], [0, 0, 1, 1], [], []>} : vector<16x128xbf16>, vector<128x128xbf16>, vector<16x128xf32> -> vector<16x128xf32>
    %c0_4 = arith.constant 0 : index
    %c0_5 = arith.constant 0 : index
    %4 = vector.load %arg5[%c0_4, %c0_5] : memref<1x128xf32, #tpu.memory_space<vmem>>, vector<1x128xf32>
    %5 = vector.broadcast %4 : vector<1x128xf32> to vector<16x128xf32>
    %6 = arith.addf %3, %5 : vector<16x128xf32>
    %cst_6 = arith.constant 3.000000e+00 : f32
    %7 = vector.broadcast %cst_6 : f32 to vector<16x128xf32>
    %8 = arith.addf %6, %7 : vector<16x128xf32>
    %cst_7 = arith.constant 0.000000e+00 : f32
    %cst_8 = arith.constant 6.000000e+00 : f32
    %9 = vector.broadcast %cst_7 : f32 to vector<16x128xf32>
    %10 = arith.maximumf %9, %8 : vector<16x128xf32>
    %11 = vector.broadcast %cst_8 : f32 to vector<16x128xf32>
    %12 = arith.minimumf %11, %10 : vector<16x128xf32>
    %13 = arith.mulf %6, %12 : vector<16x128xf32>
    %cst_9 = arith.constant 0.166666672 : f32
    %14 = vector.broadcast %cst_9 : f32 to vector<16x128xf32>
    %15 = arith.mulf %13, %14 : vector<16x128xf32>
    %cst_10 = arith.constant 0.000000e+00 : f32
    %16 = vector.broadcast %cst_10 : f32 to vector<8x128xf32>
    %c0_11 = arith.constant 0 : index
    %c0_12 = arith.constant 0 : index
    %17 = vector.load %arg16[%c0_11, %c0_12] : memref<32x128xf32, #tpu.memory_space<vmem>>, vector<8x128xf32>
    tpu.vector_store %arg16[%c0_11, %c0_12], %16 {strides = array<i32>} : memref<32x128xf32, #tpu.memory_space<vmem>>, vector<8x128xf32>,
    %c24 = arith.constant 24 : index
    %c0_13 = arith.constant 0 : index
    %18 = vector.load %arg16[%c24, %c0_13] : memref<32x128xf32, #tpu.memory_space<vmem>>, vector<8x128xf32>
    tpu.vector_store %arg16[%c24, %c0_13], %16 {strides = array<i32>} : memref<32x128xf32, #tpu.memory_space<vmem>>, vector<8x128xf32>,
    %c8 = arith.constant 8 : index
    %c0_14 = arith.constant 0 : index
    %19 = vector.load %arg16[%c8, %c0_14] : memref<32x128xf32, #tpu.memory_space<vmem>>, vector<16x128xf32>
    tpu.vector_store %arg16[%c8, %c0_14], %15 {strides = array<i32>} : memref<32x128xf32, #tpu.memory_space<vmem>>, vector<16x128xf32>,
    %c0_15 = arith.constant 0 : index
    %c0_16 = arith.constant 0 : index
    %20 = vector.load %arg6[%c0_15, %c0_16] : memref<9x128xf32, #tpu.memory_space<vmem>>, vector<9x128xf32>
    %c3 = arith.constant 3 : index
    %c0_17 = arith.constant 0 : index
    %21 = vector.load %arg16[%c3, %c0_17] : memref<32x128xf32, #tpu.memory_space<vmem>>, vector<16x128xf32>
    %22 = vector.extract_strided_slice %20 {offsets = [0, 0], sizes = [1, 128], strides = [1, 1]} : vector<9x128xf32> to vector<1x128xf32>
    %23 = vector.broadcast %22 : vector<1x128xf32> to vector<16x128xf32>
    %24 = arith.mulf %21, %23 : vector<16x128xf32>
    %c7 = arith.constant 7 : index
    %c0_18 = arith.constant 0 : index
    %25 = vector.load %arg16[%c7, %c0_18] : memref<32x128xf32, #tpu.memory_space<vmem>>, vector<16x128xf32>
    %26 = vector.extract_strided_slice %20 {offsets = [3, 0], sizes = [1, 128], strides = [1, 1]} : vector<9x128xf32> to vector<1x128xf32>
    %27 = vector.broadcast %26 : vector<1x128xf32> to vector<16x128xf32>
    %28 = arith.mulf %25, %27 : vector<16x128xf32>
    %29 = arith.addf %24, %28 : vector<16x128xf32>
    %c11 = arith.constant 11 : index
    %c0_19 = arith.constant 0 : index
    %30 = vector.load %arg16[%c11, %c0_19] : memref<32x128xf32, #tpu.memory_space<vmem>>, vector<16x128xf32>
    %31 = vector.extract_strided_slice %20 {offsets = [6, 0], sizes = [1, 128], strides = [1, 1]} : vector<9x128xf32> to vector<1x128xf32>
    %32 = vector.broadcast %31 : vector<1x128xf32> to vector<16x128xf32>
    %33 = arith.mulf %30, %32 : vector<16x128xf32>
    %34 = arith.addf %29, %33 : vector<16x128xf32>
    %c0_20 = arith.constant 0 : index
    %c0_21 = arith.constant 0 : index
    %35 = vector.load %arg2[%c0_20, %c0_21] : memref<16x1xf32, #tpu.memory_space<vmem>>, vector<16x1xf32>
    %36 = vector.broadcast %35 : vector<16x1xf32> to vector<16x128xf32>
    %37 = arith.mulf %34, %36 : vector<16x128xf32>
    %c4 = arith.constant 4 : index
    %c0_22 = arith.constant 0 : index
    %38 = vector.load %arg16[%c4, %c0_22] : memref<32x128xf32, #tpu.memory_space<vmem>>, vector<16x128xf32>
    %39 = vector.extract_strided_slice %20 {offsets = [1, 0], sizes = [1, 128], strides = [1, 1]} : vector<9x128xf32> to vector<1x128xf32>
    %40 = vector.broadcast %39 : vector<1x128xf32> to vector<16x128xf32>
    %41 = arith.mulf %38, %40 : vector<16x128xf32>
    %c8_23 = arith.constant 8 : index
    %c0_24 = arith.constant 0 : index
    %42 = vector.load %arg16[%c8_23, %c0_24] : memref<32x128xf32, #tpu.memory_space<vmem>>, vector<16x128xf32>
    %43 = vector.extract_strided_slice %20 {offsets = [4, 0], sizes = [1, 128], strides = [1, 1]} : vector<9x128xf32> to vector<1x128xf32>
    %44 = vector.broadcast %43 : vector<1x128xf32> to vector<16x128xf32>
    %45 = arith.mulf %42, %44 : vector<16x128xf32>
    %46 = arith.addf %41, %45 : vector<16x128xf32>
    %c12 = arith.constant 12 : index
    %c0_25 = arith.constant 0 : index
    %47 = vector.load %arg16[%c12, %c0_25] : memref<32x128xf32, #tpu.memory_space<vmem>>, vector<16x128xf32>
    %48 = vector.extract_strided_slice %20 {offsets = [7, 0], sizes = [1, 128], strides = [1, 1]} : vector<9x128xf32> to vector<1x128xf32>
    %49 = vector.broadcast %48 : vector<1x128xf32> to vector<16x128xf32>
    %50 = arith.mulf %47, %49 : vector<16x128xf32>
    %51 = arith.addf %46, %50 : vector<16x128xf32>
    %52 = arith.addf %37, %51 : vector<16x128xf32>
    %c5 = arith.constant 5 : index
    %c0_26 = arith.constant 0 : index
    %53 = vector.load %arg16[%c5, %c0_26] : memref<32x128xf32, #tpu.memory_space<vmem>>, vector<16x128xf32>
    %54 = vector.extract_strided_slice %20 {offsets = [2, 0], sizes = [1, 128], strides = [1, 1]} : vector<9x128xf32> to vector<1x128xf32>
    %55 = vector.broadcast %54 : vector<1x128xf32> to vector<16x128xf32>
    %56 = arith.mulf %53, %55 : vector<16x128xf32>
    %c9 = arith.constant 9 : index
    %c0_27 = arith.constant 0 : index
    %57 = vector.load %arg16[%c9, %c0_27] : memref<32x128xf32, #tpu.memory_space<vmem>>, vector<16x128xf32>
    %58 = vector.extract_strided_slice %20 {offsets = [5, 0], sizes = [1, 128], strides = [1, 1]} : vector<9x128xf32> to vector<1x128xf32>
    %59 = vector.broadcast %58 : vector<1x128xf32> to vector<16x128xf32>
    %60 = arith.mulf %57, %59 : vector<16x128xf32>
    %61 = arith.addf %56, %60 : vector<16x128xf32>
    %c13 = arith.constant 13 : index
    %c0_28 = arith.constant 0 : index
    %62 = vector.load %arg16[%c13, %c0_28] : memref<32x128xf32, #tpu.memory_space<vmem>>, vector<16x128xf32>
    %63 = vector.extract_strided_slice %20 {offsets = [8, 0], sizes = [1, 128], strides = [1, 1]} : vector<9x128xf32> to vector<1x128xf32>
    %64 = vector.broadcast %63 : vector<1x128xf32> to vector<16x128xf32>
    %65 = arith.mulf %62, %64 : vector<16x128xf32>
    %66 = arith.addf %61, %65 : vector<16x128xf32>
    %c0_29 = arith.constant 0 : index
    %c0_30 = arith.constant 0 : index
    %67 = vector.load %arg3[%c0_29, %c0_30] : memref<16x1xf32, #tpu.memory_space<vmem>>, vector<16x1xf32>
    %68 = vector.broadcast %67 : vector<16x1xf32> to vector<16x128xf32>
    %69 = arith.mulf %66, %68 : vector<16x128xf32>
    %70 = arith.addf %52, %69 : vector<16x128xf32>
    %c0_31 = arith.constant 0 : index
    %c0_32 = arith.constant 0 : index
    %71 = vector.load %arg7[%c0_31, %c0_32] : memref<1x128xf32, #tpu.memory_space<vmem>>, vector<1x128xf32>
    %72 = vector.broadcast %71 : vector<1x128xf32> to vector<16x128xf32>
    %73 = arith.addf %70, %72 : vector<16x128xf32>
    %cst_33 = arith.constant 3.000000e+00 : f32
    %74 = vector.broadcast %cst_33 : f32 to vector<16x128xf32>
    %75 = arith.addf %73, %74 : vector<16x128xf32>
    %cst_34 = arith.constant 0.000000e+00 : f32
    %cst_35 = arith.constant 6.000000e+00 : f32
    %76 = vector.broadcast %cst_34 : f32 to vector<16x128xf32>
    %77 = arith.maximumf %76, %75 : vector<16x128xf32>
    %78 = vector.broadcast %cst_35 : f32 to vector<16x128xf32>
    %79 = arith.minimumf %78, %77 : vector<16x128xf32>
    %80 = arith.mulf %73, %79 : vector<16x128xf32>
    %cst_36 = arith.constant 0.166666672 : f32
    %81 = vector.broadcast %cst_36 : f32 to vector<16x128xf32>
    %82 = arith.mulf %80, %81 : vector<16x128xf32>
    %c0_37 = arith.constant 0 : index
    %c0_38 = arith.constant 0 : index
    %83 = vector.load %arg8[%c0_37, %c0_38] : memref<4x16xbf16, #tpu.memory_space<vmem>>, vector<4x16xbf16>
    %84 = arith.truncf %82 : vector<16x128xf32> to vector<16x128xbf16>
    %cst_39 = arith.constant dense<0.000000e+00> : vector<4x128xf32>
    %85 = tpu.matmul %83, %84, %cst_39 {dimension_numbers = #tpu.dot_dimension_numbers<[1], [0], [0], [1], [0, 0, 1, 1], [], []>} : vector<4x16xbf16>, vector<16x128xbf16>, vector<4x128xf32> -> vector<4x128xf32>
    %cst_40 = arith.constant dense<0.000000e+00> : vector<128xf32>
    %86 = vector.multi_reduction <add>, %85, %cst_40 [0] : vector<4x128xf32> to vector<128xf32>
    %87 = vector.shape_cast %86 : vector<128xf32> to vector<1x128xf32>
    %cst_41 = arith.constant 4.000000e+00 : f32
    %88 = vector.broadcast %cst_41 : f32 to vector<1x128xf32>
    %89 = arith.divf %87, %88 : vector<1x128xf32>
    %90 = arith.truncf %89 : vector<1x128xf32> to vector<1x128xbf16>
    %c0_42 = arith.constant 0 : index
    %c0_43 = arith.constant 0 : index
    %91 = vector.load %arg9[%c0_42, %c0_43] : memref<128x128xbf16, #tpu.memory_space<vmem>>, vector<128x128xbf16>
    %cst_44 = arith.constant dense<0.000000e+00> : vector<1x128xf32>
    %92 = tpu.matmul %90, %91, %cst_44 {dimension_numbers = #tpu.dot_dimension_numbers<[1], [0], [0], [1], [0, 0, 1, 1], [], []>} : vector<1x128xbf16>, vector<128x128xbf16>, vector<1x128xf32> -> vector<1x128xf32>
    %c0_45 = arith.constant 0 : index
    %c0_46 = arith.constant 0 : index
    %93 = vector.load %arg10[%c0_45, %c0_46] : memref<1x128xf32, #tpu.memory_space<vmem>>, vector<1x128xf32>
    %94 = arith.addf %92, %93 : vector<1x128xf32>
    %cst_47 = arith.constant 0.000000e+00 : f32
    %95 = vector.broadcast %cst_47 : f32 to vector<1x128xf32>
    %96 = arith.maximumf %94, %95 : vector<1x128xf32>
    %97 = arith.truncf %96 : vector<1x128xf32> to vector<1x128xbf16>
    %c0_48 = arith.constant 0 : index
    %c0_49 = arith.constant 0 : index
    %98 = vector.load %arg11[%c0_48, %c0_49] : memref<128x128xbf16, #tpu.memory_space<vmem>>, vector<128x128xbf16>
    %cst_50 = arith.constant dense<0.000000e+00> : vector<1x128xf32>
    %99 = tpu.matmul %97, %98, %cst_50 {dimension_numbers = #tpu.dot_dimension_numbers<[1], [0], [0], [1], [0, 0, 1, 1], [], []>} : vector<1x128xbf16>, vector<128x128xbf16>, vector<1x128xf32> -> vector<1x128xf32>
    %c0_51 = arith.constant 0 : index
    %c0_52 = arith.constant 0 : index
    %100 = vector.load %arg12[%c0_51, %c0_52] : memref<1x128xf32, #tpu.memory_space<vmem>>, vector<1x128xf32>
    %101 = arith.addf %99, %100 : vector<1x128xf32>
    %cst_53 = arith.constant 3.000000e+00 : f32
    %102 = vector.broadcast %cst_53 : f32 to vector<1x128xf32>
    %103 = arith.addf %101, %102 : vector<1x128xf32>
    %cst_54 = arith.constant 0.000000e+00 : f32
    %cst_55 = arith.constant 6.000000e+00 : f32
    %104 = vector.broadcast %cst_54 : f32 to vector<1x128xf32>
    %105 = arith.maximumf %104, %103 : vector<1x128xf32>
    %106 = vector.broadcast %cst_55 : f32 to vector<1x128xf32>
    %107 = arith.minimumf %106, %105 : vector<1x128xf32>
    %cst_56 = arith.constant 0.166666672 : f32
    %108 = vector.broadcast %cst_56 : f32 to vector<1x128xf32>
    %109 = arith.mulf %107, %108 : vector<1x128xf32>
    %110 = vector.broadcast %109 : vector<1x128xf32> to vector<4x128xf32>
    %111 = arith.mulf %85, %110 : vector<4x128xf32>
    %112 = arith.truncf %111 : vector<4x128xf32> to vector<4x128xbf16>
    %c0_57 = arith.constant 0 : index
    %c0_58 = arith.constant 0 : index
    %113 = vector.load %arg13[%c0_57, %c0_58] : memref<128x128xbf16, #tpu.memory_space<vmem>>, vector<128x128xbf16>
    %cst_59 = arith.constant dense<0.000000e+00> : vector<4x128xf32>
    %114 = tpu.matmul %112, %113, %cst_59 {dimension_numbers = #tpu.dot_dimension_numbers<[1], [0], [0], [1], [0, 0, 1, 1], [], []>} : vector<4x128xbf16>, vector<128x128xbf16>, vector<4x128xf32> -> vector<4x128xf32>
    %c0_60 = arith.constant 0 : index
    %c0_61 = arith.constant 0 : index
    %115 = vector.load %arg14[%c0_60, %c0_61] : memref<1x128xf32, #tpu.memory_space<vmem>>, vector<1x128xf32>
    %116 = vector.broadcast %115 : vector<1x128xf32> to vector<4x128xf32>
    %117 = arith.addf %114, %116 : vector<4x128xf32>
    %118 = arith.truncf %117 : vector<4x128xf32> to vector<4x128xbf16>
    %c0_62 = arith.constant 0 : index
    %c0_63 = arith.constant 0 : index
    %c0_64 = arith.constant 0 : index
    %119 = vector.load %arg15[%c0_62, %c0_63, %c0_64] : memref<1x4x128xbf16, #tpu.memory_space<vmem>>, vector<1x4x128xbf16>
    %120 = vector.shape_cast %119 : vector<1x4x128xbf16> to vector<4x128xbf16>
    %121 = vector.shape_cast %118 : vector<4x128xbf16> to vector<1x4x128xbf16>
    tpu.vector_store %arg15[%c0_62, %c0_63, %c0_64], %121 {strides = array<i32>} : memref<1x4x128xbf16, #tpu.memory_space<vmem>>, vector<1x4x128xbf16>,
    return
  }
  func.func @transform_0(%arg0: i32) -> (i32, i32, i32) {
    %c0_i32 = arith.constant 0 : i32
    %c0_i32_0 = arith.constant 0 : i32
    %c0_i32_1 = arith.constant 0 : i32
    return %arg0, %c0_i32, %c0_i32_0 : i32, i32, i32
  }
  func.func @transform_1(%arg0: i32) -> (i32, i32) {
    %c0_i32 = arith.constant 0 : i32
    %c0_i32_0 = arith.constant 0 : i32
    %c0_i32_1 = arith.constant 0 : i32
    return %c0_i32, %c0_i32_0 : i32, i32
  }
  func.func @transform_2(%arg0: i32) -> (i32, i32) {
    %c0_i32 = arith.constant 0 : i32
    %c0_i32_0 = arith.constant 0 : i32
    %c0_i32_1 = arith.constant 0 : i32
    return %c0_i32, %c0_i32_0 : i32, i32
  }
  func.func @transform_3(%arg0: i32) -> (i32, i32) {
    %c0_i32 = arith.constant 0 : i32
    %c0_i32_0 = arith.constant 0 : i32
    %c0_i32_1 = arith.constant 0 : i32
    return %c0_i32, %c0_i32_0 : i32, i32
  }
  func.func @transform_4(%arg0: i32) -> (i32, i32) {
    %c0_i32 = arith.constant 0 : i32
    %c0_i32_0 = arith.constant 0 : i32
    %c0_i32_1 = arith.constant 0 : i32
    return %c0_i32, %c0_i32_0 : i32, i32
  }
  func.func @transform_5(%arg0: i32) -> (i32, i32) {
    %c0_i32 = arith.constant 0 : i32
    %c0_i32_0 = arith.constant 0 : i32
    %c0_i32_1 = arith.constant 0 : i32
    return %c0_i32, %c0_i32_0 : i32, i32
  }
  func.func @transform_6(%arg0: i32) -> (i32, i32) {
    %c0_i32 = arith.constant 0 : i32
    %c0_i32_0 = arith.constant 0 : i32
    %c0_i32_1 = arith.constant 0 : i32
    return %c0_i32, %c0_i32_0 : i32, i32
  }
  func.func @transform_7(%arg0: i32) -> (i32, i32) {
    %c0_i32 = arith.constant 0 : i32
    %c0_i32_0 = arith.constant 0 : i32
    %c0_i32_1 = arith.constant 0 : i32
    return %c0_i32, %c0_i32_0 : i32, i32
  }
  func.func @transform_8(%arg0: i32) -> (i32, i32) {
    %c0_i32 = arith.constant 0 : i32
    %c0_i32_0 = arith.constant 0 : i32
    %c0_i32_1 = arith.constant 0 : i32
    return %c0_i32, %c0_i32_0 : i32, i32
  }
  func.func @transform_9(%arg0: i32) -> (i32, i32) {
    %c0_i32 = arith.constant 0 : i32
    %c0_i32_0 = arith.constant 0 : i32
    %c0_i32_1 = arith.constant 0 : i32
    return %c0_i32, %c0_i32_0 : i32, i32
  }
  func.func @transform_10(%arg0: i32) -> (i32, i32) {
    %c0_i32 = arith.constant 0 : i32
    %c0_i32_0 = arith.constant 0 : i32
    %c0_i32_1 = arith.constant 0 : i32
    return %c0_i32, %c0_i32_0 : i32, i32
  }
  func.func @transform_11(%arg0: i32) -> (i32, i32) {
    %c0_i32 = arith.constant 0 : i32
    %c0_i32_0 = arith.constant 0 : i32
    %c0_i32_1 = arith.constant 0 : i32
    return %c0_i32, %c0_i32_0 : i32, i32
  }
  func.func @transform_12(%arg0: i32) -> (i32, i32) {
    %c0_i32 = arith.constant 0 : i32
    %c0_i32_0 = arith.constant 0 : i32
    %c0_i32_1 = arith.constant 0 : i32
    return %c0_i32, %c0_i32_0 : i32, i32
  }
  func.func @transform_13(%arg0: i32) -> (i32, i32) {
    %c0_i32 = arith.constant 0 : i32
    %c0_i32_0 = arith.constant 0 : i32
    %c0_i32_1 = arith.constant 0 : i32
    return %c0_i32, %c0_i32_0 : i32, i32
  }
  func.func @transform_14(%arg0: i32) -> (i32, i32, i32) {
    %c0_i32 = arith.constant 0 : i32
    %c0_i32_0 = arith.constant 0 : i32
    %c0_i32_1 = arith.constant 0 : i32
    return %arg0, %c0_i32, %c0_i32_0 : i32, i32, i32
  }
}

module attributes {stable_mosaic.version = 11 : i64} {
  func.func @_high_head_kernel(%arg0: i32, %arg1: i32, %arg2: memref<1x128x4xbf16, #tpu.memory_space<vmem>>, %arg3: memref<96x128xbf16, #tpu.memory_space<vmem>>, %arg4: memref<96x1xf32, #tpu.memory_space<vmem>>, %arg5: memref<4x576xbf16, #tpu.memory_space<vmem>>, %arg6: memref<32x96xbf16, #tpu.memory_space<vmem>>, %arg7: memref<32x1xf32, #tpu.memory_space<vmem>>, %arg8: memref<1x32xbf16, #tpu.memory_space<vmem>>, %arg9: memref<1x1xf32, #tpu.memory_space<vmem>>, %arg10: memref<1x1x576xf32, #tpu.memory_space<vmem>>, %arg11: memref<96x4xbf16, #tpu.memory_space<vmem>>) attributes {dimension_semantics = [#tpu.dimension_semantics<parallel>, #tpu.dimension_semantics<arbitrary>], iteration_bounds = array<i64: 2, 1>, scalar_prefetch = 0 : i64, scratch_operands = 1 : i64, tpu.core_type = #tpu.core_type<tc>, window_params = [{transform_indices = @transform_0, window_bounds = array<i64: 1, 128, 4>}, {pipeline_mode = #tpu.pipeline_mode<synchronous>, transform_indices = @transform_1, window_bounds = array<i64: 96, 128>}, {pipeline_mode = #tpu.pipeline_mode<synchronous>, transform_indices = @transform_2, window_bounds = array<i64: 96, 1>}, {transform_indices = @transform_3, window_bounds = array<i64: 4, 576>}, {pipeline_mode = #tpu.pipeline_mode<synchronous>, transform_indices = @transform_4, window_bounds = array<i64: 32, 96>}, {pipeline_mode = #tpu.pipeline_mode<synchronous>, transform_indices = @transform_5, window_bounds = array<i64: 32, 1>}, {pipeline_mode = #tpu.pipeline_mode<synchronous>, transform_indices = @transform_6, window_bounds = array<i64: 1, 32>}, {pipeline_mode = #tpu.pipeline_mode<synchronous>, transform_indices = @transform_7, window_bounds = array<i64: 1, 1>}, {transform_indices = @transform_8, window_bounds = array<i64: 1, 1, 576>}]} {
    %c0_i32 = arith.constant 0 : i32
    %0 = arith.cmpi eq, %arg1, %c0_i32 : i32
    %1 = arith.extui %0 : i1 to i32
    %c0_i32_0 = arith.constant 0 : i32
    %2 = arith.cmpi ne, %1, %c0_i32_0 : i32
    scf.if %2 {
      %c0_18 = arith.constant 0 : index
      %c0_19 = arith.constant 0 : index
      %23 = vector.load %arg3[%c0_18, %c0_19] : memref<96x128xbf16, #tpu.memory_space<vmem>>, vector<96x128xbf16>
      %c0_20 = arith.constant 0 : index
      %c0_21 = arith.constant 0 : index
      %c0_22 = arith.constant 0 : index
      %24 = vector.load %arg2[%c0_20, %c0_21, %c0_22] : memref<1x128x4xbf16, #tpu.memory_space<vmem>>, vector<1x128x4xbf16>
      %25 = vector.shape_cast %24 : vector<1x128x4xbf16> to vector<128x4xbf16>
      %cst_23 = arith.constant dense<0.000000e+00> : vector<96x4xf32>
      %26 = tpu.matmul %23, %25, %cst_23 {dimension_numbers = #tpu.dot_dimension_numbers<[1], [0], [0], [1], [0, 0, 1, 1], [], []>} : vector<96x128xbf16>, vector<128x4xbf16>, vector<96x4xf32> -> vector<96x4xf32>
      %c0_24 = arith.constant 0 : index
      %c0_25 = arith.constant 0 : index
      %27 = vector.load %arg4[%c0_24, %c0_25] : memref<96x1xf32, #tpu.memory_space<vmem>>, vector<96x1xf32>
      %28 = vector.broadcast %27 : vector<96x1xf32> to vector<96x4xf32>
      %29 = arith.addf %26, %28 : vector<96x4xf32>
      %cst_26 = arith.constant 3.000000e+00 : f32
      %30 = vector.broadcast %cst_26 : f32 to vector<96x4xf32>
      %31 = arith.addf %29, %30 : vector<96x4xf32>
      %cst_27 = arith.constant 0.000000e+00 : f32
      %cst_28 = arith.constant 6.000000e+00 : f32
      %32 = vector.broadcast %cst_27 : f32 to vector<96x4xf32>
      %33 = arith.maximumf %32, %31 : vector<96x4xf32>
      %34 = vector.broadcast %cst_28 : f32 to vector<96x4xf32>
      %35 = arith.minimumf %34, %33 : vector<96x4xf32>
      %36 = arith.mulf %29, %35 : vector<96x4xf32>
      %cst_29 = arith.constant 0.166666672 : f32
      %37 = vector.broadcast %cst_29 : f32 to vector<96x4xf32>
      %38 = arith.mulf %36, %37 : vector<96x4xf32>
      %39 = arith.truncf %38 : vector<96x4xf32> to vector<96x4xbf16>
      %c0_30 = arith.constant 0 : index
      %c0_31 = arith.constant 0 : index
      %40 = vector.load %arg11[%c0_30, %c0_31] : memref<96x4xbf16, #tpu.memory_space<vmem>>, vector<96x4xbf16>
      tpu.vector_store %arg11[%c0_30, %c0_31], %39 {strides = array<i32>} : memref<96x4xbf16, #tpu.memory_space<vmem>>, vector<96x4xbf16>,
    } else {
    }
    %c0 = arith.constant 0 : index
    %c0_1 = arith.constant 0 : index
    %3 = vector.load %arg11[%c0, %c0_1] : memref<96x4xbf16, #tpu.memory_space<vmem>>, vector<96x4xbf16>
    %c0_2 = arith.constant 0 : index
    %c0_3 = arith.constant 0 : index
    %4 = vector.load %arg5[%c0_2, %c0_3] : memref<4x576xbf16, #tpu.memory_space<vmem>>, vector<4x576xbf16>
    %cst = arith.constant dense<0.000000e+00> : vector<96x576xf32>
    %5 = tpu.matmul %3, %4, %cst {dimension_numbers = #tpu.dot_dimension_numbers<[1], [0], [0], [1], [0, 0, 1, 1], [], []>} : vector<96x4xbf16>, vector<4x576xbf16>, vector<96x576xf32> -> vector<96x576xf32>
    %c0_4 = arith.constant 0 : index
    %c0_5 = arith.constant 0 : index
    %6 = vector.load %arg6[%c0_4, %c0_5] : memref<32x96xbf16, #tpu.memory_space<vmem>>, vector<32x96xbf16>
    %7 = arith.truncf %5 : vector<96x576xf32> to vector<96x576xbf16>
    %cst_6 = arith.constant dense<0.000000e+00> : vector<32x576xf32>
    %8 = tpu.matmul %6, %7, %cst_6 {dimension_numbers = #tpu.dot_dimension_numbers<[1], [0], [0], [1], [0, 0, 1, 1], [], []>} : vector<32x96xbf16>, vector<96x576xbf16>, vector<32x576xf32> -> vector<32x576xf32>
    %c0_7 = arith.constant 0 : index
    %c0_8 = arith.constant 0 : index
    %9 = vector.load %arg7[%c0_7, %c0_8] : memref<32x1xf32, #tpu.memory_space<vmem>>, vector<32x1xf32>
    %10 = vector.broadcast %9 : vector<32x1xf32> to vector<32x576xf32>
    %11 = arith.addf %8, %10 : vector<32x576xf32>
    %cst_9 = arith.constant 0.000000e+00 : f32
    %12 = vector.broadcast %cst_9 : f32 to vector<32x576xf32>
    %13 = arith.maximumf %11, %12 : vector<32x576xf32>
    %c0_10 = arith.constant 0 : index
    %c0_11 = arith.constant 0 : index
    %14 = vector.load %arg8[%c0_10, %c0_11] : memref<1x32xbf16, #tpu.memory_space<vmem>>, vector<1x32xbf16>
    %15 = arith.truncf %13 : vector<32x576xf32> to vector<32x576xbf16>
    %cst_12 = arith.constant dense<0.000000e+00> : vector<1x576xf32>
    %16 = tpu.matmul %14, %15, %cst_12 {dimension_numbers = #tpu.dot_dimension_numbers<[1], [0], [0], [1], [0, 0, 1, 1], [], []>} : vector<1x32xbf16>, vector<32x576xbf16>, vector<1x576xf32> -> vector<1x576xf32>
    %c0_13 = arith.constant 0 : index
    %c0_14 = arith.constant 0 : index
    %17 = vector.load %arg9[%c0_13, %c0_14] : memref<1x1xf32, #tpu.memory_space<vmem>>, vector<1x1xf32>
    %18 = vector.broadcast %17 : vector<1x1xf32> to vector<1x576xf32>
    %19 = arith.addf %16, %18 : vector<1x576xf32>
    %c0_15 = arith.constant 0 : index
    %c0_16 = arith.constant 0 : index
    %c0_17 = arith.constant 0 : index
    %20 = vector.load %arg10[%c0_15, %c0_16, %c0_17] : memref<1x1x576xf32, #tpu.memory_space<vmem>>, vector<1x1x576xf32>
    %21 = vector.shape_cast %20 : vector<1x1x576xf32> to vector<1x576xf32>
    %22 = vector.shape_cast %19 : vector<1x576xf32> to vector<1x1x576xf32>
    tpu.vector_store %arg10[%c0_15, %c0_16, %c0_17], %22 {strides = array<i32>} : memref<1x1x576xf32, #tpu.memory_space<vmem>>, vector<1x1x576xf32>,
    return
  }
  func.func @transform_0(%arg0: i32, %arg1: i32) -> (i32, i32, i32) {
    %c0_i32 = arith.constant 0 : i32
    %c0_i32_0 = arith.constant 0 : i32
    %c0_i32_1 = arith.constant 0 : i32
    return %arg0, %c0_i32, %c0_i32_0 : i32, i32, i32
  }
  func.func @transform_1(%arg0: i32, %arg1: i32) -> (i32, i32) {
    %c0_i32 = arith.constant 0 : i32
    %c0_i32_0 = arith.constant 0 : i32
    %c0_i32_1 = arith.constant 0 : i32
    return %c0_i32, %c0_i32_0 : i32, i32
  }
  func.func @transform_2(%arg0: i32, %arg1: i32) -> (i32, i32) {
    %c0_i32 = arith.constant 0 : i32
    %c0_i32_0 = arith.constant 0 : i32
    %c0_i32_1 = arith.constant 0 : i32
    return %c0_i32, %c0_i32_0 : i32, i32
  }
  func.func @transform_3(%arg0: i32, %arg1: i32) -> (i32, i32) {
    %c0_i32 = arith.constant 0 : i32
    %c0_i32_0 = arith.constant 0 : i32
    return %c0_i32, %arg1 : i32, i32
  }
  func.func @transform_4(%arg0: i32, %arg1: i32) -> (i32, i32) {
    %c0_i32 = arith.constant 0 : i32
    %c0_i32_0 = arith.constant 0 : i32
    %c0_i32_1 = arith.constant 0 : i32
    return %c0_i32, %c0_i32_0 : i32, i32
  }
  func.func @transform_5(%arg0: i32, %arg1: i32) -> (i32, i32) {
    %c0_i32 = arith.constant 0 : i32
    %c0_i32_0 = arith.constant 0 : i32
    %c0_i32_1 = arith.constant 0 : i32
    return %c0_i32, %c0_i32_0 : i32, i32
  }
  func.func @transform_6(%arg0: i32, %arg1: i32) -> (i32, i32) {
    %c0_i32 = arith.constant 0 : i32
    %c0_i32_0 = arith.constant 0 : i32
    %c0_i32_1 = arith.constant 0 : i32
    return %c0_i32, %c0_i32_0 : i32, i32
  }
  func.func @transform_7(%arg0: i32, %arg1: i32) -> (i32, i32) {
    %c0_i32 = arith.constant 0 : i32
    %c0_i32_0 = arith.constant 0 : i32
    %c0_i32_1 = arith.constant 0 : i32
    return %c0_i32, %c0_i32_0 : i32, i32
  }
  func.func @transform_8(%arg0: i32, %arg1: i32) -> (i32, i32, i32) {
    %c0_i32 = arith.constant 0 : i32
    %c0_i32_0 = arith.constant 0 : i32
    return %arg0, %c0_i32, %arg1 : i32, i32, i32
  }
}

</mosaic_0001>

<bundles_post_ra>
// kernel: lraspp_forward.6
= control target key start
LH: loop header
LB: loop body
LE: loop exit
PB: predicated region body
PF: predicated region fallthrough
CT: control target
= control target key end

     0   :  { %s1294_s29 = smov 0   ;;  %s1447_s0 = inlined_call_operand.vmem [shape: bf16[2,16,128], index: 0, kind: input, shape index: {}]   ;;  %s1448_s1 = inlined_call_operand.vmem [shape: f32[16,1], index: 1, kind: input, shape index: {}]   ;;  %s1449_s2 = inlined_call_operand.vmem [shape: f32[16,1], index: 2, kind: input, shape index: {}]   ;;  %s1450_s3 = inlined_call_operand.vmem [shape: bf16[128,128], index: 3, kind: input, shape index: {}]   ;;  %s1451_s4 = inlined_call_operand.vmem [shape: f32[1,128], index: 4, kind: input, shape index: {}]   ;;  %s1452_s5 = inlined_call_operand.vmem [shape: f32[9,128], index: 5, kind: input, shape index: {}]   ;;  %s1453_s6 = inlined_call_operand.vmem [shape: f32[1,128], index: 6, kind: input, shape index: {}]   ;;  %s1454_s7 = inlined_call_operand.vmem [shape: bf16[4,16], index: 7, kind: input, shape index: {}]   ;;  %s1455_s8 = inlined_call_operand.vmem [shape: bf16[128,128], index: 8, kind: input, shape index: {}]   ;;  %s1456_s9 = inlined_call_operand.vmem [shape: f32[1,128], index: 9, kind: input, shape index: {}]   ;;  %s1457_s10 = inlined_call_operand.vmem [shape: bf16[128,128], index: 10, kind: input, shape index: {}]   ;;  %s1458_s11 = inlined_call_operand.vmem [shape: f32[1,128], index: 11, kind: input, shape index: {}]   ;;  %s1459_s12 = inlined_call_operand.vmem [shape: bf16[128,128], index: 12, kind: input, shape index: {}]   ;;  %s1460_s13 = inlined_call_operand.vmem [shape: f32[1,128], index: 13, kind: input, shape index: {}]   ;;  %s1461_s14 = inlined_call_operand.vmem [shape: bf16[2,4,128], index: 14, kind: output, shape index: {}]  }
   0x1 LB: > { %s1012_s30 = sadd.s32 4294967295, %s1214_s29   ;;  %p1016_p0 = scmp.ge.s32.totalorder %s1214_s29, 1  ;;  %s1214_s29 = sphi %s1294_s29, %s24_s29  }
   0x2   : > { %p412_p1 = scmp.lt.s32.totalorder %s1214_s29, 3 }
   0x4   : > { %p413_p2 = pnand %p1016_p0, %p412_p1 }
   0x5   : > { %p457_p3 = scmp.lt.s32.totalorder (!%p413_p2), %s1012_s30, 1 }
   0x6   : > { %416 = sbr.rel (%p413_p2) target bundleno = 793 (0x319), region = 76 }
   0xb   : > { %v1164_v0 = vld [vmem:[%s1450_s3 + $0x38] sm:$0xff]  ;;  %v1163_v1 = vld [vmem:[%s1450_s3 + $0x30] sm:$0xff]  ;;  %v1216_v2 = vmov 0   ;;  %v591_v3 = vld [vmem:[%s1448_s1] sm:$0xff]  ;;  %s1463_s30 = smov (!%p457_p3, %s1012_s30), 1  ;;  %v1217_v14 = vmov 0.0  }
   0xc   : > { %543 = vmatpush.bf16.msra.mxu0 %v1164_v0  ;;  %1200 = vset.pattern.permute.xlu0 %v1216_v2  ;;  %v643_v4 = vld [vmem:[%s1449_s2] sm:$0xff]  ;;  %v1162_v5 = vld [vmem:[%s1450_s3 + $0x28] sm:$0xff]  ;;  %v1160_v9 = vld [vmem:[%s1450_s3 + $0x18] sm:$0xff]  ;;  %s1155_s23 = sshll.u32 %s1463_s30, 3  ;;  %567 = vst [vmem:[#allocation2] sm:$0xff] %v1217_v14  ;;  %vm677_vm0 = vcmask 130048  }
   0xd   : > { %595 = vperm.xlu0 %1200, %v591_v3   ;;  %1201 = vset.pattern.permute.xlu1 %v1216_v2  ;;  %v592_v6 = vld [vmem:[%s1448_s1 + $0x8] sm:$0xff]  ;;  %v1161_v8 = vld [vmem:[%s1450_s3 + $0x20] sm:$0xff]  ;;  %v1159_v10 = vld [vmem:[%s1450_s3 + $0x10] sm:$0xff]  ;;  %s461_s28 = scalar_lea.vmem %s1447_s0, %s1155_s23  ;;  %568 = vst [vmem:[#allocation2 + $0x18] sm:$0xff] %v1217_v14  ;;  %vm694_vm1 = vcmask 1043456   ;;  %s1019_s23 = sshll.u32 %s1463_s30, 1 }
   0xe   : > { %647 = vperm.xlu1 %1201, %v643_v4   ;;  %v644_v7 = vld [vmem:[%s1449_s2 + $0x8] sm:$0xff]  ;;  %v1157_v12 = vld [vmem:[%s1450_s3] sm:$0xff]  ;;  %v1172_v49 = vld [vmem:[%s1455_s8 + $0x38] sm:$0xff]  ;;  %s465_s26 = scalar_lea.vmem %s1461_s14, %s1019_s23 }
   0xf   : > { %v1158_v11 = vld [vmem:[%s1450_s3 + $0x8] sm:$0xff]  ;;  %v1156_v13 = vld [vmem:[%s461_s28] sm:$0xff]  ;;  %v1171_v50 = vld [vmem:[%s1455_s8 + $0x30] sm:$0xff]  ;;  %776 = vmatpush.bf16.msra.mxu2 %v1172_v49 }
  0x10   : > { %544 = vmatpush.bf16.msra.mxu0 %v1163_v1  ;;  %v1202_v15 = vld [vmem:[%s1451_s4] ss:$0 sm:$0xff]  ;;  %v1203_v48 = vld [vmem:[%s1452_s5 + $0x8] ss:$0 sm:$0xff] }
  0x11   : > { %v571_v30 = vld [vmem:[%s1452_s5] sm:$0xff] }
  0x12   : > { %v575_v31 = vperm.slane %v571_v30, 0  ;;  %v580_v32 = vperm.slane %v571_v30, 3  ;;  %v607_v35 = vperm.slane %v571_v30, 1  ;;  %v612_v37 = vperm.slane %v571_v30, 4  ;;  %v675_v49 = vld [vmem:[%s1454_s7] sm:$0x3] }
  0x13   : > { %v627_v38 = vperm.slane %v571_v30, 2  ;;  %v586_v42 = vperm.slane %v571_v30, 6  ;;  %v618_v43 = vperm.slane %v571_v30, 7  ;;  %v632_v46 = vperm.slane %v571_v30, 5  ;;  %777 = vmatpush.bf16.msra.mxu2 %v1171_v50  ;;  %v1168_v50 = vld [vmem:[%s1455_s8 + $0x18] sm:$0xff] }
  0x14   : > { %545 = vmatpush.bf16.msra.mxu0 %v1162_v5 }
  0x15   : > { %600 = vperm.xlu0 %1200, %v592_v6  }
  0x16   : > { %652 = vperm.xlu1 %1201, %v644_v7  }
  0x18   : > { %546 = vmatpush.bf16.msra.mxu0 %v1161_v8 }
  0x1c   : > { %547 = vmatpush.bf16.msra.mxu0 %v1160_v9 }
  0x20   : > { %548 = vmatpush.bf16.msra.mxu0 %v1159_v10 }
  0x24   : > { %549 = vmatpush.bf16.msra.mxu0 %v1158_v11 }
  0x28   : > { %550 = vmatpush.bf16.msra.mxu0 %v1157_v12 }
  0x2b   : > { %551 = vmatmul.bf16.vlgmr.msra.gmra.mxu0 %v1156_v13 }
  0x7f   : > { %v596_v39 = vpop.permute.xlu0 %595 }
  0x80   : > { %v648_v47 = vpop.permute.xlu1 %647 }
  0x88   : > { %v653_v30 = vpop.permute.xlu1 %652 }
  0xa8   : > { %v552_v16 = vpop.f32.mrf.mxu0 }
  0xa9   : > { %v553_v17 = vadd.f32 %v1202_v15, %v552_v16 }
  0xab   : > { %v557_v18 = vadd.f32 3.0, %v553_v17 }
  0xad   : > { %v559_v19 = vmax.f32 %v557_v18, 0.0  ;;  %v1170_v18 = vld [vmem:[%s1455_s8 + $0x28] sm:$0xff] }
  0xae   : > { %778 = vmatpush.bf16.msra.mxu2 %v1170_v18  ;;  %v1186_v18 = vld [vmem:[%s1459_s12 + $0x28] sm:$0xff] }
  0xaf   : > { %v561_v20 = vmin.f32 %v559_v19, 6.0 }
  0xb0   : > { %v554_v21 = vpop.f32.mrf.mxu0 }
  0xb1   : > { %v563_v22 = vmul.f32 %v561_v20, %v553_v17  ;;  %v555_v23 = vadd.f32 %v1202_v15, %v554_v21 }
  0xb3   : > { %v565_v24 = vmul.f32 0.16666667, %v563_v22  ;;  %v558_v25 = vadd.f32 3.0, %v555_v23 }
  0xb5   : > { %569 = vst [vmem:[#allocation2 + $0x8] sm:$0xff] %v565_v24  ;;  %v560_v26 = vmax.f32 %v558_v25, 0.0  ;;  %v613_v53 = vmul.f32 %v612_v37, %v565_v24  ;;  %v601_v24 = vpop.permute.xlu0 %600 }
  0xb7   : > { %v562_v27 = vmin.f32 %v560_v26, 6.0 }
  0xb9   : > { %v564_v28 = vmul.f32 %v562_v27, %v555_v23 }
  0xbb   : > { %v566_v29 = vmul.f32 0.16666667, %v564_v28 }
  0xbc   : > { %v573_v33 = vld [vmem:[#allocation2 + $0x3] sm:$0xff] }
  0xbd   : > { %570 = vst [vmem:[#allocation2 + $0x10] sm:$0xff] %v566_v29  ;;  %v578_v34 = vld [vmem:[#allocation2 + $0x7] sm:$0xff]  ;;  %v576_v40 = vmul.f32 %v575_v31, %v573_v33  ;;  %v614_v56 = vmul.f32 %v612_v37, %v566_v29  ;;  %v1204_v29 = vld [vmem:[%s1453_s6] ss:$0 sm:$0xff] }
  0xbe   : > { %v605_v36 = vld [vmem:[#allocation2 + $0x4] sm:$0xff]  ;;  %v581_v41 = vmul.f32 %v580_v32, %v578_v34 }
  0xbf   : > { %v625_v44 = vld [vmem:[#allocation2 + $0x5] sm:$0xff]  ;;  %v608_v45 = vmul.f32 %v607_v35, %v605_v36 }
  0xc0   : > { %v628_v55 = vmul.f32 %v627_v38, %v625_v44  ;;  %v583_v57 = vadd.f32 %v581_v41, %v576_v40 }
  0xc1   : > { %v615_v0 = vadd.f32 %v613_v53, %v608_v45  ;;  %v1165_v53 = vld [vmem:[%s1455_s8] sm:$0xff] }
  0xc4   : > { %v574_v51 = vld [vmem:[#allocation2 + $0xb] sm:$0xff]  ;;  %v585_v63 = vld [vmem:[#allocation2 + $0x13] sm:$0xff] }
  0xc5   : > { %v606_v52 = vld [vmem:[#allocation2 + $0xc] sm:$0xff]  ;;  %v587_v58 = vmul.f32 %v586_v42, %v574_v51  ;;  %v577_v61 = vmul.f32 %v575_v31, %v574_v51  ;;  %v617_v4 = vld [vmem:[#allocation2 + $0x14] sm:$0xff]  ;;  %v588_v8 = vmul.f32 %v586_v42, %v585_v63  ;;  %v1169_v31 = vld [vmem:[%s1455_s8 + $0x20] sm:$0xff] }
  0xc6   : > { %v626_v54 = vld [vmem:[#allocation2 + $0xd] sm:$0xff]  ;;  %v619_v59 = vmul.f32 %v618_v43, %v606_v52  ;;  %v609_v3 = vmul.f32 %v607_v35, %v606_v52  ;;  %v637_v10 = vld [vmem:[#allocation2 + $0x15] sm:$0xff]  ;;  %v620_v17 = vmul.f32 %v618_v43, %v617_v4  ;;  %779 = vmatpush.bf16.msra.mxu2 %v1169_v31 }
  0xc7   : > { %v630_v60 = vld [vmem:[#allocation2 + $0x9] sm:$0xff]  ;;  %v631_v5 = vld [vmem:[#allocation2 + $0x11] sm:$0xff]  ;;  %v589_v6 = vadd.f32 %v587_v58, %v583_v57  ;;  %v639_v7 = vmul.f32 %v1203_v48, %v626_v54  ;;  %v629_v9 = vmul.f32 %v627_v38, %v626_v54  ;;  %v640_v22 = vmul.f32 %v1203_v48, %v637_v10 }
  0xc8   : > { %v579_v62 = vld [vmem:[#allocation2 + $0xf] sm:$0xff]  ;;  %v633_v1 = vmul.f32 %v632_v46, %v630_v60  ;;  %v616_v13 = vadd.f32 %v614_v56, %v609_v3  ;;  %v634_v14 = vmul.f32 %v632_v46, %v631_v5  ;;  %v621_v16 = vadd.f32 %v619_v59, %v615_v0  ;;  %v1177_v60 = vld [vmem:[%s1457_s10 + $0x20] sm:$0xff]  ;;  %v1176_v63 = vld [vmem:[%s1457_s10 + $0x18] sm:$0xff] }
  0xc9   : > { %v582_v2 = vmul.f32 %v580_v32, %v579_v62  ;;  %v603_v15 = vmul.f32 %v596_v39, %v589_v6  ;;  %v1167_v51 = vld [vmem:[%s1455_s8 + $0x10] sm:$0xff]  ;;  %v1166_v52 = vld [vmem:[%s1455_s8 + $0x8] sm:$0xff]  ;;  %v1218_v54 = vmov 4.0  }
  0xca   : > { %v635_v11 = vadd.f32 %v633_v1, %v628_v55  ;;  %v636_v21 = vadd.f32 %v634_v14, %v629_v9  ;;  %v622_v27 = vadd.f32 %v620_v17, %v616_v13  ;;  %780 = vmatpush.bf16.msra.mxu2 %v1168_v50  ;;  %1206 = vrcp.f32 %v1218_v54  ;;  %v1180_v55 = vld [vmem:[%s1457_s10 + $0x38] sm:$0xff]  ;;  %v1179_v56 = vld [vmem:[%s1457_s10 + $0x30] sm:$0xff]  ;;  %v1178_v58 = vld [vmem:[%s1457_s10 + $0x28] sm:$0xff] }
  0xcb   : > { %v584_v12 = vadd.f32 %v582_v2, %v577_v61  ;;  %v623_v23 = vadd.f32 %v621_v16, %v603_v15  ;;  %856 = vmatpush.bf16.msra.mxu3 %v1180_v55  ;;  %v1175_v4 = vld [vmem:[%s1457_s10 + $0x10] sm:$0xff]  ;;  %v1174_v14 = vld [vmem:[%s1457_s10 + $0x8] sm:$0xff]  ;;  %v1173_v15 = vld [vmem:[%s1457_s10] sm:$0xff] }
  0xcc   : > { %v641_v19 = vadd.f32 %v639_v7, %v635_v11  ;;  %v642_v28 = vadd.f32 %v640_v22, %v636_v21  ;;  %v1188_v16 = vld [vmem:[%s1459_s12 + $0x38] sm:$0xff]  ;;  %v1187_v17 = vld [vmem:[%s1459_s12 + $0x30] sm:$0xff] }
  0xcd   : > { %v590_v20 = vadd.f32 %v588_v8, %v584_v12 }
  0xce   : > { %v655_v25 = vmul.f32 %v648_v47, %v641_v19  ;;  %v656_v34 = vmul.f32 %v653_v30, %v642_v28  ;;  %781 = vmatpush.bf16.msra.mxu2 %v1167_v51  ;;  %v1185_v19 = vld [vmem:[%s1459_s12 + $0x20] sm:$0xff]  ;;  %v1182_v28 = vld [vmem:[%s1459_s12 + $0x8] sm:$0xff] }
  0xcf   : > { %v604_v26 = vmul.f32 %v601_v24, %v590_v20  ;;  %857 = vmatpush.bf16.msra.mxu3 %v1179_v56  ;;  %v727_v20 = vld [vmem:[%s1456_s9] sm:$0x1] }
  0xd0   : > { %v657_v32 = vadd.f32 %v655_v25, %v623_v23  ;;  %v1207_v57 = vpop.eup %1206  ;;  %v807_v30 = vld [vmem:[%s1458_s11] sm:$0x1] }
  0xd1   : > { %v624_v33 = vadd.f32 %v622_v27, %v604_v26  ;;  %v703_v59 = vmul.f32 4.0, %v1207_v57  ;;  %vm707_vm2 = vweird.f32 %v1207_v57  ;;  %v1184_v26 = vld [vmem:[%s1459_s12 + $0x18] sm:$0xff]  ;;  %v1183_v27 = vld [vmem:[%s1459_s12 + $0x10] sm:$0xff] }
  0xd2   : > { %v663_v36 = vadd.f32 %v1204_v29, %v657_v32  ;;  %782 = vmatpush.bf16.msra.mxu2 %v1166_v52 }
  0xd3   : > { %v658_v35 = vadd.f32 %v656_v34, %v624_v33  ;;  %858 = vmatpush.bf16.msra.mxu3 %v1178_v58  ;;  %v704_v61 = vsub.f32 1.0, %v703_v59 }
  0xd4   : > { %v665_v38 = vadd.f32 3.0, %v663_v36 }
  0xd5   : > { %v664_v37 = vadd.f32 %v1204_v29, %v658_v35  ;;  %v705_v2 = vmul.f32 %v1207_v57, %v704_v61  ;;  %v1181_v29 = vld [vmem:[%s1459_s12] sm:$0xff] }
  0xd6   : > { %v667_v40 = vmax.f32 %v665_v38, 0.0  ;;  %783 = vmatpush.bf16.msra.mxu2 %v1165_v53 }
  0xd7   : > { %v666_v39 = vadd.f32 3.0, %v664_v37  ;;  %859 = vmatpush.bf16.msra.mxu3 %v1177_v60  ;;  %v706_v6 = vadd.f32 %v1207_v57, %v705_v2 }
  0xd8   : > { %v669_v42 = vmin.f32 %v667_v40, 6.0 }
  0xd9   : > { %v668_v41 = vmax.f32 %v666_v39, 0.0  ;;  %v708_v10 = vsel %vm707_vm2, %v1207_v57, %v706_v6 }
  0xda   : > { %v671_v44 = vmul.f32 %v669_v42, %v663_v36 }
  0xdb   : > { %v670_v43 = vmin.f32 %v668_v41, 6.0  ;;  %860 = vmatpush.bf16.msra.mxu3 %v1176_v63  ;;  %v1205_v41 = vld [vmem:[%s1460_s13] ss:$0 sm:$0xff] }
  0xdc   : > { %v673_v46 = vmul.f32 0.16666667, %v671_v44 }
  0xdd   : > { %v672_v45 = vmul.f32 %v670_v43, %v664_v37 }
  0xdf   : > { %v674_v47 = vmul.f32 0.16666667, %v672_v45  ;;  %861 = vmatpush.bf16.msra.mxu3 %v1175_v4 }
  0xe1   : > { %v676_v48 = vpack.c.bf16 %v674_v47, %v673_v46 }
  0xe3   : > { %688 = vmatpush.bf16.msra.mxu1 %v676_v48  ;;  %862 = vmatpush.bf16.msra.mxu3 %v1174_v14 }
  0xe6   : > { %1056 = vmatmul.msk.bf16.vlgmr.msra.gmra.mxu1 %vm677_vm0, %v675_v49 }
  0xe7   : > { %863 = vmatpush.bf16.msra.mxu3 %v1173_v15  ;;  %944 = vmatpush.bf16.msrb.mxu1 %v1188_v16 }
  0xeb   : > { %945 = vmatpush.bf16.msrb.mxu1 %v1187_v17 }
  0xef   : > { %946 = vmatpush.bf16.msrb.mxu1 %v1186_v18 }
  0xf3   : > { %947 = vmatpush.bf16.msrb.mxu1 %v1185_v19 }
  0xf7   : > { %948 = vmatpush.bf16.msrb.mxu1 %v1184_v26 }
  0xfb   : > { %949 = vmatpush.bf16.msrb.mxu1 %v1183_v27 }
  0xff   : > { %950 = vmatpush.bf16.msrb.mxu1 %v1182_v28 }
 0x103   : > { %951 = vmatpush.bf16.msrb.mxu1 %v1181_v29 }
 0x163   : > { %v690_v62 = vpop.f32.mrf.mxu1 }
 0x164   : > { %v695_v0 = vsel %vm694_vm1, %v690_v62, 0.0 }
 0x165   : > { %v696_v1 = vrot.slane %v695_v0, 4 }
 0x167   : > { %v697_v3 = vadd.f32 %v696_v1, %v695_v0 }
 0x169   : > { %v698_v5 = vrot.slane %v697_v3, 2 }
 0x16b   : > { %v699_v7 = vadd.f32 %v698_v5, %v697_v3  ;;  %v692_v8 = vpop.f32.mrf.mxu1 }
 0x16d   : > { %v700_v9 = vrot.slane %v699_v7, 1 }
 0x16f   : > { %v701_v11 = vadd.f32 %v700_v9, %v699_v7 }
 0x171   : > { %v709_v12 = vmul.f32 %v708_v10, %v701_v11 }
 0x173   : > { %v710_v13 = vpack.c.bf16 %v709_v12, %v709_v12 }
 0x175   : > { %784 = vmatmul.bf16.vlgmr.msra.gmra.mxu2 %v710_v13 }
 0x1f8   : > { %v785_v21 = vpop.f32.mrf.mxu2 }
 0x1f9   : > { %v786_v22 = vadd.f32 %v785_v21, %v727_v20 }
 0x1fb   : > { %v789_v23 = vmax.f32 %v786_v22, 0.0 }
 0x1fd   : > { %v790_v24 = vpack.c.bf16 %v789_v23, %v789_v23 }
 0x1ff   : > { %864 = vmatmul.bf16.vlgmr.msra.gmra.mxu3 %v790_v24 }
 0x200   : > { %v787_v25 = vpop.f32.mrf.mxu2 }
 0x282   : > { %v865_v31 = vpop.f32.mrf.mxu3 }
 0x283   : > { %v866_v32 = vadd.f32 %v865_v31, %v807_v30 }
 0x285   : > { %v869_v33 = vadd.f32 3.0, %v866_v32 }
 0x287   : > { %v870_v34 = vmax.f32 %v869_v33, 0.0 }
 0x289   : > { %v871_v35 = vmin.f32 %v870_v34, 6.0 }
 0x28a   : > { %v867_v36 = vpop.f32.mrf.mxu3 }
 0x28b   : > { %v872_v37 = vmul.f32 0.16666667, %v871_v35 }
 0x28d   : > { %v873_v38 = vperm.slane %v872_v37, 0 }
 0x28f   : > { %v874_v39 = vmul.f32 %v873_v38, %v690_v62 }
 0x291   : > { %v875_v40 = vpack.c.bf16 %v874_v39, %v874_v39 }
 0x293   : > { %952 = vmatmul.bf16.vlgmr.msrb.gmra.mxu1 %v875_v40 }
 0x310   : > { %v953_v42 = vpop.f32.mrf.mxu1 }
 0x311   : > { %v954_v43 = vadd.f32 %v1205_v41, %v953_v42 }
 0x313   : > { %v957_v44 = vpack.c.bf16 %v954_v43, %v954_v43 }
 0x315   : > { %958 = vst [vmem:[%s465_s26] sm:$0x3] %v957_v44 }
 0x318   : > { %v955_v45 = vpop.f32.mrf.mxu1 }
 0x319 PF: > { %s24_s29 = sadd.s32 1, %s1214_s29  }
 0x31a   : > { %p21_p4 = scmp.ge.s32.totalorder %s24_s29, 4  }
 0x31c   :  { %23 = sbr.rel (!%p21_p4) target bundleno = 1 (0x1), region = 106 }

// kernel: lraspp_forward.5
= control target key start
LH: loop header
LB: loop body
LE: loop exit
PB: predicated region body
PF: predicated region fallthrough
CT: control target
= control target key end

     0   :  { %s1268_s13 = smov 0   ;;  %s1613_s0 = inlined_call_operand.vmem [shape: bf16[2,64,128], index: 0, kind: input, shape index: {}]   ;;  %s1614_s1 = inlined_call_operand.vmem [shape: f32[64,1], index: 1, kind: input, shape index: {}]   ;;  %s1615_s2 = inlined_call_operand.vmem [shape: f32[64,1], index: 2, kind: input, shape index: {}]   ;;  %s1616_s3 = inlined_call_operand.vmem [shape: bf16[128,128], index: 3, kind: input, shape index: {}]   ;;  %s1617_s4 = inlined_call_operand.vmem [shape: f32[1,128], index: 4, kind: input, shape index: {}]   ;;  %s1618_s5 = inlined_call_operand.vmem [shape: f32[9,128], index: 5, kind: input, shape index: {}]   ;;  %s1619_s6 = inlined_call_operand.vmem [shape: f32[1,128], index: 6, kind: input, shape index: {}]   ;;  %s1620_s7 = inlined_call_operand.vmem [shape: bf16[16,64], index: 7, kind: input, shape index: {}]   ;;  %s1621_s8 = inlined_call_operand.vmem [shape: bf16[128,128], index: 8, kind: input, shape index: {}]   ;;  %s1622_s9 = inlined_call_operand.vmem [shape: f32[1,128], index: 9, kind: input, shape index: {}]   ;;  %s1623_s10 = inlined_call_operand.vmem [shape: bf16[2,16,128], index: 10, kind: output, shape index: {}]  }
   0x1 LB: > { %s1054_s14 = sadd.s32 4294967295, %s1209_s13   ;;  %p1058_p0 = scmp.ge.s32.totalorder %s1209_s13, 1  ;;  %s1209_s13 = sphi %s1268_s13, %s20_s13  }
   0x2   : > { %p312_p1 = scmp.lt.s32.totalorder %s1209_s13, 3 }
   0x4   : > { %p313_p2 = pnand %p1058_p0, %p312_p1 }
   0x6   : > { %316 = sbr.rel (%p313_p2) target bundleno = 546 (0x222), region = 60 }
   0xb   : > { %v1163_v0 = vld [vmem:[%s1616_s3 + $0x38] sm:$0xff]  ;;  %v1211_v1 = vmov 0   ;;  %v1162_v2 = vld [vmem:[%s1616_s3 + $0x30] sm:$0xff]  ;;  %v1161_v5 = vld [vmem:[%s1616_s3 + $0x28] sm:$0xff]  ;;  %p350_p3 = scmp.lt.s32.totalorder %s1054_s14, 1  ;;  %v1212_v29 = vmov 0.0  }
   0xc   : > { %1196 = vset.pattern.permute.xlu0 %v1211_v1  ;;  %1197 = vset.pattern.permute.xlu1 %v1211_v1  ;;  %v603_v3 = vld [vmem:[%s1614_s1 + $0x30] sm:$0xff]  ;;  %v604_v6 = vld [vmem:[%s1614_s1 + $0x38] sm:$0xff]  ;;  %v1160_v7 = vld [vmem:[%s1616_s3 + $0x20] sm:$0xff]  ;;  %530 = vst [vmem:[#allocation2] sm:$0xff] %v1212_v29  ;;  %vm894_vm0 = vcmask 523264  }
   0xd   : > { %461 = vmatpush.bf16.msra.mxu0 %v1163_v0  ;;  %1178 = vmatpush.bf16.msra.mxu3 %v1163_v0  ;;  %v773_v4 = vld [vmem:[%s1615_s2 + $0x30] sm:$0xff]  ;;  %v1159_v8 = vld [vmem:[%s1616_s3 + $0x18] sm:$0xff]  ;;  %v771_v9 = vld [vmem:[%s1615_s2 + $0x20] sm:$0xff]  ;;  %s1635_s14 = smov (!%p350_p3, %s1054_s14), 1  ;;  %531 = vst [vmem:[#allocation2 + $0x8] sm:$0xff] %v1212_v29 }
   0xe   : > { %637 = vperm.xlu0 %1196, %v603_v3   ;;  %1198 = vset.pattern.permute.xlu2 %v1211_v1  ;;  %v774_v10 = vld [vmem:[%s1615_s2 + $0x38] sm:$0xff]  ;;  %v1158_v11 = vld [vmem:[%s1616_s3 + $0x10] sm:$0xff]  ;;  %v601_v12 = vld [vmem:[%s1614_s1 + $0x20] sm:$0xff]  ;;  %s1150_s23 = sshll.u32 %s1635_s14, 5  ;;  %532 = vst [vmem:[#allocation2 + $0x50] sm:$0xff] %v1212_v29 }
   0xf   : > { %807 = vperm.xlu1 %1197, %v773_v4   ;;  %627 = vperm.xlu2 %1198, %v601_v12   ;;  %v1157_v13 = vld [vmem:[%s1616_s3 + $0x8] sm:$0xff]  ;;  %v600_v14 = vld [vmem:[%s1614_s1 + $0x18] sm:$0xff]  ;;  %v1156_v17 = vld [vmem:[%s1616_s3] sm:$0xff]  ;;  %s354_s16 = scalar_lea.vmem %s1613_s0, %s1150_s23  ;;  %533 = vst [vmem:[#allocation2 + $0x58] sm:$0xff] %v1212_v29  ;;  %s1151_s23 = sshll.u32 %s1635_s14, 3 }
  0x10   : > { %v772_v15 = vld [vmem:[%s1615_s2 + $0x28] sm:$0xff]  ;;  %v1152_v18 = vld [vmem:[%s354_s16] sm:$0xff]  ;;  %v1154_v19 = vld [vmem:[%s354_s16 + $0x10] sm:$0xff]  ;;  %s359_s26 = scalar_lea.vmem %s1623_s10, %s1151_s23 }
  0x11   : > { %462 = vmatpush.bf16.msra.mxu0 %v1162_v2  ;;  %1179 = vmatpush.bf16.msra.mxu3 %v1162_v2  ;;  %v602_v16 = vld [vmem:[%s1614_s1 + $0x28] sm:$0xff]  ;;  %v597_v20 = vld [vmem:[%s1614_s1] sm:$0xff]  ;;  %v769_v21 = vld [vmem:[%s1615_s2 + $0x10] sm:$0xff] }
  0x12   : > { %v599_v22 = vld [vmem:[%s1614_s1 + $0x10] sm:$0xff]  ;;  %v768_v23 = vld [vmem:[%s1615_s2 + $0x8] sm:$0xff]  ;;  %v770_v25 = vld [vmem:[%s1615_s2 + $0x18] sm:$0xff] }
  0x13   : > { %v598_v24 = vld [vmem:[%s1614_s1 + $0x8] sm:$0xff]  ;;  %v1155_v27 = vld [vmem:[%s354_s16 + $0x18] sm:$0xff]  ;;  %v767_v28 = vld [vmem:[%s1615_s2] sm:$0xff] }
  0x14   : > { %v1153_v26 = vld [vmem:[%s354_s16 + $0x8] sm:$0xff]  ;;  %v1363_v31 = vld [vmem:[%s1617_s4] ss:$0 sm:$0xff] }
  0x15   : > { %463 = vmatpush.bf16.msra.mxu0 %v1161_v5  ;;  %1180 = vmatpush.bf16.msra.mxu3 %v1161_v5  ;;  %v542_v58 = vld [vmem:[%s1618_s5] sm:$0xff] }
  0x16   : > { %642 = vperm.xlu0 %1196, %v604_v6   ;;  %v1385_v0 = vperm.slane %v542_v58, 1  ;;  %v1387_v4 = vperm.slane %v542_v58, 4  ;;  %v1389_v5 = vperm.slane %v542_v58, 0 }
  0x17   : > { %812 = vperm.xlu1 %1197, %v774_v10   ;;  %632 = vperm.xlu2 %1198, %v602_v16  }
  0x18   : > { %v662_v12 = vmul.f32 0.0, %v1385_v0 }
  0x19   : > { %464 = vmatpush.bf16.msra.mxu0 %v1160_v7  ;;  %1181 = vmatpush.bf16.msra.mxu3 %v1160_v7 }
  0x1d   : > { %465 = vmatpush.bf16.msra.mxu0 %v1159_v8  ;;  %1182 = vmatpush.bf16.msra.mxu3 %v1159_v8  ;;  %v544_v8 = vld [vmem:[#allocation2 + $0x7] sm:$0xff] }
  0x1e   : > { %797 = vperm.xlu0 %1196, %v771_v9   ;;  %v1391_v9 = vperm.slane %v542_v58, 3 }
  0x1f   : > { %802 = vperm.xlu1 %1197, %v772_v15   ;;  %617 = vperm.xlu2 %1198, %v599_v22  }
  0x21   : > { %466 = vmatpush.bf16.msra.mxu0 %v1158_v11  ;;  %1183 = vmatpush.bf16.msra.mxu3 %v1158_v11 }
  0x25   : > { %467 = vmatpush.bf16.msra.mxu0 %v1157_v13  ;;  %1184 = vmatpush.bf16.msra.mxu3 %v1157_v13  ;;  %v1396_v13 = vperm.slane %v542_v58, 7 }
  0x26   : > { %622 = vperm.xlu0 %1196, %v600_v14  }
  0x27   : > { %787 = vperm.xlu1 %1197, %v769_v21   ;;  %792 = vperm.xlu2 %1198, %v770_v25   ;;  %v1404_v21 = vperm.slane %v542_v58, 6 }
  0x29   : > { %468 = vmatpush.bf16.msra.mxu0 %v1156_v17  ;;  %1185 = vmatpush.bf16.msra.mxu3 %v1156_v17 }
  0x2c   : > { %469 = vmatmul.bf16.vlgmr.msra.gmra.mxu0 %v1152_v18  ;;  %479 = vmatmul.bf16.vlgmr.msra.gmra.mxu3 %v1154_v19  ;;  %v1399_v18 = vperm.slane %v542_v58, 2 }
  0x2e   : > { %607 = vperm.xlu0 %1196, %v597_v20   ;;  %v553_v20 = vmul.f32 %v1389_v5, %v544_v8 }
  0x2f   : > { %612 = vperm.xlu1 %1197, %v598_v24   ;;  %777 = vperm.xlu2 %1198, %v767_v28   ;;  %v1407_v24 = vperm.slane %v542_v58, 5 }
  0x36   : > { %782 = vperm.xlu0 %1196, %v768_v23  }
  0x3c   : > { %474 = vmatmul.bf16.gmra.mxu0 %v1153_v26  ;;  %484 = vmatmul.bf16.gmra.mxu3 %v1155_v27 }
  0x69   : > { %v1370_v38 = vpop.permute.xlu2 %627 }
  0x71   : > { %v1378_v56 = vpop.permute.xlu2 %632 }
  0x72   : > { %1625 = vst [vmem:[#allocation4_spill] sm:$0xff] %v1378_v56 }
  0x79   : > { %v1409_v27 = vpop.permute.xlu2 %617 }
  0x80   : > { %v1358_v30 = vpop.permute.xlu0 %637 }
  0x81   : > { %v1368_v36 = vpop.permute.xlu1 %807 }
  0x88   : > { %v1366_v34 = vpop.permute.xlu0 %642 }
  0x89   : > { %v1376_v52 = vpop.permute.xlu1 %812 }
  0x90   : > { %v1374_v49 = vpop.permute.xlu0 %797 }
  0x91   : > { %1624 = vst [vmem:[#allocation3_spill] sm:$0xff] %v1374_v49  ;;  %v1401_v19 = vpop.permute.xlu1 %802 }
  0x92   : > { %1626 = vst [vmem:[#allocation5_spill] sm:$0xff] %v1401_v19 }
  0x98   : > { %v1393_v10 = vpop.permute.xlu0 %622 }
  0xa9   : > { %v470_v32 = vpop.f32.mrf.mxu0 }
  0xaa   : > { %v471_v33 = vadd.f32 %v1363_v31, %v470_v32 }
  0xac   : > { %v490_v35 = vadd.f32 3.0, %v471_v33 }
  0xae   : > { %v498_v37 = vmax.f32 %v490_v35, 0.0 }
  0xaf   : > { %v480_v39 = vpop.f32.mrf.mxu3 }
  0xb0   : > { %v506_v40 = vmin.f32 %v498_v37, 6.0  ;;  %v481_v41 = vadd.f32 %v1363_v31, %v480_v39 }
  0xb1   : > { %v472_v42 = vpop.f32.mrf.mxu0 }
  0xb2   : > { %v514_v43 = vmul.f32 %v506_v40, %v471_v33  ;;  %v494_v44 = vadd.f32 3.0, %v481_v41  ;;  %v473_v45 = vadd.f32 %v1363_v31, %v472_v42 }
  0xb4   : > { %v522_v46 = vmul.f32 0.16666667, %v514_v43  ;;  %v502_v47 = vmax.f32 %v494_v44, 0.0  ;;  %v491_v48 = vadd.f32 3.0, %v473_v45 }
  0xb6   : > { %534 = vst [vmem:[#allocation2 + $0x10] sm:$0xff] %v522_v46  ;;  %v510_v50 = vmin.f32 %v502_v47, 6.0  ;;  %v499_v51 = vmax.f32 %v491_v48, 0.0  ;;  %v672_v17 = vmul.f32 %v1387_v4, %v522_v46  ;;  %v663_v35 = vmul.f32 %v1385_v0, %v522_v46 }
  0xb7   : > { %v482_v53 = vpop.f32.mrf.mxu3 }
  0xb8   : > { %v518_v54 = vmul.f32 %v510_v50, %v481_v41  ;;  %v507_v55 = vmin.f32 %v499_v51, 6.0  ;;  %v483_v57 = vadd.f32 %v1363_v31, %v482_v53  ;;  %v680_v40 = vadd.f32 %v672_v17, %v662_v12  ;;  %v749_v17 = vld [vmem:[#allocation2 + $0x51] sm:$0xff] }
  0xb9   : > { %v475_v59 = vpop.f32.mrf.mxu0 }
  0xba   : > { %v526_v60 = vmul.f32 0.16666667, %v518_v54  ;;  %v515_v61 = vmul.f32 %v507_v55, %v473_v45  ;;  %v495_v62 = vadd.f32 3.0, %v483_v57  ;;  %v476_v63 = vadd.f32 %v1363_v31, %v475_v59 }
  0xbc   : > { %538 = vst [vmem:[#allocation2 + $0x30] sm:$0xff] %v526_v60  ;;  %v523_v1 = vmul.f32 0.16666667, %v515_v61  ;;  %v503_v2 = vmax.f32 %v495_v62, 0.0  ;;  %v492_v3 = vadd.f32 3.0, %v476_v63  ;;  %v667_v42 = vmul.f32 %v1385_v0, %v526_v60 }
  0xbd   : > { %v545_v11 = vld [vmem:[#allocation2 + $0xf] sm:$0xff]  ;;  %v1419_v48 = vmul.f32 %v1387_v4, %v526_v60  ;;  %v1422_v50 = vmul.f32 %v1396_v13, %v526_v60 }
  0xbe   : > { %535 = vst [vmem:[#allocation2 + $0x18] sm:$0xff] %v523_v1  ;;  %v511_v6 = vmin.f32 %v503_v2, 6.0  ;;  %v500_v7 = vmax.f32 %v492_v3, 0.0  ;;  %v563_v28 = vmul.f32 %v1391_v9, %v545_v11  ;;  %v690_v32 = vmul.f32 %v1396_v13, %v523_v1  ;;  %v714_v43 = vld [vmem:[#allocation2 + $0x9] sm:$0xff]  ;;  %v608_v3 = vpop.permute.xlu0 %607 }
  0xbf   : > { %v485_v14 = vpop.f32.mrf.mxu3  ;;  %v673_v37 = vmul.f32 %v1387_v4, %v523_v1  ;;  %v664_v47 = vmul.f32 %v1385_v0, %v523_v1  ;;  %v554_v54 = vmul.f32 %v1389_v5, %v545_v11  ;;  %v723_v62 = vmul.f32 %v1399_v18, %v714_v43 }
  0xc0   : > { %v519_v15 = vmul.f32 %v511_v6, %v483_v57  ;;  %v508_v16 = vmin.f32 %v500_v7, 6.0  ;;  %v486_v22 = vadd.f32 %v1363_v31, %v485_v14  ;;  %v571_v46 = vadd.f32 %v563_v28, %v553_v20 }
  0xc1   : > { %v477_v23 = vpop.f32.mrf.mxu0  ;;  %v698_v55 = vadd.f32 %v690_v32, %v680_v40  ;;  %v681_v61 = vadd.f32 %v673_v37, %v663_v35 }
  0xc2   : > { %v527_v25 = vmul.f32 0.16666667, %v519_v15  ;;  %v516_v26 = vmul.f32 %v508_v16, %v476_v63  ;;  %v478_v29 = vadd.f32 %v1363_v31, %v477_v23  ;;  %v496_v33 = vadd.f32 3.0, %v486_v22  ;;  %v1435_v23 = vpop.permute.xlu1 %787 }
  0xc4   : > { %539 = vst [vmem:[#allocation2 + $0x38] sm:$0xff] %v527_v25  ;;  %v524_v39 = vmul.f32 0.16666667, %v516_v26  ;;  %v493_v41 = vadd.f32 3.0, %v478_v29  ;;  %v504_v45 = vmax.f32 %v496_v33, 0.0  ;;  %v677_v60 = vmul.f32 %v1387_v4, %v527_v25  ;;  %v1450_v33 = vpop.permute.xlu2 %792 }
  0xc5   : > { %v546_v44 = vld [vmem:[#allocation2 + $0x17] sm:$0xff]  ;;  %v1444_v26 = vmul.f32 0.0, %v1396_v13  ;;  %v1447_v28 = vmul.f32 %v1396_v13, %v527_v25 }
  0xc6   : > { %536 = vst [vmem:[#allocation2 + $0x20] sm:$0xff] %v524_v39  ;;  %v581_v51 = vmul.f32 %v1404_v21, %v546_v44  ;;  %v501_v53 = vmax.f32 %v493_v41, 0.0  ;;  %v512_v57 = vmin.f32 %v504_v45, 6.0  ;;  %v715_v58 = vld [vmem:[#allocation2 + $0x11] sm:$0xff]  ;;  %v674_v7 = vmul.f32 %v1387_v4, %v524_v39 }
  0xc7   : > { %v487_v59 = vpop.f32.mrf.mxu3  ;;  %v564_v8 = vmul.f32 %v1391_v9, %v546_v44  ;;  %v691_v11 = vmul.f32 %v1396_v13, %v524_v39  ;;  %v733_v16 = vmul.f32 %v1407_v24, %v715_v58  ;;  %v665_v35 = vmul.f32 %v1385_v0, %v524_v39 }
  0xc8   : > { %v589_v63 = vadd.f32 %v581_v51, %v571_v46  ;;  %v509_v1 = vmin.f32 %v501_v53, 6.0  ;;  %v488_v2 = vadd.f32 %v1363_v31, %v487_v59  ;;  %v520_v6 = vmul.f32 %v512_v57, %v486_v22  ;;  %v1440_v31 = vld [vmem:[%s1618_s5 + $0x8] ss:$0 sm:$0xff] }
  0xc9   : > { %v668_v22 = vmul.f32 %v1385_v0, %v527_v25  ;;  %v724_v40 = vmul.f32 %v1399_v18, %v715_v58  ;;  %v682_v43 = vadd.f32 %v674_v7, %v664_v47  ;;  %v572_v51 = vadd.f32 %v564_v8, %v554_v54 }
  0xca   : > { %v645_v12 = vmul.f32 %v608_v3, %v589_v63  ;;  %v517_v14 = vmul.f32 %v509_v1, %v478_v29  ;;  %v497_v15 = vadd.f32 3.0, %v488_v2  ;;  %v1433_v20 = vmul.f32 0.16666667, %v520_v6 }
  0xcb   : > { %v555_v29 = vmul.f32 %v1389_v5, %v546_v44  ;;  %v719_v37 = vld [vmem:[#allocation2 + $0x31] sm:$0xff]  ;;  %v1456_v25 = vmul.f32 %v1440_v31, %v749_v17  ;;  %v1460_v44 = vadd.f32 %v691_v11, %v681_v61  ;;  %v741_v57 = vadd.f32 %v733_v16, %v723_v62 }
  0xcc   : > { %v525_v32 = vmul.f32 0.16666667, %v517_v14  ;;  %540 = vst [vmem:[#allocation2 + $0x40] sm:$0xff] %v1433_v20  ;;  %v505_v46 = vmax.f32 %v497_v15, 0.0  ;;  %v1458_v53 = vadd.f32 %v698_v55, %v645_v12  ;;  %v1462_v39 = vadd.f32 %v677_v60, %v667_v42  ;;  %v550_v54 = vld [vmem:[#allocation2 + $0x37] sm:$0xff] }
  0xcd   : > { %v547_v41 = vld [vmem:[#allocation2 + $0x1f] sm:$0xff]  ;;  %v1467_v47 = vmul.f32 %v1399_v18, %v719_v37  ;;  %v737_v42 = vmul.f32 %v1407_v24, %v719_v37  ;;  %v678_v6 = vmul.f32 %v1387_v4, %v1433_v20  ;;  %v754_v8 = vmul.f32 %v1440_v31, %v719_v37 }
  0xce   : > { %v716_v45 = vld [vmem:[#allocation2 + $0x19] sm:$0xff]  ;;  %537 = vst [vmem:[#allocation2 + $0x28] sm:$0xff] %v525_v32  ;;  %v565_v58 = vmul.f32 %v1391_v9, %v547_v41  ;;  %v675_v59 = vmul.f32 %v1387_v4, %v525_v32  ;;  %v513_v63 = vmin.f32 %v505_v46, 6.0  ;;  %v692_v1 = vmul.f32 %v1396_v13, %v525_v32 }
  0xcf   : > { %1627 = vst [vmem:[#allocation6_spill] sm:$0xff] %v1462_v39  ;;  %v734_v55 = vmul.f32 %v1407_v24, %v716_v45  ;;  %v582_v3 = vmul.f32 %v1404_v21, %v547_v41  ;;  %v751_v61 = vmul.f32 %v1440_v31, %v716_v45  ;;  %v666_v7 = vmul.f32 %v1385_v0, %v525_v32 }
  0xd0   : > { %v683_v62 = vadd.f32 %v675_v59, %v665_v35  ;;  %v521_v60 = vmul.f32 %v513_v63, %v488_v2  ;;  %v559_v12 = vmul.f32 %v1389_v5, %v550_v54  ;;  %v725_v14 = vmul.f32 %v1399_v18, %v716_v45  ;;  %v613_v45 = vpop.permute.xlu1 %612 }
  0xd1   : > { %v590_v11 = vadd.f32 %v582_v3, %v572_v51  ;;  %v759_v16 = vadd.f32 %v751_v61, %v741_v57  ;;  %v1484_v17 = vmul.f32 %v1385_v0, %v1433_v20  ;;  %v573_v2 = vadd.f32 %v565_v58, %v555_v29 }
  0xd2   : > { %v1480_v15 = vmul.f32 0.16666667, %v521_v60  ;;  %v700_v35 = vadd.f32 %v692_v1, %v682_v43  ;;  %v556_v46 = vmul.f32 %v1389_v5, %v547_v41  ;;  %v742_v59 = vadd.f32 %v734_v55, %v724_v40 }
  0xd3   : > { %v701_v51 = vadd.f32 %v1422_v50, %v683_v62  ;;  %v1489_v3 = vadd.f32 %v678_v6, %v668_v22  ;;  %v1492_v57 = vmul.f32 %v1391_v9, %v550_v54  ;;  %v1495_v0 = vmul.f32 %v1404_v21, %v550_v54  ;;  %v1499_v43 = vld [vmem:[#allocation2 + $0x39] sm:$0xff]  ;;  %v778_v50 = vpop.permute.xlu2 %777 }
  0xd4   : > { %541 = vst [vmem:[#allocation2 + $0x48] sm:$0xff] %v1480_v15  ;;  %v646_v58 = vmul.f32 %v613_v45, %v590_v11  ;;  %v1502_v1 = vadd.f32 %v1419_v48, %v666_v7  ;;  %v815_v61 = vmul.f32 %v778_v50, %v759_v16  ;;  %v1506_v62 = vld [vmem:[#allocation2 + $0x3f] sm:$0xff]  ;;  %v1510_v54 = vmul.f32 %v1396_v13, %v1433_v20 }
  0xd5   : > { %v548_v32 = vld [vmem:[#allocation2 + $0x27] sm:$0xff]  ;;  %v549_v41 = vld [vmem:[#allocation2 + $0x2f] sm:$0xff]  ;;  %v738_v16 = vmul.f32 %v1407_v24, %v1499_v43 }
  0xd6   : > { %v717_v63 = vld [vmem:[#allocation2 + $0x21] sm:$0xff]  ;;  %v718_v37 = vld [vmem:[#allocation2 + $0x29] sm:$0xff]  ;;  %v583_v29 = vmul.f32 %v1404_v21, %v548_v32  ;;  %v566_v55 = vmul.f32 %v1391_v9, %v548_v32  ;;  %1628 = vst [vmem:[#allocation7_spill] sm:$0xff] %v1510_v54  ;;  %v584_v48 = vmul.f32 %v1404_v21, %v549_v41 }
  0xd7   : > { %v735_v40 = vmul.f32 %v1407_v24, %v717_v63  ;;  %v727_v22 = vmul.f32 %v1399_v18, %v718_v37  ;;  %v753_v19 = vmul.f32 %v1440_v31, %v718_v37  ;;  %v726_v11 = vmul.f32 %v1399_v18, %v717_v63 }
  0xd8   : > { %v591_v60 = vadd.f32 %v583_v29, %v573_v2  ;;  %v574_v45 = vadd.f32 %v566_v55, %v556_v46  ;;  %v736_v7 = vmul.f32 %v1407_v24, %v718_v37  ;;  %v752_v20 = vmul.f32 %v1440_v31, %v717_v63 }
  0xd9   : > { %v743_v6 = vadd.f32 %v735_v40, %v725_v14  ;;  %v569_v14 = vmul.f32 %v1391_v9, %v1506_v62  ;;  %v560_v46 = vmul.f32 %v1389_v5, %v1506_v62  ;;  %v679_v40 = vmul.f32 %v1387_v4, %v1480_v15 }
  0xda   : > { %v647_v50 = vmul.f32 %v1409_v27, %v591_v60  ;;  %v592_v2 = vadd.f32 %v584_v48, %v574_v45  ;;  %v744_v29 = vadd.f32 %v736_v7, %v726_v11  ;;  %v557_v37 = vmul.f32 %v1389_v5, %v548_v32 }
  0xdb   : > { %v761_v49 = vadd.f32 %v753_v19, %v743_v6  ;;  %v558_v55 = vmul.f32 %v1389_v5, %v549_v41  ;;  %v567_v27 = vmul.f32 %v1391_v9, %v549_v41  ;;  %v745_v19 = vadd.f32 %v737_v42, %v727_v22  ;;  %v561_v60 = vld [vmem:[#allocation2 + $0x47] sm:$0xff]  ;;  %v579_v63 = vld [vmem:[#allocation2 + $0x4f] sm:$0xff] }
  0xdc   : > { %v648_v6 = vmul.f32 %v1393_v10, %v592_v2  ;;  %v762_v54 = vadd.f32 %v754_v8, %v744_v29  ;;  %v760_v45 = vadd.f32 %v752_v20, %v742_v59  ;;  %v570_v11 = vmul.f32 %v1391_v9, %v561_v60  ;;  %v721_v41 = vld [vmem:[#allocation2 + $0x41] sm:$0xff]  ;;  %v783_v10 = vpop.permute.xlu0 %782 }
  0xdd   : > { %v708_v48 = vadd.f32 %v700_v35, %v647_v50  ;;  %v817_v7 = vmul.f32 %v1435_v23, %v761_v49  ;;  %v577_v39 = vadd.f32 %v569_v14, %v559_v12  ;;  %v587_v4 = vmul.f32 %v1404_v21, %v561_v60  ;;  %v731_v49 = vld [vmem:[#allocation2 + $0x49] sm:$0xff] }
  0xde   : > { %v709_v32 = vadd.f32 %v701_v51, %v648_v6  ;;  %v746_v5 = vadd.f32 %v738_v16, %v1467_v47  ;;  %v578_v56 = vadd.f32 %v570_v11, %v560_v46  ;;  %v588_v42 = vmul.f32 %v1404_v21, %v579_v63  ;;  %v1629_v60 = vld [vmem:[#allocation4_spill] sm:$0xff]  ;;  %v1631_v6 = vld [vmem:[#allocation7_spill] sm:$0xff] }
  0xdf   : > { %v818_v22 = vmul.f32 %v1450_v33, %v762_v54  ;;  %v595_v8 = vadd.f32 %v587_v4, %v577_v39  ;;  %v687_v59 = vadd.f32 %v679_v40, %v1484_v17  ;;  %v696_v9 = vmul.f32 %v1396_v13, %v1480_v15  ;;  %v1171_v4 = vld [vmem:[%s1621_s8 + $0x30] sm:$0xff] }
  0xe0   : > { %v816_v23 = vmul.f32 %v783_v10, %v760_v45  ;;  %v707_v12 = vadd.f32 %v1460_v44, %v646_v58  ;;  %v823_v35 = vadd.f32 %v815_v61, %v1458_v53  ;;  %v596_v47 = vadd.f32 %v588_v42, %v578_v56 }
  0xe1   : > { %v825_v51 = vadd.f32 %v817_v7, %v708_v48  ;;  %v826_v16 = vadd.f32 %v818_v22, %v709_v32  ;;  %v651_v50 = vmul.f32 %v1358_v30, %v595_v8  ;;  %v730_v33 = vmul.f32 %v1399_v18, %v721_v41 }
  0xe2   : > { %v652_v39 = vmul.f32 %v1366_v34, %v596_v47  ;;  %v729_v17 = vmul.f32 %v1399_v18, %v1499_v43  ;;  %v739_v13 = vmul.f32 %v1407_v24, %v721_v41  ;;  %v740_v15 = vmul.f32 %v1407_v24, %v731_v49  ;;  %v1200_v34 = vld [vmem:[%s1619_s6] ss:$0 sm:$0xff]  ;;  %v1170_v47 = vld [vmem:[%s1621_s8 + $0x28] sm:$0xff] }
  0xe3   : > { %v704_v44 = vadd.f32 %v696_v9, %v1489_v3  ;;  %v705_v53 = vadd.f32 %v1444_v26, %v687_v59  ;;  %v575_v56 = vadd.f32 %v567_v27, %v557_v37  ;;  %v576_v58 = vadd.f32 %v1492_v57, %v558_v55 }
  0xe4   : > { %v824_v61 = vadd.f32 %v816_v23, %v707_v12  ;;  %v747_v30 = vadd.f32 %v739_v13, %v729_v17  ;;  %v748_v54 = vadd.f32 %v740_v15, %v730_v33  ;;  %v757_v20 = vmul.f32 %v1440_v31, %v731_v49 }
  0xe5   : > { %v712_v18 = vadd.f32 %v704_v44, %v651_v50  ;;  %v713_v14 = vadd.f32 %v705_v53, %v652_v39  ;;  %v586_v24 = vmul.f32 %v1404_v21, %v1506_v62  ;;  %v593_v3 = vadd.f32 %v1495_v0, %v575_v56 }
  0xe6   : > { %v765_v26 = vadd.f32 %v757_v20, %v747_v30  ;;  %v766_v2 = vadd.f32 %v1456_v25, %v748_v54  ;;  %v755_v57 = vmul.f32 %v1440_v31, %v1499_v43  ;;  %v756_v29 = vmul.f32 %v1440_v31, %v721_v41  ;;  %v1630_v43 = vld [vmem:[#allocation6_spill] sm:$0xff] }
  0xe7   : > { %v1562_v46 = vadd.f32 %v1200_v34, %v826_v16  ;;  %v594_v40 = vadd.f32 %v586_v24, %v576_v58  ;;  %v649_v37 = vmul.f32 %v1370_v38, %v593_v3  ;;  %v702_v55 = vadd.f32 %v1447_v28, %v1502_v1  ;;  %v1172_v38 = vld [vmem:[%s1621_s8 + $0x38] sm:$0xff]  ;;  %v1632_v28 = vld [vmem:[#allocation3_spill] sm:$0xff] }
  0xe8   : > { %v821_v21 = vmul.f32 %v1368_v36, %v765_v26  ;;  %v822_v0 = vmul.f32 %v1376_v52, %v766_v2  ;;  %v763_v62 = vadd.f32 %v755_v57, %v745_v19  ;;  %v764_v27 = vadd.f32 %v756_v29, %v746_v5  ;;  %v1633_v36 = vld [vmem:[#allocation5_spill] sm:$0xff]  ;;  %981 = vmatpush.bf16.msra.mxu2 %v1172_v38  ;;  %v1169_v58 = vld [vmem:[%s1621_s8 + $0x20] sm:$0xff]  ;;  %v1168_v57 = vld [vmem:[%s1621_s8 + $0x18] sm:$0xff] }
  0xe9   : > { %v837_v25 = vadd.f32 %v1200_v34, %v825_v51  ;;  %v650_v63 = vmul.f32 %v1629_v60, %v594_v40  ;;  %v703_v31 = vadd.f32 %v1631_v6, %v1630_v43  ;;  %v710_v45 = vadd.f32 %v702_v55, %v649_v37 }
  0xea   : > { %v829_v11 = vadd.f32 %v821_v21, %v712_v18  ;;  %v830_v48 = vadd.f32 %v822_v0, %v713_v14  ;;  %v819_v1 = vmul.f32 %v1632_v28, %v763_v62  ;;  %v820_v7 = vmul.f32 %v1633_v36, %v764_v27  ;;  %v1165_v28 = vld [vmem:[%s1621_s8] sm:$0xff] }
  0xeb   : > { %v846_v52 = vadd.f32 3.0, %v1562_v46  ;;  %v711_v19 = vadd.f32 %v703_v31, %v650_v63  ;;  %v836_v41 = vadd.f32 %v1200_v34, %v824_v61  ;;  %v845_v22 = vadd.f32 3.0, %v837_v25 }
  0xec   : > { %v841_v32 = vadd.f32 %v1200_v34, %v829_v11  ;;  %v842_v5 = vadd.f32 %v1200_v34, %v830_v48  ;;  %v827_v42 = vadd.f32 %v819_v1, %v710_v45  ;;  %v835_v8 = vadd.f32 %v1200_v34, %v823_v35  ;;  %982 = vmatpush.bf16.msra.mxu2 %v1171_v4  ;;  %v1166_v48 = vld [vmem:[%s1621_s8 + $0x8] sm:$0xff] }
  0xed   : > { %v828_v10 = vadd.f32 %v820_v7, %v711_v19  ;;  %v854_v12 = vmax.f32 %v846_v52, 0.0  ;;  %v844_v33 = vadd.f32 3.0, %v836_v41  ;;  %v853_v17 = vmax.f32 %v845_v22, 0.0  ;;  %v1202_v19 = vld [vmem:[%s1622_s9] ss:$0 sm:$0xff] }
  0xee   : > { %v849_v59 = vadd.f32 3.0, %v841_v32  ;;  %v850_v9 = vadd.f32 3.0, %v842_v5  ;;  %v839_v49 = vadd.f32 %v1200_v34, %v827_v42  ;;  %v843_v13 = vadd.f32 3.0, %v835_v8 }
  0xef   : > { %v840_v23 = vadd.f32 %v1200_v34, %v828_v10  ;;  %v862_v56 = vmin.f32 %v854_v12, 6.0  ;;  %v852_v20 = vmax.f32 %v844_v33, 0.0  ;;  %v861_v18 = vmin.f32 %v853_v17, 6.0 }
  0xf0   : > { %v857_v51 = vmax.f32 %v849_v59, 0.0  ;;  %v858_v16 = vmax.f32 %v850_v9, 0.0  ;;  %v847_v50 = vadd.f32 3.0, %v839_v49  ;;  %983 = vmatpush.bf16.msra.mxu2 %v1170_v47  ;;  %v851_v26 = vmax.f32 %v843_v13, 0.0 }
  0xf1   : > { %v848_v39 = vadd.f32 3.0, %v840_v23  ;;  %v870_v40 = vmul.f32 %v862_v56, %v1562_v46  ;;  %v860_v37 = vmin.f32 %v852_v20, 6.0  ;;  %v869_v0 = vmul.f32 %v861_v18, %v837_v25  ;;  %v1164_v46 = vld [vmem:[%s1620_s7] sm:$0xff]  ;;  %v1167_v25 = vld [vmem:[%s1621_s8 + $0x10] sm:$0xff] }
  0xf2   : > { %v865_v15 = vmin.f32 %v857_v51, 6.0  ;;  %v866_v44 = vmin.f32 %v858_v16, 6.0  ;;  %v855_v35 = vmax.f32 %v847_v50, 0.0  ;;  %v859_v62 = vmin.f32 %v851_v26, 6.0 }
  0xf3   : > { %v856_v53 = vmax.f32 %v848_v39, 0.0  ;;  %v878_v60 = vmul.f32 0.16666667, %v870_v40  ;;  %v868_v63 = vmul.f32 %v860_v37, %v836_v41  ;;  %v877_v43 = vmul.f32 0.16666667, %v869_v0 }
  0xf4   : > { %v873_v61 = vmul.f32 %v865_v15, %v841_v32  ;;  %v874_v30 = vmul.f32 %v866_v44, %v842_v5  ;;  %v863_v54 = vmin.f32 %v855_v35, 6.0  ;;  %984 = vmatpush.bf16.msra.mxu2 %v1169_v58  ;;  %v867_v6 = vmul.f32 %v859_v62, %v835_v8 }
  0xf5   : > { %v864_v34 = vmin.f32 %v856_v53, 6.0  ;;  %v886_v31 = vpack.c.bf16 %v878_v60, %v877_v43  ;;  %v876_v45 = vmul.f32 0.16666667, %v868_v63 }
  0xf6   : > { %v881_v14 = vmul.f32 0.16666667, %v873_v61  ;;  %v882_v24 = vmul.f32 0.16666667, %v874_v30  ;;  %v871_v3 = vmul.f32 %v863_v54, %v839_v49  ;;  %v875_v38 = vmul.f32 0.16666667, %v867_v6 }
  0xf7   : > { %v872_v2 = vmul.f32 %v864_v34, %v840_v23 }
  0xf8   : > { %v888_v29 = vpack.c.bf16 %v882_v24, %v881_v14  ;;  %v879_v21 = vmul.f32 0.16666667, %v871_v3  ;;  %985 = vmatpush.bf16.msra.mxu2 %v1168_v57  ;;  %v885_v11 = vpack.c.bf16 %v876_v45, %v875_v38 }
  0xf9   : > { %v880_v55 = vmul.f32 0.16666667, %v872_v2 }
  0xfa   : > { %902 = vmatpush.bf16.msra.mxu1 %v888_v29 }
  0xfb   : > { %v887_v27 = vpack.c.bf16 %v880_v55, %v879_v21 }
  0xfc   : > { %986 = vmatpush.bf16.msra.mxu2 %v1167_v25 }
  0xfe   : > { %903 = vmatpush.bf16.msra.mxu1 %v887_v27 }
 0x100   : > { %987 = vmatpush.bf16.msra.mxu2 %v1166_v48 }
 0x102   : > { %904 = vmatpush.bf16.msra.mxu1 %v886_v31 }
 0x104   : > { %988 = vmatpush.bf16.msra.mxu2 %v1165_v28 }
 0x106   : > { %905 = vmatpush.bf16.msra.mxu1 %v885_v11 }
 0x109   : > { %1115 = vmatmul.msk.bf16.vlgmr.msra.gmra.mxu1 %vm894_vm0, %v1164_v46 }
 0x186   : > { %v907_v1 = vpop.f32.mrf.mxu1 }
 0x18e   : > { %v909_v36 = vpop.f32.mrf.mxu1 }
 0x18f   : > { %v912_v7 = vpack.c.bf16 %v909_v36, %v907_v1 }
 0x191   : > { %989 = vmatmul.bf16.vlgmr.msra.gmra.mxu2 %v912_v7 }
 0x214   : > { %v990_v52 = vpop.f32.mrf.mxu2 }
 0x215   : > { %v991_v32 = vadd.f32 %v1202_v19, %v990_v52 }
 0x21c   : > { %v992_v4 = vpop.f32.mrf.mxu2 }
 0x21d   : > { %v993_v5 = vadd.f32 %v1202_v19, %v992_v4 }
 0x21f   : > { %v1176_v42 = vpack.c.bf16 %v993_v5, %v991_v32 }
 0x221   : > { %1177 = vst [vmem:[%s359_s26] sm:$0xff] %v1176_v42  }
 0x222 PF: > { %s20_s13 = sadd.s32 1, %s1209_s13  }
 0x223   : > { %p17_p4 = scmp.ge.s32.totalorder %s20_s13, 4  }
 0x225   :  { %19 = sbr.rel (!%p17_p4) target bundleno = 1 (0x1), region = 90 }

// kernel: lraspp_forward.4
= control target key start
LH: loop header
LB: loop body
LE: loop exit
PB: predicated region body
PF: predicated region fallthrough
CT: control target
= control target key end

     0   :  { %s3317_s21 = smov 0   ;;  %s5041_s0 = inlined_call_operand.vmem [shape: bf16[2,256,27], index: 0, kind: input, shape index: {}]   ;;  %s5042_s1 = inlined_call_operand.vmem [shape: f32[256,1], index: 1, kind: input, shape index: {}]   ;;  %s5043_s2 = inlined_call_operand.vmem [shape: f32[256,1], index: 2, kind: input, shape index: {}]   ;;  %s5044_s3 = inlined_call_operand.vmem [shape: bf16[27,16], index: 3, kind: input, shape index: {}]   ;;  %s5045_s4 = inlined_call_operand.vmem [shape: f32[1,16], index: 4, kind: input, shape index: {}]   ;;  %s5046_s5 = inlined_call_operand.vmem [shape: bf16[16,128], index: 5, kind: input, shape index: {}]   ;;  %s5047_s6 = inlined_call_operand.vmem [shape: f32[1,128], index: 6, kind: input, shape index: {}]   ;;  %s5048_s7 = inlined_call_operand.vmem [shape: f32[9,128], index: 7, kind: input, shape index: {}]   ;;  %s5049_s8 = inlined_call_operand.vmem [shape: f32[1,128], index: 8, kind: input, shape index: {}]   ;;  %s5050_s9 = inlined_call_operand.vmem [shape: bf16[64,256], index: 9, kind: input, shape index: {}]   ;;  %s5051_s10 = inlined_call_operand.vmem [shape: bf16[128,128], index: 10, kind: input, shape index: {}]   ;;  %s5052_s11 = inlined_call_operand.vmem [shape: f32[1,128], index: 11, kind: input, shape index: {}]   ;;  %s5053_s12 = inlined_call_operand.vmem [shape: bf16[128,128], index: 12, kind: input, shape index: {}]   ;;  %s5054_s13 = inlined_call_operand.vmem [shape: f32[1,128], index: 13, kind: input, shape index: {}]   ;;  %s5055_s14 = inlined_call_operand.vmem [shape: bf16[128,128], index: 14, kind: input, shape index: {}]   ;;  %s5056_s15 = inlined_call_operand.vmem [shape: f32[1,128], index: 15, kind: input, shape index: {}]   ;;  %s5057_s16 = inlined_call_operand.vmem [shape: bf16[2,64,128], index: 16, kind: output, shape index: {}]  }
   0x1   :  { %5071 = sst [smem:[#allocation65_spill]] %s5041_s0 }
   0x2 LB: > { %s2861_s22 = sadd.s32 4294967295, %s3226_s21   ;;  %p2865_p0 = scmp.ge.s32.totalorder %s3226_s21, 1  ;;  %s3226_s21 = sphi %s3317_s21, %s26_s21  }
   0x3   : > { %p462_p1 = scmp.lt.s32.totalorder %s3226_s21, 3 }
   0x5   : > { %p463_p2 = pnand %p2865_p0, %p462_p1 }
   0x7   : > { %466 = sbr.rel (%p463_p2) target bundleno = 1248 (0x4e0), region = 84 }
   0xc   : > { %v2940_v0 = vld [vmem:[%s5044_s3 + $0x8] sm:$0xf]  ;;  %v3127_v1 = vld [vmem:[%s5044_s3 + $0x8] sm:$0x30]  ;;  %vm703_vm0 = vcmask 1044480   ;;  %vm704_vm1 = vcmask 1045504  }
   0xd   : > { %v2941_v2 = vor.u32 %v3127_v1, %v2940_v0  ;;  %p512_p3 = scmp.lt.s32.totalorder %s2861_s22, 1  ;;  %v3228_v3 = vmov 65535   ;;  %v3126_v7 = vld [vmem:[%s5044_s3] sm:$0xff]  ;;  %s5072_s17 = sld [smem:[#allocation65_spill]]  ;;  %vm654_vm2 = vcmask 220160   ;;  %v1410_v10 = vld [vmem:[%s5042_s1 + $0x70] sm:$0xff] }
   0xe   : > { %v705_v4 = vsel %vm703_vm0, 4294967295, %v3228_v3  ;;  %v1426_v11 = vld [vmem:[%s5042_s1 + $0xf0] sm:$0xff]  ;;  %v3229_v12 = vmov 0   ;;  %v1411_v13 = vld [vmem:[%s5042_s1 + $0x78] sm:$0xff]  ;;  %v1409_v19 = vld [vmem:[%s5042_s1 + $0x68] sm:$0xff]  ;;  %vm987_vm3 = vcmask 130048  }
   0xf   : > { %v706_v5 = vsel %vm704_vm1, %v705_v4, 0  ;;  %s5240_s22 = smov (!%p512_p3, %s2861_s22), 1  ;;  %3199 = vset.pattern.permute.xlu0 %v3229_v12  ;;  %3200 = vset.pattern.permute.xlu1 %v3229_v12  ;;  %v1427_v16 = vld [vmem:[%s5042_s1 + $0xf8] sm:$0xff]  ;;  %v2080_v17 = vld [vmem:[%s5043_s2 + $0xf0] sm:$0xff]  ;;  %v1424_v23 = vld [vmem:[%s5042_s1 + $0xe0] sm:$0xff] }
  0x10   : > { %v708_v6 = vand.u32 %v2941_v2, %v706_v5  ;;  %s3108_s27 = sshll.u32 %s5240_s22, 7  ;;  %1500 = vperm.xlu0 %3199, %v1410_v10   ;;  %1580 = vperm.xlu1 %3200, %v1426_v11   ;;  %v2081_v18 = vld [vmem:[%s5043_s2 + $0xf8] sm:$0xff]  ;;  %v2064_v22 = vld [vmem:[%s5043_s2 + $0x70] sm:$0xff]  ;;  %v2062_v24 = vld [vmem:[%s5043_s2 + $0x60] sm:$0xff]  ;;  %s3109_s28 = sshll.u32 %s5240_s22, 5 }
  0x11   : > { %3201 = vset.pattern.permute.xlu2 %v3229_v12  ;;  %v2065_v25 = vld [vmem:[%s5043_s2 + $0x78] sm:$0xff]  ;;  %v2063_v26 = vld [vmem:[%s5043_s2 + $0x68] sm:$0xff]  ;;  %v1422_v29 = vld [vmem:[%s5042_s1 + $0xd0] sm:$0xff]  ;;  %s521_s0 = scalar_lea.vmem %s5057_s16, %s3109_s28 }
  0x12   : > { %716 = vmatpush.bf16.msra.mxu0 %v708_v6  ;;  %3184 = vmatpush.bf16.msra.mxu3 %v708_v6  ;;  %v2079_v27 = vld [vmem:[%s5043_s2 + $0xe8] sm:$0xff]  ;;  %v1408_v30 = vld [vmem:[%s5042_s1 + $0x60] sm:$0xff]  ;;  %v1406_v31 = vld [vmem:[%s5042_s1 + $0x50] sm:$0xff] }
  0x13   : > { %s3340_s18 = scalar_lea.vmem %s5072_s17, %s3108_s27  ;;  %2154 = vperm.xlu2 %3201, %v2064_v22   ;;  %v1425_v32 = vld [vmem:[%s5042_s1 + $0xe8] sm:$0xff]  ;;  %v1423_v33 = vld [vmem:[%s5042_s1 + $0xd8] sm:$0xff]  ;;  %v2078_v36 = vld [vmem:[%s5043_s2 + $0xe0] sm:$0xff] }
  0x14   : > { %v3110_v8 = vld [vmem:[%s3340_s18] sm:$0xff]  ;;  %v3123_v9 = vld [vmem:[%s3340_s18 + $0x68] sm:$0xff]  ;;  %v3124_v15 = vld [vmem:[%s3340_s18 + $0x70] sm:$0xff] }
  0x15   : > { %v3111_v14 = vld [vmem:[%s3340_s18 + $0x8] sm:$0xff]  ;;  %v3112_v20 = vld [vmem:[%s3340_s18 + $0x10] sm:$0xff]  ;;  %v3125_v21 = vld [vmem:[%s3340_s18 + $0x78] sm:$0xff] }
  0x16   : > { %717 = vmatpush.bf16.msra.mxu0 %v3126_v7  ;;  %3185 = vmatpush.bf16.msra.mxu3 %v3126_v7  ;;  %v3113_v28 = vld [vmem:[%s3340_s18 + $0x18] sm:$0xff]  ;;  %v3114_v35 = vld [vmem:[%s3340_s18 + $0x20] sm:$0xff]  ;;  %v2076_v37 = vld [vmem:[%s5043_s2 + $0xd0] sm:$0xff] }
  0x17   : > { %v2061_v34 = vld [vmem:[%s5043_s2 + $0x58] sm:$0xff]  ;;  %v1404_v38 = vld [vmem:[%s5042_s1 + $0x40] sm:$0xff]  ;;  %v1405_v40 = vld [vmem:[%s5042_s1 + $0x48] sm:$0xff] }
  0x18   : > { %1505 = vperm.xlu0 %3199, %v1411_v13   ;;  %1585 = vperm.xlu1 %3200, %v1427_v16   ;;  %v1407_v39 = vld [vmem:[%s5042_s1 + $0x58] sm:$0xff]  ;;  %v1421_v41 = vld [vmem:[%s5042_s1 + $0xc8] sm:$0xff]  ;;  %v2060_v43 = vld [vmem:[%s5043_s2 + $0x50] sm:$0xff] }
  0x19   : > { %2942 = vmatmul.msk.bf16.vlgmr.msra.gmra.mxu0 %vm654_vm2, %v3110_v8  ;;  %2955 = vmatmul.msk.bf16.vlgmr.msra.gmra.mxu3 %vm654_vm2, %v3123_v9  ;;  %v3115_v42 = vld [vmem:[%s3340_s18 + $0x28] sm:$0xff]  ;;  %v2058_v44 = vld [vmem:[%s5043_s2 + $0x40] sm:$0xff]  ;;  %v3116_v46 = vld [vmem:[%s3340_s18 + $0x30] sm:$0xff] }
  0x1a   : > { %v2074_v45 = vld [vmem:[%s5043_s2 + $0xc0] sm:$0xff]  ;;  %v2077_v47 = vld [vmem:[%s5043_s2 + $0xd8] sm:$0xff]  ;;  %v2075_v48 = vld [vmem:[%s5043_s2 + $0xc8] sm:$0xff] }
  0x1b   : > { %2159 = vperm.xlu2 %3201, %v2065_v25   ;;  %v1403_v49 = vld [vmem:[%s5042_s1 + $0x38] sm:$0xff]  ;;  %v1420_v50 = vld [vmem:[%s5042_s1 + $0xc0] sm:$0xff]  ;;  %v1418_v51 = vld [vmem:[%s5042_s1 + $0xb0] sm:$0xff] }
  0x1c   : > { %v2056_v52 = vld [vmem:[%s5043_s2 + $0x30] sm:$0xff]  ;;  %v3117_v53 = vld [vmem:[%s3340_s18 + $0x38] sm:$0xff]  ;;  %v2059_v54 = vld [vmem:[%s5043_s2 + $0x48] sm:$0xff] }
  0x1d   : > { %v2057_v55 = vld [vmem:[%s5043_s2 + $0x38] sm:$0xff]  ;;  %v3128_v57 = vld [vmem:[%s5046_s5] sm:$0xff]  ;;  %v1402_v59 = vld [vmem:[%s5042_s1 + $0x30] sm:$0xff] }
  0x1e   : > { %v2073_v56 = vld [vmem:[%s5043_s2 + $0xb8] sm:$0xff]  ;;  %1043 = vmatpush.bf16.msra.mxu1 %v3128_v57  ;;  %3186 = vmatpush.bf16.msrb.mxu3 %v3128_v57  ;;  %v1416_v58 = vld [vmem:[%s5042_s1 + $0xa0] sm:$0xff]  ;;  %v2055_v2 = vld [vmem:[%s5043_s2 + $0x28] sm:$0xff] }
  0x1f   : > { %v1400_v60 = vld [vmem:[%s5042_s1 + $0x20] sm:$0xff]  ;;  %v1419_v3 = vld [vmem:[%s5042_s1 + $0xb8] sm:$0xff]  ;;  %v1417_v4 = vld [vmem:[%s5042_s1 + $0xa8] sm:$0xff] }
  0x20   : > { %2234 = vperm.xlu0 %3199, %v2080_v17   ;;  %2239 = vperm.xlu1 %3200, %v2081_v18   ;;  %v3490_v61 = vld [vmem:[%s5045_s4] ss:$0 sm:$0xff]  ;;  %v2072_v13 = vld [vmem:[%s5043_s2 + $0xb0] sm:$0xff] }
  0x21   : > { %v3118_v63 = vld [vmem:[%s3340_s18 + $0x40] sm:$0xff] }
  0x23   : > { %1490 = vperm.xlu2 %3201, %v1408_v30  }
  0x28   : > { %1495 = vperm.xlu0 %3199, %v1409_v19   ;;  %1570 = vperm.xlu1 %3200, %v1424_v23  }
  0x29   : > { %2943 = vmatmul.msk.bf16.gmra.mxu0 %vm654_vm2, %v3111_v14  ;;  %2956 = vmatmul.msk.bf16.gmra.mxu3 %vm654_vm2, %v3124_v15  ;;  %v2070_v14 = vld [vmem:[%s5043_s2 + $0xa0] sm:$0xff]  ;;  %v1398_v15 = vld [vmem:[%s5042_s1 + $0x10] sm:$0xff] }
  0x2b   : > { %1575 = vperm.xlu2 %3201, %v1425_v32  }
  0x30   : > { %2144 = vperm.xlu0 %3199, %v2062_v24   ;;  %2149 = vperm.xlu1 %3200, %v2063_v26   ;;  %v3119_v24 = vld [vmem:[%s3340_s18 + $0x48] sm:$0xff] }
  0x33   : > { %2224 = vperm.xlu2 %3201, %v2078_v36  }
  0x38   : > { %2229 = vperm.xlu0 %3199, %v2079_v27   ;;  %1480 = vperm.xlu1 %3200, %v1406_v31  }
  0x39   : > { %2944 = vmatmul.msk.bf16.gmra.mxu0 %vm654_vm2, %v3112_v20  ;;  %2957 = vmatmul.msk.bf16.gmra.mxu3 %vm654_vm2, %v3125_v21 }
  0x3b   : > { %1485 = vperm.xlu2 %3201, %v1407_v39  }
  0x40   : > { %1560 = vperm.xlu0 %3199, %v1422_v29   ;;  %1565 = vperm.xlu1 %3200, %v1423_v33   ;;  %v1401_v33 = vld [vmem:[%s5042_s1 + $0x28] sm:$0xff] }
  0x43   : > { %2134 = vperm.xlu2 %3201, %v2060_v43  }
  0x48   : > { %2139 = vperm.xlu0 %3199, %v2061_v34   ;;  %2214 = vperm.xlu1 %3200, %v2076_v37   ;;  %v1399_v34 = vld [vmem:[%s5042_s1 + $0x18] sm:$0xff] }
  0x49   : > { %2945 = vmatmul.msk.bf16.gmra.mxu0 %vm654_vm2, %v3113_v28 }
  0x4b   : > { %2219 = vperm.xlu2 %3201, %v2077_v47  }
  0x50   : > { %1470 = vperm.xlu0 %3199, %v1404_v38   ;;  %1475 = vperm.xlu1 %3200, %v1405_v40  }
  0x53   : > { %1550 = vperm.xlu2 %3201, %v1420_v50  }
  0x58   : > { %1555 = vperm.xlu0 %3199, %v1421_v41   ;;  %2124 = vperm.xlu1 %3200, %v2058_v44  }
  0x59   : > { %2946 = vmatmul.msk.bf16.gmra.mxu0 %vm654_vm2, %v3114_v35  ;;  %v1415_v35 = vld [vmem:[%s5042_s1 + $0x98] sm:$0xff] }
  0x5b   : > { %2129 = vperm.xlu2 %3201, %v2059_v54   ;;  %v2052_v54 = vld [vmem:[%s5043_s2 + $0x10] sm:$0xff] }
  0x60   : > { %2204 = vperm.xlu0 %3199, %v2074_v45   ;;  %2209 = vperm.xlu1 %3200, %v2075_v48  }
  0x63   : > { %1460 = vperm.xlu2 %3201, %v1402_v59  }
  0x68   : > { %1465 = vperm.xlu0 %3199, %v1403_v49   ;;  %1540 = vperm.xlu1 %3200, %v1418_v51  }
  0x69   : > { %2947 = vmatmul.msk.bf16.gmra.mxu0 %vm654_vm2, %v3115_v42 }
  0x6b   : > { %1545 = vperm.xlu2 %3201, %v1419_v3  }
  0x6d   : > { %v3519_v19 = vpop.permute.xlu2 %2154 }
  0x6e   : > { %5075 = vst [vmem:[#allocation5_spill] sm:$0xff] %v3519_v19 }
  0x70   : > { %2114 = vperm.xlu0 %3199, %v2056_v52   ;;  %2119 = vperm.xlu1 %3200, %v2057_v55   ;;  %v2068_v55 = vld [vmem:[%s5043_s2 + $0x90] sm:$0xff] }
  0x73   : > { %2194 = vperm.xlu2 %3201, %v2072_v13   ;;  %v2071_v13 = vld [vmem:[%s5043_s2 + $0xa8] sm:$0xff] }
  0x75   : > { %v3538_v43 = vpop.permute.xlu2 %2159 }
  0x76   : > { %5076 = vst [vmem:[#allocation6_spill] sm:$0xff] %v3538_v43 }
  0x78   : > { %2199 = vperm.xlu0 %3199, %v2073_v56   ;;  %1450 = vperm.xlu1 %3200, %v1400_v60  }
  0x79   : > { %2948 = vmatmul.msk.bf16.gmra.mxu0 %vm654_vm2, %v3116_v46 }
  0x7b   : > { %1455 = vperm.xlu2 %3201, %v1401_v33  }
  0x80   : > { %1530 = vperm.xlu0 %3199, %v1416_v58   ;;  %1535 = vperm.xlu1 %3200, %v1417_v4   ;;  %v3120_v4 = vld [vmem:[%s3340_s18 + $0x50] sm:$0xff] }
  0x82   : > { %v3492_v62 = vpop.permute.xlu0 %1500  ;;  %v3524_v31 = vpop.permute.xlu1 %1580 }
  0x83   : > { %5073 = vst [vmem:[#allocation3_spill] sm:$0xff] %v3492_v62 }
  0x88   : > { %2109 = vperm.xlu0 %3199, %v2055_v2   ;;  %2184 = vperm.xlu1 %3200, %v2070_v14   ;;  %v2069_v14 = vld [vmem:[%s5043_s2 + $0x98] sm:$0xff] }
  0x89   : > { %2949 = vmatmul.msk.bf16.gmra.mxu0 %vm654_vm2, %v3117_v53  ;;  %v2054_v53 = vld [vmem:[%s5043_s2 + $0x20] sm:$0xff] }
  0x8a   : > { %v3507_v9 = vpop.permute.xlu0 %1505  ;;  %2104 = vperm.xlu2 %3201, %v2054_v53   ;;  %v3552_v60 = vpop.permute.xlu1 %1585 }
  0x8b   : > { %5074 = vst [vmem:[#allocation4_spill] sm:$0xff] %v3507_v9 }
  0x90   : > { %1440 = vperm.xlu0 %3199, %v1398_v15   ;;  %1445 = vperm.xlu1 %3200, %v1399_v34   ;;  %v1397_v15 = vld [vmem:[%s5042_s1 + $0x8] sm:$0xff] }
  0x92   : > { %v3526_v32 = vpop.permute.xlu0 %2234  ;;  %2189 = vperm.xlu2 %3201, %v2071_v13  }
  0x96   : > { %v719_v0 = vpop.f32.mrf.mxu0 }
  0x97   : > { %v720_v1 = vadd.f32 %v3490_v61, %v719_v0 }
  0x98   : > { %1525 = vperm.xlu0 %3199, %v1415_v35   ;;  %2094 = vperm.xlu1 %3200, %v2052_v54  }
  0x99   : > { %v799_v5 = vadd.f32 3.0, %v720_v1  ;;  %2950 = vmatmul.msk.bf16.gmra.mxu0 %vm654_vm2, %v3118_v63 }
  0x9a   : > { %v3554_v63 = vpop.permute.xlu0 %1495 }
  0x9b   : > { %v831_v6 = vmax.f32 %v799_v5, 0.0  ;;  %5077 = vst [vmem:[#allocation7_spill] sm:$0xff] %v3554_v63 }
  0x9c   : > { %v784_v7 = vpop.f32.mrf.mxu3 }
  0x9d   : > { %v785_v8 = vadd.f32 %v3490_v61, %v784_v7  ;;  %v863_v16 = vmin.f32 %v831_v6, 6.0  ;;  %v3559_v7 = vpop.permute.xlu2 %1490 }
  0x9e   : > { %v721_v10 = vpop.f32.mrf.mxu0  ;;  %5078 = vst [vmem:[#allocation8_spill] sm:$0xff] %v3559_v7 }
  0x9f   : > { %v722_v11 = vadd.f32 %v3490_v61, %v721_v10  ;;  %v825_v12 = vadd.f32 3.0, %v785_v8  ;;  %v895_v21 = vmul.f32 %v863_v16, %v720_v1 }
  0xa0   : > { %2174 = vperm.xlu0 %3199, %v2068_v55   ;;  %2179 = vperm.xlu1 %3200, %v2069_v14  }
  0xa1   : > { %v800_v17 = vadd.f32 3.0, %v722_v11  ;;  %v857_v18 = vmax.f32 %v825_v12, 0.0  ;;  %v927_v36 = vmul.f32 0.16666667, %v895_v21 }
  0xa3   : > { %v832_v20 = vmax.f32 %v800_v17, 0.0  ;;  %v889_v25 = vmin.f32 %v857_v18, 6.0 }
  0xa4   : > { %v786_v22 = vpop.f32.mrf.mxu3 }
  0xa5   : > { %v864_v23 = vmin.f32 %v832_v20, 6.0  ;;  %v787_v26 = vadd.f32 %v3490_v61, %v786_v22  ;;  %v921_v39 = vmul.f32 %v889_v25, %v785_v8  ;;  %v3574_v25 = vpop.permute.xlu0 %2144 }
  0xa6   : > { %v724_v27 = vpop.f32.mrf.mxu0  ;;  %5079 = vst [vmem:[#allocation9_spill] sm:$0xff] %v3574_v25 }
  0xa7   : > { %v896_v28 = vmul.f32 %v864_v23, %v722_v11  ;;  %v725_v29 = vadd.f32 %v3490_v61, %v724_v27  ;;  %v826_v30 = vadd.f32 3.0, %v787_v26  ;;  %v953_v46 = vmul.f32 0.16666667, %v921_v39  ;;  %v1412_v39 = vld [vmem:[%s5042_s1 + $0x80] sm:$0xff] }
  0xa8   : > { %1435 = vperm.xlu0 %3199, %v1397_v15   ;;  %1510 = vperm.xlu1 %3200, %v1412_v39  }
  0xa9   : > { %v928_v37 = vmul.f32 0.16666667, %v896_v28  ;;  %v801_v38 = vadd.f32 3.0, %v725_v29  ;;  %2951 = vmatmul.msk.bf16.gmra.mxu0 %vm654_vm2, %v3119_v24  ;;  %v858_v40 = vmax.f32 %v826_v30, 0.0  ;;  %v3572_v24 = vpop.permute.xlu1 %2239 }
  0xab   : > { %v959_v41 = vpack.c.bf16 %v928_v37, %v927_v36  ;;  %v890_v42 = vmin.f32 %v858_v40, 6.0  ;;  %v833_v44 = vmax.f32 %v801_v38, 0.0  ;;  %v3579_v37 = vpop.permute.xlu2 %1575  ;;  %v1414_v38 = vld [vmem:[%s5042_s1 + $0x90] sm:$0xff]  ;;  %v2050_v40 = vld [vmem:[%s5043_s2] sm:$0xff] }
  0xac   : > { %v789_v45 = vpop.f32.mrf.mxu3  ;;  %5080 = vst [vmem:[#allocation10_spill] sm:$0xff] %v3579_v37  ;;  %1520 = vperm.xlu2 %3201, %v1414_v38  }
  0xad   : > { %2962 = vmatmul.msk.bf16.vlgmr.msra.gmra.mxu1 %vm987_vm3, %v959_v41  ;;  %v922_v47 = vmul.f32 %v890_v42, %v787_v26  ;;  %v790_v48 = vadd.f32 %v3490_v61, %v789_v45  ;;  %v865_v56 = vmin.f32 %v833_v44, 6.0  ;;  %v3595_v54 = vpop.permute.xlu0 %2229 }
  0xae   : > { %v726_v49 = vpop.f32.mrf.mxu0  ;;  %5082 = vst [vmem:[#allocation12_spill] sm:$0xff] %v3595_v54 }
  0xaf   : > { %v727_v50 = vadd.f32 %v3490_v61, %v726_v49  ;;  %v954_v51 = vmul.f32 0.16666667, %v922_v47  ;;  %v827_v52 = vadd.f32 3.0, %v790_v48  ;;  %v897_v1 = vmul.f32 %v865_v56, %v725_v29 }
  0xb0   : > { %2084 = vperm.xlu0 %3199, %v2050_v40  }
  0xb1   : > { %v802_v57 = vadd.f32 3.0, %v727_v50  ;;  %v972_v58 = vpack.c.bf16 %v954_v51, %v953_v46  ;;  %v859_v59 = vmax.f32 %v827_v52, 0.0  ;;  %v929_v16 = vmul.f32 0.16666667, %v897_v1  ;;  %v3592_v52 = vpop.permute.xlu1 %1570 }
  0xb2   : > { %5081 = vst [vmem:[#allocation11_spill] sm:$0xff] %v3592_v52 }
  0xb3   : > { %v834_v0 = vmax.f32 %v802_v57, 0.0  ;;  %2975 = vmatmul.msk.bf16.vlgmr.msrb.gmra.mxu3 %vm987_vm3, %v972_v58  ;;  %v891_v5 = vmin.f32 %v859_v59, 6.0  ;;  %v2053_v59 = vld [vmem:[%s5043_s2 + $0x18] sm:$0xff] }
  0xb4   : > { %v791_v2 = vpop.f32.mrf.mxu3  ;;  %2099 = vperm.xlu2 %3201, %v2053_v59  }
  0xb5   : > { %v866_v3 = vmin.f32 %v834_v0, 6.0  ;;  %v792_v6 = vadd.f32 %v3490_v61, %v791_v2  ;;  %v923_v20 = vmul.f32 %v891_v5, %v790_v48  ;;  %v2051_v0 = vld [vmem:[%s5043_s2 + $0x8] sm:$0xff] }
  0xb6   : > { %v729_v8 = vpop.f32.mrf.mxu0  ;;  %2089 = vperm.xlu1 %3200, %v2051_v0  }
  0xb7   : > { %v898_v10 = vmul.f32 %v866_v3, %v727_v50  ;;  %v730_v11 = vadd.f32 %v3490_v61, %v729_v8  ;;  %v828_v12 = vadd.f32 3.0, %v792_v6  ;;  %v955_v28 = vmul.f32 0.16666667, %v923_v20  ;;  %v3121_v50 = vld [vmem:[%s3340_s18 + $0x58] sm:$0xff]  ;;  %v1396_v20 = vld [vmem:[%s5042_s1] sm:$0xff] }
  0xb9   : > { %v930_v17 = vmul.f32 0.16666667, %v898_v10  ;;  %v803_v18 = vadd.f32 3.0, %v730_v11  ;;  %2952 = vmatmul.msk.bf16.gmra.mxu0 %vm654_vm2, %v3120_v4  ;;  %v860_v21 = vmax.f32 %v828_v12, 0.0 }
  0xbb   : > { %v960_v22 = vpack.c.bf16 %v930_v17, %v929_v16  ;;  %v892_v23 = vmin.f32 %v860_v21, 6.0  ;;  %v835_v26 = vmax.f32 %v803_v18, 0.0  ;;  %v3609_v17 = vpop.permute.xlu1 %2149  ;;  %v3611_v18 = vpop.permute.xlu0 %1560 }
  0xbc   : > { %v794_v27 = vpop.f32.mrf.mxu3  ;;  %5084 = vst [vmem:[#allocation14_spill] sm:$0xff] %v3609_v17  ;;  %1430 = vperm.xlu2 %3201, %v1396_v20  }
  0xbd   : > { %2963 = vmatmul.msk.bf16.gmra.mxu1 %vm987_vm3, %v960_v22  ;;  %v924_v29 = vmul.f32 %v892_v23, %v792_v6  ;;  %v795_v30 = vadd.f32 %v3490_v61, %v794_v27  ;;  %v867_v41 = vmin.f32 %v835_v26, 6.0  ;;  %v3605_v6 = vpop.permute.xlu2 %2224  ;;  %5085 = vst [vmem:[#allocation15_spill] sm:$0xff] %v3611_v18 }
  0xbe   : > { %v731_v33 = vpop.f32.mrf.mxu0  ;;  %5083 = vst [vmem:[#allocation13_spill] sm:$0xff] %v3605_v6 }
  0xbf   : > { %v732_v34 = vadd.f32 %v3490_v61, %v731_v33  ;;  %v956_v35 = vmul.f32 0.16666667, %v924_v29  ;;  %v829_v36 = vadd.f32 3.0, %v795_v30  ;;  %v899_v47 = vmul.f32 %v867_v41, %v730_v11 }
  0xc1   : > { %v804_v42 = vadd.f32 3.0, %v732_v34  ;;  %v861_v44 = vmax.f32 %v829_v36, 0.0  ;;  %v973_v45 = vpack.c.bf16 %v956_v35, %v955_v28  ;;  %v931_v1 = vmul.f32 0.16666667, %v899_v47 }
  0xc3   : > { %v836_v46 = vmax.f32 %v804_v42, 0.0  ;;  %2976 = vmatmul.msk.bf16.gmra.mxu3 %vm987_vm3, %v973_v45  ;;  %v893_v51 = vmin.f32 %v861_v44, 6.0  ;;  %v3622_v40 = vpop.permute.xlu1 %1480  ;;  %v3624_v41 = vpop.permute.xlu0 %2139 }
  0xc4   : > { %v796_v48 = vpop.f32.mrf.mxu3  ;;  %5087 = vst [vmem:[#allocation17_spill] sm:$0xff] %v3622_v40 }
  0xc5   : > { %v868_v49 = vmin.f32 %v836_v46, 6.0  ;;  %v797_v53 = vadd.f32 %v3490_v61, %v796_v48  ;;  %v925_v4 = vmul.f32 %v893_v51, %v795_v30  ;;  %v3616_v27 = vpop.permute.xlu2 %1485  ;;  %v3122_v30 = vld [vmem:[%s3340_s18 + $0x60] sm:$0xff]  ;;  %5088 = vst [vmem:[#allocation18_spill] sm:$0xff] %v3624_v41 }
  0xc6   : > { %v734_v55 = vpop.f32.mrf.mxu0  ;;  %5086 = vst [vmem:[#allocation16_spill] sm:$0xff] %v3616_v27 }
  0xc7   : > { %v900_v56 = vmul.f32 %v868_v49, %v732_v34  ;;  %v735_v57 = vadd.f32 %v3490_v61, %v734_v55  ;;  %v830_v58 = vadd.f32 3.0, %v797_v53  ;;  %v957_v12 = vmul.f32 0.16666667, %v925_v4  ;;  %v2067_v55 = vld [vmem:[%s5043_s2 + $0x88] sm:$0xff] }
  0xc8   : > { %2169 = vperm.xlu0 %3199, %v2067_v55  }
  0xc9   : > { %v932_v2 = vmul.f32 0.16666667, %v900_v56  ;;  %v805_v3 = vadd.f32 3.0, %v735_v57  ;;  %2953 = vmatmul.msk.bf16.gmra.mxu0 %vm654_vm2, %v3121_v50  ;;  %v862_v5 = vmax.f32 %v830_v58, 0.0 }
  0xcb   : > { %v961_v8 = vpack.c.bf16 %v932_v2, %v931_v1  ;;  %v894_v10 = vmin.f32 %v862_v5, 6.0  ;;  %v837_v11 = vmax.f32 %v805_v3, 0.0  ;;  %v3630_v51 = vpop.permute.xlu1 %1565 }
  0xcc   : > { %5090 = vst [vmem:[#allocation20_spill] sm:$0xff] %v3630_v51 }
  0xcd   : > { %2964 = vmatmul.msk.bf16.gmra.mxu1 %vm987_vm3, %v961_v8  ;;  %v926_v13 = vmul.f32 %v894_v10, %v797_v53  ;;  %v869_v21 = vmin.f32 %v837_v11, 6.0  ;;  %v3627_v45 = vpop.permute.xlu2 %2134  ;;  %v3632_v53 = vpop.permute.xlu0 %1470 }
  0xce   : > { %v736_v14 = vpop.f32.mrf.mxu0  ;;  %5089 = vst [vmem:[#allocation19_spill] sm:$0xff] %v3627_v45 }
  0xcf   : > { %v737_v15 = vadd.f32 %v3490_v61, %v736_v14  ;;  %v958_v16 = vmul.f32 0.16666667, %v926_v13  ;;  %v901_v28 = vmul.f32 %v869_v21, %v735_v57  ;;  %5091 = vst [vmem:[#allocation21_spill] sm:$0xff] %v3632_v53 }
  0xd1   : > { %v806_v22 = vadd.f32 3.0, %v737_v15  ;;  %v974_v23 = vpack.c.bf16 %v958_v16, %v957_v12  ;;  %v933_v36 = vmul.f32 0.16666667, %v901_v28 }
  0xd3   : > { %v838_v26 = vmax.f32 %v806_v22, 0.0  ;;  %2977 = vmatmul.msk.bf16.gmra.mxu3 %vm987_vm3, %v974_v23  ;;  %v3641_v10 = vpop.permute.xlu1 %2214 }
  0xd4   : > { %5093 = vst [vmem:[#allocation23_spill] sm:$0xff] %v3641_v10 }
  0xd5   : > { %v870_v29 = vmin.f32 %v838_v26, 6.0  ;;  %v3638_v1 = vpop.permute.xlu2 %2219  ;;  %v3643_v11 = vpop.permute.xlu0 %1555 }
  0xd6   : > { %v739_v33 = vpop.f32.mrf.mxu0  ;;  %5092 = vst [vmem:[#allocation22_spill] sm:$0xff] %v3638_v1 }
  0xd7   : > { %v902_v34 = vmul.f32 %v870_v29, %v737_v15  ;;  %v740_v35 = vadd.f32 %v3490_v61, %v739_v33  ;;  %5094 = vst [vmem:[#allocation24_spill] sm:$0xff] %v3643_v11 }
  0xd9   : > { %v934_v38 = vmul.f32 0.16666667, %v902_v34  ;;  %v807_v39 = vadd.f32 3.0, %v740_v35  ;;  %2954 = vmatmul.msk.bf16.gmra.mxu0 %vm654_vm2, %v3122_v30 }
  0xdb   : > { %v962_v42 = vpack.c.bf16 %v934_v38, %v933_v36  ;;  %v839_v44 = vmax.f32 %v807_v39, 0.0  ;;  %v3649_v29 = vpop.permute.xlu1 %1475  ;;  %v1413_v39 = vld [vmem:[%s5042_s1 + $0x88] sm:$0xff] }
  0xdc   : > { %5096 = vst [vmem:[#allocation26_spill] sm:$0xff] %v3649_v29  ;;  %1515 = vperm.xlu2 %3201, %v1413_v39   ;;  %v3829_v29 = vld [vmem:[%s5048_s7 + $0x8] ss:$0 sm:$0xff] }
  0xdd   : > { %2965 = vmatmul.msk.bf16.gmra.mxu1 %vm987_vm3, %v962_v42  ;;  %v871_v48 = vmin.f32 %v839_v44, 6.0  ;;  %v3646_v16 = vpop.permute.xlu2 %1550  ;;  %v3651_v30 = vpop.permute.xlu0 %2204 }
  0xde   : > { %v741_v46 = vpop.f32.mrf.mxu0  ;;  %5095 = vst [vmem:[#allocation25_spill] sm:$0xff] %v3646_v16 }
  0xdf   : > { %v742_v47 = vadd.f32 %v3490_v61, %v741_v46  ;;  %v903_v56 = vmul.f32 %v871_v48, %v740_v35  ;;  %5097 = vst [vmem:[#allocation27_spill] sm:$0xff] %v3651_v30 }
  0xe1   : > { %v808_v49 = vadd.f32 3.0, %v742_v47  ;;  %v935_v2 = vmul.f32 0.16666667, %v903_v56  ;;  %v2066_v56 = vld [vmem:[%s5043_s2 + $0x80] sm:$0xff] }
  0xe3   : > { %v840_v50 = vmax.f32 %v808_v49, 0.0  ;;  %v3660_v49 = vpop.permute.xlu1 %2124 }
  0xe4   : > { %5099 = vst [vmem:[#allocation29_spill] sm:$0xff] %v3660_v49  ;;  %2164 = vperm.xlu2 %3201, %v2066_v56  }
  0xe5   : > { %v872_v57 = vmin.f32 %v840_v50, 6.0  ;;  %v3653_v38 = vpop.permute.xlu2 %2129  ;;  %v3662_v50 = vpop.permute.xlu0 %1465 }
  0xe6   : > { %v744_v58 = vpop.f32.mrf.mxu0  ;;  %5098 = vst [vmem:[#allocation28_spill] sm:$0xff] %v3653_v38 }
  0xe7   : > { %v904_v59 = vmul.f32 %v872_v57, %v742_v47  ;;  %v745_v0 = vadd.f32 %v3490_v61, %v744_v58  ;;  %5100 = vst [vmem:[#allocation30_spill] sm:$0xff] %v3662_v50 }
  0xe9   : > { %v936_v3 = vmul.f32 0.16666667, %v904_v59  ;;  %v809_v4 = vadd.f32 3.0, %v745_v0 }
  0xeb   : > { %v963_v5 = vpack.c.bf16 %v936_v3, %v935_v2  ;;  %v841_v8 = vmax.f32 %v809_v4, 0.0 }
  0xed   : > { %2966 = vmatmul.msk.bf16.gmra.mxu1 %vm987_vm3, %v963_v5  ;;  %v873_v14 = vmin.f32 %v841_v8, 6.0  ;;  %v3667_v59 = vpop.permute.xlu2 %1460 }
  0xee   : > { %v746_v12 = vpop.f32.mrf.mxu0  ;;  %5101 = vst [vmem:[#allocation31_spill] sm:$0xff] %v3667_v59 }
  0xef   : > { %v747_v13 = vadd.f32 %v3490_v61, %v746_v12  ;;  %v905_v21 = vmul.f32 %v873_v14, %v745_v0  ;;  %v3670_v12 = vpop.permute.xlu1 %2209  ;;  %v3672_v14 = vpop.permute.xlu0 %2114 }
  0xf0   : > { %5102 = vst [vmem:[#allocation32_spill] sm:$0xff] %v3670_v12 }
  0xf1   : > { %v810_v15 = vadd.f32 3.0, %v747_v13  ;;  %v937_v33 = vmul.f32 0.16666667, %v905_v21  ;;  %5103 = vst [vmem:[#allocation33_spill] sm:$0xff] %v3672_v14 }
  0xf3   : > { %v842_v20 = vmax.f32 %v810_v15, 0.0 }
  0xf5   : > { %v874_v22 = vmin.f32 %v842_v20, 6.0 }
  0xf6   : > { %v749_v23 = vpop.f32.mrf.mxu0 }
  0xf7   : > { %v906_v26 = vmul.f32 %v874_v22, %v747_v13  ;;  %v750_v28 = vadd.f32 %v3490_v61, %v749_v23  ;;  %v3676_v22 = vpop.permute.xlu2 %1545  ;;  %v3230_v23 = vmov 0.0   ;;  %v3680_v39 = vpop.permute.xlu0 %2199 }
  0xf8   : > { %5104 = vst [vmem:[#allocation34_spill] sm:$0xff] %v3676_v22 }
  0xf9   : > { %v938_v34 = vmul.f32 0.16666667, %v906_v26  ;;  %v811_v35 = vadd.f32 3.0, %v750_v28  ;;  %1158 = vst [vmem:[#allocation2 + $0x8] sm:$0xff] %v3230_v23 }
  0xfa   : > { %1159 = vst [vmem:[#allocation2 + $0x10] sm:$0xff] %v3230_v23 }
  0xfb   : > { %v964_v36 = vpack.c.bf16 %v938_v34, %v937_v33  ;;  %v843_v42 = vmax.f32 %v811_v35, 0.0  ;;  %1157 = vst [vmem:[#allocation2] sm:$0xff] %v3230_v23 }
  0xfc   : > { %1160 = vst [vmem:[#allocation2 + $0x118] sm:$0xff] %v3230_v23 }
  0xfd   : > { %2967 = vmatmul.msk.bf16.gmra.mxu1 %vm987_vm3, %v964_v36  ;;  %v875_v47 = vmin.f32 %v843_v42, 6.0  ;;  %1161 = vst [vmem:[#allocation2 + $0x120] sm:$0xff] %v3230_v23  ;;  %v3678_v36 = vpop.permute.xlu1 %1540 }
  0xfe   : > { %v751_v44 = vpop.f32.mrf.mxu0  ;;  %1162 = vst [vmem:[#allocation2 + $0x128] sm:$0xff] %v3230_v23 }
  0xff   : > { %v752_v46 = vadd.f32 %v3490_v61, %v751_v44  ;;  %v907_v57 = vmul.f32 %v875_v47, %v750_v28  ;;  %5105 = vst [vmem:[#allocation35_spill] sm:$0xff] %v3678_v36  ;;  %v3683_v56 = vpop.permute.xlu2 %2194 }
 0x100   : > { %5106 = vst [vmem:[#allocation36_spill] sm:$0xff] %v3680_v39 }
 0x101   : > { %v812_v48 = vadd.f32 3.0, %v752_v46  ;;  %v939_v4 = vmul.f32 0.16666667, %v907_v57  ;;  %5107 = vst [vmem:[#allocation37_spill] sm:$0xff] %v3683_v56  ;;  %v1198_v6 = vld [vmem:[#allocation2 + $0xf] sm:$0xff] }
 0x103   : > { %v844_v55 = vmax.f32 %v812_v48, 0.0 }
 0x105   : > { %v876_v58 = vmin.f32 %v844_v55, 6.0 }
 0x106   : > { %v754_v0 = vpop.f32.mrf.mxu0 }
 0x107   : > { %v908_v2 = vmul.f32 %v876_v58, %v752_v46  ;;  %v755_v3 = vadd.f32 %v3490_v61, %v754_v0 }
 0x109   : > { %v940_v5 = vmul.f32 0.16666667, %v908_v2  ;;  %v813_v8 = vadd.f32 3.0, %v755_v3  ;;  %v3686_v2 = vpop.permute.xlu1 %2119 }
 0x10a   : > { %5108 = vst [vmem:[#allocation38_spill] sm:$0xff] %v3686_v2 }
 0x10b   : > { %v965_v13 = vpack.c.bf16 %v940_v5, %v939_v4  ;;  %v845_v15 = vmax.f32 %v813_v8, 0.0  ;;  %v3689_v4 = vpop.permute.xlu0 %1530 }
 0x10c   : > { %5109 = vst [vmem:[#allocation39_spill] sm:$0xff] %v3689_v4 }
 0x10d   : > { %2968 = vmatmul.msk.bf16.gmra.mxu1 %vm987_vm3, %v965_v13  ;;  %v877_v26 = vmin.f32 %v845_v15, 6.0  ;;  %v3691_v15 = vpop.permute.xlu2 %1455 }
 0x10e   : > { %v756_v20 = vpop.f32.mrf.mxu0 }
 0x10f   : > { %v757_v21 = vadd.f32 %v3490_v61, %v756_v20  ;;  %v909_v34 = vmul.f32 %v877_v26, %v755_v3 }
 0x111   : > { %v814_v28 = vadd.f32 3.0, %v757_v21  ;;  %v941_v47 = vmul.f32 0.16666667, %v909_v34 }
 0x113   : > { %v846_v33 = vmax.f32 %v814_v28, 0.0 }
 0x115   : > { %v878_v35 = vmin.f32 %v846_v33, 6.0  ;;  %v3697_v33 = vld [vmem:[%s5047_s6] ss:$0 sm:$0xff] }
 0x116   : > { %v759_v42 = vpop.f32.mrf.mxu0 }
 0x117   : > { %v910_v44 = vmul.f32 %v878_v35, %v757_v21  ;;  %v760_v46 = vadd.f32 %v3490_v61, %v759_v42  ;;  %v3699_v42 = vpop.permute.xlu1 %1450 }
 0x119   : > { %v942_v48 = vmul.f32 0.16666667, %v910_v44  ;;  %v815_v55 = vadd.f32 3.0, %v760_v46 }
 0x11b   : > { %v966_v57 = vpack.c.bf16 %v942_v48, %v941_v47  ;;  %v847_v58 = vmax.f32 %v815_v55, 0.0  ;;  %v3701_v47 = vpop.permute.xlu0 %2109 }
 0x11c   : > { %5110 = vst [vmem:[#allocation40_spill] sm:$0xff] %v3701_v47 }
 0x11d   : > { %2969 = vmatmul.msk.bf16.gmra.mxu1 %vm987_vm3, %v966_v57  ;;  %v879_v5 = vmin.f32 %v847_v58, 6.0  ;;  %v3704_v58 = vpop.permute.xlu2 %2104 }
 0x11e   : > { %v761_v0 = vpop.f32.mrf.mxu0  ;;  %5111 = vst [vmem:[#allocation41_spill] sm:$0xff] %v3704_v58 }
 0x11f   : > { %v762_v3 = vadd.f32 %v3490_v61, %v761_v0  ;;  %v911_v20 = vmul.f32 %v879_v5, %v760_v46 }
 0x121   : > { %v816_v8 = vadd.f32 3.0, %v762_v3  ;;  %v943_v34 = vmul.f32 0.16666667, %v911_v20 }
 0x123   : > { %v848_v13 = vmax.f32 %v816_v8, 0.0 }
 0x125   : > { %v880_v21 = vmin.f32 %v848_v13, 6.0  ;;  %v3720_v39 = vpop.permute.xlu2 %2189 }
 0x126   : > { %v764_v23 = vpop.f32.mrf.mxu0  ;;  %5114 = vst [vmem:[#allocation44_spill] sm:$0xff] %v3720_v39 }
 0x127   : > { %v912_v26 = vmul.f32 %v880_v21, %v762_v3  ;;  %v765_v28 = vadd.f32 %v3490_v61, %v764_v23  ;;  %v3708_v21 = vpop.permute.xlu1 %1535 }
 0x128   : > { %5112 = vst [vmem:[#allocation42_spill] sm:$0xff] %v3708_v21 }
 0x129   : > { %v944_v35 = vmul.f32 0.16666667, %v912_v26  ;;  %v817_v44 = vadd.f32 3.0, %v765_v28  ;;  %v3710_v26 = vpop.permute.xlu0 %1440 }
 0x12a   : > { %v1045_v48 = vpop.f32.mrf.mxu1  ;;  %5113 = vst [vmem:[#allocation43_spill] sm:$0xff] %v3710_v26 }
 0x12b   : > { %v1046_v46 = vadd.f32 %v3697_v33, %v1045_v48  ;;  %v967_v55 = vpack.c.bf16 %v944_v35, %v943_v34  ;;  %v849_v57 = vmax.f32 %v817_v44, 0.0 }
 0x12d   : > { %v1125_v0 = vmax.f32 %v1046_v46, 0.0  ;;  %2970 = vmatmul.msk.bf16.gmra.mxu1 %vm987_vm3, %v967_v55  ;;  %v881_v8 = vmin.f32 %v849_v57, 6.0  ;;  %v3718_v46 = vld [vmem:[%s5048_s7] sm:$0xff] }
 0x12e   : > { %v766_v3 = vpop.f32.mrf.mxu0  ;;  %v3807_v9 = vperm.slane %v3718_v46, 2 }
 0x12f   : > { %1163 = vst [vmem:[#allocation2 + $0x18] sm:$0xff] %v1125_v0  ;;  %v767_v5 = vadd.f32 %v3490_v61, %v766_v3  ;;  %v913_v35 = vmul.f32 %v881_v8, %v765_v28  ;;  %v3726_v28 = vperm.slane %v3718_v46, 1  ;;  %v3729_v8 = vperm.slane %v3718_v46, 4  ;;  %v3737_v22 = vpop.permute.xlu1 %2184 }
 0x130   : > { %5116 = vst [vmem:[#allocation46_spill] sm:$0xff] %v3737_v22  ;;  %v3752_v22 = vpop.permute.xlu2 %1520 }
 0x131   : > { %v818_v13 = vadd.f32 3.0, %v767_v5  ;;  %v1654_v39 = vmul.f32 0.0, %v3726_v28  ;;  %v3739_v30 = vpop.permute.xlu0 %1525  ;;  %5118 = vst [vmem:[#allocation48_spill] sm:$0xff] %v3752_v22 }
 0x132   : > { %v1047_v20 = vpop.f32.mrf.mxu1  ;;  %5117 = vst [vmem:[#allocation47_spill] sm:$0xff] %v3739_v30 }
 0x133   : > { %v850_v23 = vmax.f32 %v818_v13, 0.0  ;;  %v1048_v34 = vadd.f32 %v3697_v33, %v1047_v20 }
 0x135   : > { %v882_v44 = vmin.f32 %v850_v23, 6.0  ;;  %v3713_v48 = vmax.f32 %v1048_v34, 0.0  ;;  %v945_v23 = vmul.f32 0.16666667, %v913_v35 }
 0x136   : > { %v769_v55 = vpop.f32.mrf.mxu0  ;;  %v1110_v57 = vpop.f32.mrf.mxu3 }
 0x137   : > { %v914_v3 = vmul.f32 %v882_v44, %v767_v5  ;;  %1164 = vst [vmem:[#allocation2 + $0x20] sm:$0xff] %v3713_v48  ;;  %v770_v13 = vadd.f32 %v3490_v61, %v769_v55  ;;  %v1111_v20 = vadd.f32 %v3697_v33, %v1110_v57  ;;  %v3734_v55 = vperm.slane %v3718_v46, 7  ;;  %v3763_v16 = vpop.permute.xlu1 %1445 }
 0x138   : > { %v1688_v57 = vmul.f32 %v3729_v8, %v1125_v0  ;;  %5119 = vst [vmem:[#allocation49_spill] sm:$0xff] %v3763_v16 }
 0x139   : > { %v946_v34 = vmul.f32 0.16666667, %v914_v3  ;;  %v819_v21 = vadd.f32 3.0, %v770_v13  ;;  %v1151_v4 = vmax.f32 %v1111_v20, 0.0  ;;  %5115 = vst [vmem:[#allocation45_spill] sm:$0xff] %v3734_v55  ;;  %v1655_v20 = vmul.f32 %v3726_v28, %v1125_v0 }
 0x13a   : > { %v1050_v56 = vpop.f32.mrf.mxu1 }
 0x13b   : > { %v1051_v5 = vadd.f32 %v3697_v33, %v1050_v56  ;;  %v968_v44 = vpack.c.bf16 %v946_v34, %v945_v23  ;;  %1189 = vst [vmem:[#allocation2 + $0xe8] sm:$0xff] %v1151_v4  ;;  %v851_v12 = vmax.f32 %v819_v21, 0.0  ;;  %v1720_v34 = vadd.f32 %v1688_v57, %v1654_v39 }
 0x13c   : > { %v1689_v57 = vmul.f32 %v3729_v8, %v3713_v48 }
 0x13d   : > { %v3741_v35 = vmax.f32 %v1051_v5, 0.0  ;;  %2971 = vmatmul.msk.bf16.gmra.mxu1 %vm987_vm3, %v968_v44  ;;  %v883_v30 = vmin.f32 %v851_v12, 6.0 }
 0x13e   : > { %v771_v3 = vpop.f32.mrf.mxu0  ;;  %v1112_v56 = vpop.f32.mrf.mxu3  ;;  %v1200_v43 = vld [vmem:[#allocation2 + $0x1f] sm:$0xff] }
 0x13f   : > { %1165 = vst [vmem:[#allocation2 + $0x28] sm:$0xff] %v3741_v35  ;;  %v772_v4 = vadd.f32 %v3490_v61, %v771_v3  ;;  %v1690_v23 = vmul.f32 %v3729_v8, %v3741_v35  ;;  %v1755_v21 = vmul.f32 %v3734_v55, %v3741_v35  ;;  %v1113_v5 = vadd.f32 %v3697_v33, %v1112_v56  ;;  %v3815_v63 = vpop.permute.xlu1 %2094 }
 0x140   : > { %v915_v51 = vmul.f32 %v883_v30, %v770_v13  ;;  %5122 = vst [vmem:[#allocation52_spill] sm:$0xff] %v3815_v63 }
 0x141   : > { %v820_v44 = vadd.f32 3.0, %v772_v4  ;;  %v3754_v11 = vadd.f32 %v1755_v21, %v1720_v34  ;;  %v1152_v1 = vmax.f32 %v1113_v5, 0.0  ;;  %v3756_v3 = vadd.f32 %v1690_v23, %v1655_v20  ;;  %v3769_v23 = vpop.permute.xlu0 %2174 }
 0x142   : > { %v1052_v36 = vpop.f32.mrf.mxu1  ;;  %5120 = vst [vmem:[#allocation50_spill] sm:$0xff] %v3769_v23  ;;  %v947_v30 = vmul.f32 0.16666667, %v915_v51  ;;  %v1656_v5 = vmul.f32 %v3726_v28, %v3713_v48  ;;  %v1199_v23 = vld [vmem:[#allocation2 + $0x17] sm:$0xff]  ;;  %v3796_v48 = vperm.slane %v3718_v46, 6 }
 0x143   : > { %v852_v0 = vmax.f32 %v820_v44, 0.0  ;;  %v1053_v10 = vadd.f32 %v3697_v33, %v1052_v36  ;;  %1190 = vst [vmem:[#allocation2 + $0xf0] sm:$0xff] %v1152_v1  ;;  %v1721_v1 = vadd.f32 %v1689_v57, %v1654_v39  ;;  %v3786_v39 = vpop.permute.xlu2 %2099  ;;  %v3789_v57 = vperm.slane %v3718_v46, 3 }
 0x144   : > { %5121 = vst [vmem:[#allocation51_spill] sm:$0xff] %v3786_v39 }
 0x145   : > { %v884_v18 = vmin.f32 %v852_v0, 6.0  ;;  %v3761_v56 = vmax.f32 %v1053_v10, 0.0  ;;  %v1265_v62 = vmul.f32 %v3789_v57, %v1199_v23 }
 0x146   : > { %v774_v12 = vpop.f32.mrf.mxu0  ;;  %v1115_v52 = vpop.f32.mrf.mxu3  ;;  %v1854_v50 = vld [vmem:[#allocation2 + $0x21] sm:$0xff] }
 0x147   : > { %v916_v34 = vmul.f32 %v884_v18, %v772_v4  ;;  %1166 = vst [vmem:[#allocation2 + $0x30] sm:$0xff] %v3761_v56  ;;  %v3767_v20 = vadd.f32 %v3490_v61, %v774_v12  ;;  %v1691_v36 = vmul.f32 %v3729_v8, %v3761_v56  ;;  %v1756_v10 = vmul.f32 %v3734_v55, %v3761_v56  ;;  %v3868_v26 = vpop.permute.xlu1 %2179 }
 0x148   : > { %v3776_v21 = vadd.f32 %v3697_v33, %v1115_v52  ;;  %v3780_v4 = vperm.slane %v3718_v46, 0  ;;  %5124 = vst [vmem:[#allocation54_spill] sm:$0xff] %v3868_v26 }
 0x149   : > { %v948_v13 = vmul.f32 0.16666667, %v916_v34  ;;  %v821_v18 = vadd.f32 3.0, %v3767_v20  ;;  %v3784_v44 = vadd.f32 %v1756_v10, %v1721_v1  ;;  %v1197_v34 = vld [vmem:[#allocation2 + $0x7] sm:$0xff]  ;;  %v3793_v22 = vadd.f32 %v1691_v36, %v1656_v5  ;;  %v1853_v5 = vld [vmem:[#allocation2 + $0x19] sm:$0xff]  ;;  %v1436_v54 = vpop.permute.xlu0 %1435 }
 0x14a   : > { %v1055_v0 = vpop.f32.mrf.mxu1  ;;  %v5058_v12 = vmax.f32 %v3776_v21, 0.0  ;;  %v3802_v10 = vperm.slane %v3718_v46, 5  ;;  %v1851_v36 = vld [vmem:[#allocation2 + $0x9] sm:$0xff]  ;;  %v1231_v17 = vmul.f32 %v3780_v4, %v1198_v6  ;;  %v1232_v6 = vmul.f32 %v3780_v4, %v1199_v23 }
 0x14b   : > { %v1056_v51 = vadd.f32 %v3697_v33, %v1055_v0  ;;  %v969_v52 = vpack.c.bf16 %v948_v13, %v947_v30  ;;  %v853_v30 = vmax.f32 %v821_v18, 0.0  ;;  %v1201_v13 = vld [vmem:[#allocation2 + $0x27] sm:$0xff]  ;;  %v1884_v7 = vmul.f32 %v3807_v9, %v1851_v36 }
 0x14c   : > { %1191 = vst [vmem:[#allocation2 + $0xf8] sm:$0xff] %v5058_v12  ;;  %v1266_v12 = vmul.f32 %v3789_v57, %v1200_v43  ;;  %v1332_v46 = vmul.f32 %v3796_v48, %v1201_v13  ;;  %v1233_v38 = vmul.f32 %v3780_v4, %v1200_v43  ;;  %v1431_v43 = vpop.permute.xlu2 %1430 }
 0x14d   : > { %v3798_v1 = vmax.f32 %v1056_v51, 0.0  ;;  %2972 = vmatmul.msk.bf16.gmra.mxu1 %vm987_vm3, %v969_v52  ;;  %v1230_v51 = vmul.f32 %v3780_v4, %v1197_v34  ;;  %v1852_v52 = vld [vmem:[#allocation2 + $0x11] sm:$0xff]  ;;  %v1919_v34 = vmul.f32 %v3802_v10, %v1853_v5  ;;  %v885_v27 = vmin.f32 %v853_v30, 6.0 }
 0x14e   : > { %v776_v0 = vpop.f32.mrf.mxu0  ;;  %v1117_v19 = vpop.f32.mrf.mxu3  ;;  %v3817_v25 = vld [vmem:[#allocation2 + $0x2f] sm:$0xff]  ;;  %v1657_v30 = vmul.f32 %v3726_v28, %v3741_v35 }
 0x14f   : > { %1167 = vst [vmem:[#allocation2 + $0x38] sm:$0xff] %v3798_v1  ;;  %v777_v18 = vadd.f32 %v3490_v61, %v776_v0  ;;  %v1118_v41 = vadd.f32 %v3697_v33, %v1117_v19  ;;  %v1885_v0 = vmul.f32 %v3807_v9, %v1852_v52  ;;  %v1297_v49 = vadd.f32 %v1265_v62, %v1230_v51  ;;  %v1855_v53 = vld [vmem:[#allocation2 + $0x29] sm:$0xff] }
 0x150   : > { %v1298_v19 = vadd.f32 %v1266_v12, %v1231_v17  ;;  %v1333_v23 = vmul.f32 %v3796_v48, %v3817_v25  ;;  %v1886_v51 = vmul.f32 %v3807_v9, %v1853_v5  ;;  %v1951_v2 = vadd.f32 %v1919_v34, %v1884_v7 }
 0x151   : > { %v822_v45 = vadd.f32 3.0, %v777_v18  ;;  %v3832_v37 = vmax.f32 %v1118_v41, 0.0  ;;  %v1364_v62 = vadd.f32 %v1332_v46, %v1297_v49  ;;  %v917_v17 = vmul.f32 %v885_v27, %v3767_v20  ;;  %v2085_v47 = vpop.permute.xlu0 %2084 }
 0x152   : > { %v1057_v40 = vpop.f32.mrf.mxu1  ;;  %v3846_v41 = vmul.f32 %v3780_v4, %v1201_v13  ;;  %v1267_v49 = vmul.f32 %v3789_v57, %v1201_v13  ;;  %v1986_v7 = vmul.f32 %v3829_v29, %v1855_v53  ;;  %v1692_v27 = vmul.f32 %v3729_v8, %v3798_v1 }
 0x153   : > { %v1058_v36 = vadd.f32 %v3697_v33, %v1057_v40  ;;  %5123 = vst [vmem:[#allocation53_spill] sm:$0xff] %v3832_v37  ;;  %v854_v52 = vmax.f32 %v822_v45, 0.0  ;;  %v1658_v40 = vmul.f32 %v3726_v28, %v3761_v56  ;;  %v1365_v20 = vadd.f32 %v1333_v23, %v1298_v19 }
 0x154   : > { %1192 = vst [vmem:[#allocation2 + $0x100] sm:$0xff] %v3832_v37  ;;  %v1920_v46 = vmul.f32 %v3802_v10, %v1854_v50  ;;  %v1588_v13 = vmul.f32 %v1431_v43, %v1364_v62  ;;  %v949_v39 = vmul.f32 0.16666667, %v917_v17  ;;  %v3865_v23 = vmul.f32 %v3807_v9, %v1854_v50 }
 0x155   : > { %v3839_v14 = vmax.f32 %v1058_v36, 0.0  ;;  %v886_v45 = vmin.f32 %v854_v52, 6.0  ;;  %v1268_v36 = vmul.f32 %v3789_v57, %v3817_v25  ;;  %v1921_v52 = vmul.f32 %v3802_v10, %v1855_v53 }
 0x156   : > { %v779_v35 = vpop.f32.mrf.mxu0  ;;  %v1120_v12 = vpop.f32.mrf.mxu3  ;;  %v1589_v43 = vmul.f32 %v1436_v54, %v1365_v20  ;;  %v3870_v62 = vadd.f32 %v1267_v49, %v1232_v6  ;;  %v3886_v6 = vmul.f32 %v3807_v9, %v1855_v53  ;;  %v5126_v49 = vmax.f32 %v3776_v21, 0.0 }
 0x157   : > { %1168 = vst [vmem:[#allocation2 + $0x40] sm:$0xff] %v3839_v14  ;;  %v3852_v5 = vadd.f32 %v3490_v61, %v779_v35  ;;  %v918_v56 = vmul.f32 %v886_v45, %v777_v18  ;;  %v1121_v34 = vadd.f32 %v3697_v33, %v1120_v12  ;;  %v1693_v19 = vmul.f32 %v3729_v8, %v3839_v14 }
 0x158   : > { %v2018_v18 = vadd.f32 %v1986_v7, %v1951_v2  ;;  %v1724_v12 = vadd.f32 %v1692_v27, %v1657_v30  ;;  %v3875_v2 = vadd.f32 %v1920_v46, %v1885_v0  ;;  %v1330_v7 = vld [vmem:[#allocation2 + $0x11f] sm:$0xff]  ;;  %v3883_v54 = vadd.f32 %v1268_v36, %v1233_v38  ;;  %v1227_v0 = vld [vmem:[#allocation2 + $0xf7] sm:$0xff] }
 0x159   : > { %v823_v59 = vadd.f32 3.0, %v3852_v5  ;;  %v950_v35 = vmul.f32 0.16666667, %v918_v56  ;;  %v1155_v16 = vmax.f32 %v1121_v34, 0.0  ;;  %v3872_v56 = vadd.f32 %v1693_v19, %v1658_v40 }
 0x15a   : > { %v1060_v63 = vpop.f32.mrf.mxu1  ;;  %v1819_v34 = vadd.f32 %v3754_v11, %v1588_v13  ;;  %v2242_v30 = vmul.f32 %v2085_v47, %v2018_v18  ;;  %v1659_v38 = vmul.f32 %v3726_v28, %v3798_v1  ;;  %v3897_v53 = vadd.f32 %v3784_v44, %v1589_v43 }
 0x15b   : > { %v1061_v45 = vadd.f32 %v3697_v33, %v1060_v63  ;;  %v970_v17 = vpack.c.bf16 %v950_v35, %v949_v39  ;;  %1193 = vst [vmem:[#allocation2 + $0x108] sm:$0xff] %v1155_v16  ;;  %v855_v58 = vmax.f32 %v823_v59, 0.0  ;;  %v3881_v63 = vmul.f32 %v3780_v4, %v3817_v25 }
 0x15c   : > { %v3888_v39 = vadd.f32 %v1921_v52, %v1886_v51  ;;  %v3900_v51 = vmul.f32 %v3796_v48, %v1330_v7  ;;  %v1683_v27 = vmul.f32 %v3726_v28, %v5126_v49  ;;  %v1260_v13 = vmul.f32 %v3780_v4, %v1227_v0  ;;  %v1983_v52 = vld [vmem:[#allocation2 + $0x119] sm:$0xff]  ;;  %v1984_v0 = vld [vmem:[#allocation2 + $0x121] sm:$0xff] }
 0x15d   : > { %v3877_v50 = vmax.f32 %v1061_v45, 0.0  ;;  %2973 = vmatmul.msk.bf16.gmra.mxu1 %vm987_vm3, %v970_v17  ;;  %v887_v20 = vmin.f32 %v855_v58, 6.0  ;;  %v1684_v35 = vmul.f32 %v3726_v28, %v3832_v37  ;;  %v1757_v18 = vmul.f32 %v3734_v55, %v3798_v1  ;;  %v3932_v1 = vld [vmem:[#allocation2 + $0x37] sm:$0xff] }
 0x15e   : > { %5125 = vst [vmem:[#allocation55_spill] sm:$0xff] %v3888_v39  ;;  %v781_v11 = vpop.f32.mrf.mxu0  ;;  %v1122_v59 = vpop.f32.mrf.mxu3  ;;  %v3918_v58 = vadd.f32 %v2242_v30, %v1819_v34  ;;  %v3923_v7 = vmul.f32 0.0, %v3734_v55 }
 0x15f   : > { %1169 = vst [vmem:[#allocation2 + $0x48] sm:$0xff] %v3877_v50  ;;  %v782_v40 = vadd.f32 %v3490_v61, %v781_v11  ;;  %v1123_v25 = vadd.f32 %v3697_v33, %v1122_v59  ;;  %v1694_v47 = vmul.f32 %v3729_v8, %v3877_v50  ;;  %v1856_v61 = vld [vmem:[#allocation2 + $0x31] sm:$0xff]  ;;  %v1759_v21 = vmul.f32 %v3734_v55, %v3877_v50 }
 0x160   : > { %5128 = vst [vmem:[#allocation57_spill] sm:$0xff] %v3918_v58  ;;  %v3926_v11 = vmul.f32 %v3807_v9, %v1856_v61  ;;  %v1718_v59 = vmul.f32 %v3729_v8, %v1155_v16  ;;  %v919_v30 = vmul.f32 %v887_v20, %v3852_v5  ;;  %v3944_v16 = vpop.permute.xlu1 %1510  ;;  %v1987_v26 = vmul.f32 %v3829_v29, %v1856_v61 }
 0x161   : > { %v824_v46 = vadd.f32 3.0, %v782_v40  ;;  %v3907_v36 = vmax.f32 %v1123_v25, 0.0  ;;  %v3912_v19 = vadd.f32 %v1694_v47, %v1659_v38  ;;  %v3930_v25 = vmul.f32 %v3829_v29, %v1983_v52  ;;  %v3939_v47 = vld [vmem:[#allocation2 + $0xff] sm:$0xff]  ;;  %5131 = vst [vmem:[#allocation60_spill] sm:$0xff] %v3944_v16 }
 0x162   : > { %v1062_v44 = vpop.f32.mrf.mxu1  ;;  %v1262_v17 = vld [vmem:[#allocation2 + $0x107] sm:$0xff]  ;;  %v3934_v34 = vadd.f32 %v1759_v21, %v1724_v12  ;;  %5129 = vst [vmem:[#allocation58_spill] sm:$0xff] %v3939_v47  ;;  %v3947_v52 = vmul.f32 %v3802_v10, %v1856_v61  ;;  %v3953_v5 = vadd.f32 %v1757_v18, %v3756_v3  ;;  %v1660_v61 = vmul.f32 %v3726_v28, %v3839_v14 }
 0x163   : > { %5127 = vst [vmem:[#allocation56_spill] sm:$0xff] %v3907_v36  ;;  %v856_v45 = vmax.f32 %v824_v46, 0.0  ;;  %v1063_v43 = vadd.f32 %v3697_v33, %v1062_v44  ;;  %v1295_v46 = vmul.f32 %v3789_v57, %v1262_v17  ;;  %v3942_v44 = vld [vmem:[#allocation2 + $0xf9] sm:$0xff]  ;;  %v1719_v12 = vmul.f32 %v3729_v8, %v3907_v36  ;;  %v3956_v21 = vld [vmem:[#allocation2 + $0x101] sm:$0xff] }
 0x164   : > { %1194 = vst [vmem:[#allocation2 + $0x110] sm:$0xff] %v3907_v36  ;;  %v1261_v17 = vmul.f32 %v3780_v4, %v3939_v47  ;;  %v1750_v16 = vadd.f32 %v1718_v59, %v1683_v27  ;;  %v1914_v3 = vmul.f32 %v3807_v9, %v3942_v44  ;;  %v951_v18 = vmul.f32 0.16666667, %v919_v30 }
 0x165   : > { %v888_v38 = vmin.f32 %v856_v45, 6.0  ;;  %v3937_v49 = vmax.f32 %v1063_v43, 0.0  ;;  %5130 = vst [vmem:[#allocation59_spill] sm:$0xff] %v3942_v44  ;;  %v2017_v45 = vmul.f32 %v3829_v29, %v1984_v0  ;;  %v3961_v43 = vmul.f32 %v3780_v4, %v3932_v1 }
 0x166   : > { %5132 = vst [vmem:[#allocation61_spill] sm:$0xff] %v3953_v5  ;;  %v1327_v0 = vadd.f32 %v1295_v46, %v1260_v13  ;;  %v1915_v27 = vmul.f32 %v3807_v9, %v3956_v21  ;;  %v1758_v30 = vmul.f32 %v3734_v55, %v3839_v14 }
 0x167   : > { %v920_v20 = vmul.f32 %v888_v38, %v782_v40  ;;  %1170 = vst [vmem:[#allocation2 + $0x50] sm:$0xff] %v3937_v49  ;;  %v1695_v40 = vmul.f32 %v3729_v8, %v3937_v49  ;;  %v1760_v36 = vmul.f32 %v3734_v55, %v3937_v49 }
 0x168   : > { %5133 = vst [vmem:[#allocation62_spill] sm:$0xff] %v3956_v21  ;;  %v4003_v21 = vld [vmem:[#allocation2 + $0x39] sm:$0xff] }
 0x169   : > { %5134 = vst [vmem:[#allocation63_spill] sm:$0xff] %v3961_v43  ;;  %v952_v38 = vmul.f32 0.16666667, %v920_v20  ;;  %v1751_v43 = vadd.f32 %v1719_v12, %v1684_v35  ;;  %v3979_v44 = vadd.f32 %v1695_v40, %v1660_v61  ;;  %v2019_v35 = vadd.f32 %v1987_v26, %v3875_v2 }
 0x16a   : > { %v1065_v37 = vpop.f32.mrf.mxu1  ;;  %v3995_v14 = vadd.f32 %v1760_v36, %v3872_v56  ;;  %v4008_v56 = vadd.f32 %v1758_v30, %v3793_v22 }
 0x16b   : > { %v3973_v58 = vld [vmem:[#allocation2 + $0x10f] sm:$0xff]  ;;  %v1329_v5 = vld [vmem:[#allocation2 + $0x117] sm:$0xff]  ;;  %v971_v20 = vpack.c.bf16 %v952_v38, %v951_v18  ;;  %v1066_v13 = vadd.f32 %v3697_v33, %v1065_v37  ;;  %v1817_v38 = vadd.f32 %v3923_v7, %v1750_v16  ;;  %v1818_v16 = vadd.f32 %v3923_v7, %v1751_v43 }
 0x16c   : > { %v3977_v59 = vld [vmem:[#allocation2 + $0x109] sm:$0xff]  ;;  %v1296_v46 = vmul.f32 %v3789_v57, %v3973_v58  ;;  %v1362_v47 = vmul.f32 %v3796_v48, %v1329_v5  ;;  %v3987_v39 = vld [vmem:[#allocation2 + $0x111] sm:$0xff]  ;;  %v4000_v5 = vld [vmem:[#allocation2 + $0x3f] sm:$0xff] }
 0x16d   : > { %5135 = vst [vmem:[#allocation64_spill] sm:$0xff] %v3977_v59  ;;  %v1949_v12 = vmul.f32 %v3802_v10, %v3977_v59  ;;  %v1950_v61 = vmul.f32 %v3802_v10, %v3987_v39  ;;  %v3997_v40 = vmax.f32 %v1066_v13, 0.0  ;;  %2974 = vmatmul.msk.bf16.gmra.mxu1 %vm987_vm3, %v971_v20  ;;  %v1269_v59 = vmul.f32 %v3789_v57, %v3932_v1 }
 0x16e   : > { %v1328_v37 = vadd.f32 %v1296_v46, %v1261_v17  ;;  %v1394_v18 = vadd.f32 %v1362_v47, %v1327_v0  ;;  %v4014_v17 = vld [vmem:[#allocation2 + $0x47] sm:$0xff]  ;;  %v2090_v0 = vpop.permute.xlu1 %2089  ;;  %v1270_v30 = vmul.f32 %v3789_v57, %v4000_v5  ;;  %v4024_v13 = vld [vmem:[#allocation2 + $0x4f] sm:$0xff] }
 0x16f   : > { %v1981_v26 = vadd.f32 %v1949_v12, %v1914_v3  ;;  %v1982_v2 = vadd.f32 %v1950_v61, %v1915_v27  ;;  %1171 = vst [vmem:[#allocation2 + $0x58] sm:$0xff] %v3997_v40  ;;  %v1661_v3 = vmul.f32 %v3726_v28, %v3877_v50  ;;  %v1696_v22 = vmul.f32 %v3729_v8, %v3997_v40  ;;  %v4026_v7 = vld [vmem:[#allocation2 + $0x49] sm:$0xff] }
 0x170   : > { %v1395_v36 = vadd.f32 %v3900_v51, %v1328_v37  ;;  %v1618_v47 = vmul.f32 %v3524_v31, %v1394_v18  ;;  %v1761_v50 = vmul.f32 %v3734_v55, %v3997_v40  ;;  %v2243_v61 = vmul.f32 %v2090_v0, %v2019_v35 }
 0x171   : > { %v2048_v27 = vadd.f32 %v3930_v25, %v1981_v26  ;;  %v2049_v20 = vadd.f32 %v2017_v45, %v1982_v2  ;;  %v1923_v25 = vmul.f32 %v3802_v10, %v4003_v21  ;;  %v4034_v12 = vadd.f32 %v1696_v22, %v1661_v3  ;;  %v1858_v26 = vld [vmem:[#allocation2 + $0x41] sm:$0xff] }
 0x172   : > { %v1619_v51 = vmul.f32 %v3552_v60, %v1395_v36  ;;  %v1849_v31 = vadd.f32 %v1817_v38, %v1618_v47  ;;  %v1067_v45 = vpop.f32.mrf.mxu1  ;;  %v1336_v60 = vmul.f32 %v3796_v48, %v4014_v17  ;;  %v4040_v38 = vadd.f32 %v1761_v50, %v3912_v19 }
 0x173   : > { %v2272_v43 = vmul.f32 %v3526_v32, %v2048_v27  ;;  %v2273_v46 = vmul.f32 %v3572_v24, %v2049_v20  ;;  %v1068_v37 = vadd.f32 %v3697_v33, %v1067_v45  ;;  %v4045_v32 = vld [vmem:[%s5049_s8] ss:$0 sm:$0xff]  ;;  %v1301_v24 = vadd.f32 %v1269_v59, %v3846_v41 }
 0x174   : > { %v1850_v18 = vadd.f32 %v1818_v16, %v1619_v51  ;;  %v1337_v36 = vmul.f32 %v3796_v48, %v4024_v13  ;;  %v1990_v35 = vmul.f32 %v3829_v29, %v4026_v7  ;;  %v1302_v19 = vadd.f32 %v1270_v30, %v3881_v63 }
 0x175   : > { %v2304_v2 = vadd.f32 %v2272_v43, %v1849_v31  ;;  %v4052_v47 = vmax.f32 %v1068_v37, 0.0  ;;  %v1334_v3 = vmul.f32 %v3796_v48, %v3932_v1  ;;  %v1368_v27 = vadd.f32 %v1336_v60, %v1301_v24 }
 0x176   : > { %v2305_v16 = vadd.f32 %v2273_v46, %v1850_v18  ;;  %v1924_v20 = vmul.f32 %v3802_v10, %v1858_v26  ;;  %v1955_v41 = vadd.f32 %v1923_v25, %v3886_v6  ;;  %v1954_v59 = vadd.f32 %v3947_v52, %v3865_v23  ;;  %v4067_v30 = vld [vmem:[#allocation2 + $0x51] sm:$0xff] }
 0x177   : > { %v2340_v0 = vadd.f32 %v4045_v32, %v2304_v2  ;;  %v4063_v22 = vadd.f32 %v2243_v61, %v3897_v53  ;;  %1172 = vst [vmem:[#allocation2 + $0x60] sm:$0xff] %v4052_v47  ;;  %v1369_v1 = vadd.f32 %v1337_v36, %v1302_v19  ;;  %v1662_v31 = vmul.f32 %v3726_v28, %v3937_v49  ;;  %v5136_v36 = vld [vmem:[#allocation41_spill] sm:$0xff] }
 0x178   : > { %v2341_v63 = vadd.f32 %v4045_v32, %v2305_v16  ;;  %v1697_v6 = vmul.f32 %v3729_v8, %v4052_v47  ;;  %v2022_v50 = vadd.f32 %v1990_v35, %v1955_v41  ;;  %v1762_v23 = vmul.f32 %v3734_v55, %v4052_v47 }
 0x179   : > { %v2372_v51 = vmax.f32 %v2340_v0, 0.0  ;;  %v1335_v53 = vmul.f32 %v3796_v48, %v4000_v5  ;;  %v1366_v52 = vadd.f32 %v1334_v3, %v3870_v62  ;;  %v1592_v46 = vmul.f32 %v3699_v42, %v1368_v27  ;;  %v5137_v0 = vld [vmem:[#allocation40_spill] sm:$0xff] }
 0x17a   : > { %v2373_v25 = vmax.f32 %v2341_v63, 0.0  ;;  %v1070_v45 = vpop.f32.mrf.mxu1  ;;  %v4078_v43 = vadd.f32 %v1697_v6, %v1662_v31  ;;  %v1956_v49 = vadd.f32 %v1924_v20, %v3926_v11  ;;  %v1991_v60 = vmul.f32 %v3829_v29, %v4067_v30  ;;  %v4107_v20 = vld [vmem:[#allocation2 + $0x57] sm:$0xff] }
 0x17b   : > { %v1071_v61 = vadd.f32 %v3697_v33, %v1070_v45  ;;  %v4086_v18 = vadd.f32 %v1762_v23, %v3979_v44  ;;  %v1593_v2 = vmul.f32 %v3691_v15, %v1369_v1  ;;  %v1237_v62 = vmul.f32 %v3780_v4, %v4000_v5  ;;  %v5138_v63 = vld [vmem:[#allocation43_spill] sm:$0xff] }
 0x17c   : > { %v2397_v37 = vpack.c.bf16 %v2373_v25, %v2372_v51  ;;  %v2023_v24 = vadd.f32 %v1991_v60, %v1956_v49  ;;  %v2246_v35 = vmul.f32 %v5136_v36, %v2022_v50  ;;  %v1988_v42 = vmul.f32 %v3829_v29, %v4003_v21  ;;  %v5139_v25 = vld [vmem:[#allocation55_spill] sm:$0xff] }
 0x17d   : > { %v4094_v11 = vmax.f32 %v1071_v61, 0.0  ;;  %v1271_v16 = vmul.f32 %v3789_v57, %v4014_v17  ;;  %v1890_v44 = vmul.f32 %v3807_v9, %v4003_v21  ;;  %v1367_v15 = vadd.f32 %v1335_v53, %v3883_v54  ;;  %v5140_v53 = vld [vmem:[#allocation63_spill] sm:$0xff] }
 0x17e   : > { %2467 = vmatpush.bf16.msra.mxu3 %v2397_v37  ;;  %v1272_v5 = vmul.f32 %v3789_v57, %v4024_v13  ;;  %v1891_v19 = vmul.f32 %v3807_v9, %v1858_v26  ;;  %v1823_v3 = vadd.f32 %v3934_v34, %v1592_v46  ;;  %v2247_v27 = vmul.f32 %v5137_v0, %v2023_v24  ;;  %v4115_v51 = vld [vmem:[#allocation2 + $0x5f] sm:$0xff] }
 0x17f   : > { %1173 = vst [vmem:[#allocation2 + $0x68] sm:$0xff] %v4094_v11  ;;  %v1663_v41 = vmul.f32 %v3726_v28, %v3997_v40  ;;  %v1698_v21 = vmul.f32 %v3729_v8, %v4094_v11  ;;  %v1824_v54 = vadd.f32 %v3995_v14, %v1593_v2  ;;  %v1590_v1 = vmul.f32 %v5138_v63, %v1366_v52  ;;  %v4117_v31 = vld [vmem:[#allocation2 + $0x59] sm:$0xff] }
 0x180   : > { %v1763_v34 = vmul.f32 %v3734_v55, %v4094_v11  ;;  %v2278_v6 = vadd.f32 %v2246_v35, %v1823_v3  ;;  %v1989_v50 = vmul.f32 %v3829_v29, %v1858_v26  ;;  %v2020_v23 = vadd.f32 %v1988_v42, %v5139_v25  ;;  %v5141_v37 = vld [vmem:[#allocation49_spill] sm:$0xff] }
 0x181   : > { %v4123_v40 = vadd.f32 %v1698_v21, %v1663_v41  ;;  %v1303_v45 = vadd.f32 %v1271_v16, %v5140_v53  ;;  %v1925_v14 = vmul.f32 %v3802_v10, %v4026_v7  ;;  %v2279_v52 = vadd.f32 %v2247_v27, %v1824_v54  ;;  %v5142_v16 = vld [vmem:[#allocation52_spill] sm:$0xff]  ;;  %v5143_v27 = vld [vmem:[#allocation61_spill] sm:$0xff] }
 0x182   : > { %v1072_v46 = vpop.f32.mrf.mxu1  ;;  %v4129_v49 = vadd.f32 %v1763_v34, %v4034_v12  ;;  %v1304_v60 = vadd.f32 %v1272_v5, %v1237_v62  ;;  %v1338_v61 = vmul.f32 %v3796_v48, %v4107_v20  ;;  %v1591_v26 = vmul.f32 %v5141_v37, %v1367_v15  ;;  %v5144_v34 = vld [vmem:[#allocation57_spill] sm:$0xff]  ;;  %v4166_v37 = vld [vmem:[#allocation2 + $0xef] sm:$0xff] }
 0x183   : > { %v1073_v2 = vadd.f32 %v3697_v33, %v1072_v46  ;;  %v1339_v24 = vmul.f32 %v3796_v48, %v4115_v51  ;;  %v1992_v36 = vmul.f32 %v3829_v29, %v4117_v31  ;;  %v2315_v35 = vadd.f32 %v4045_v32, %v2279_v52 }
 0x184   : > { %v2314_v42 = vadd.f32 %v4045_v32, %v2278_v6  ;;  %v2021_v12 = vadd.f32 %v1989_v50, %v1954_v59  ;;  %v2244_v62 = vmul.f32 %v5142_v16, %v2020_v23  ;;  %v2311_v5 = vadd.f32 %v4045_v32, %v4063_v22  ;;  %v5147_v16 = vld [vmem:[#allocation30_spill] sm:$0xff] }
 0x185   : > { %v4144_v3 = vmax.f32 %v1073_v2, 0.0  ;;  %v1926_v15 = vmul.f32 %v3802_v10, %v4067_v30  ;;  %v1957_v0 = vadd.f32 %v1925_v14, %v1890_v44  ;;  %v1821_v41 = vadd.f32 %v5143_v27, %v1590_v1  ;;  %v5145_v44 = vld [vmem:[#allocation51_spill] sm:$0xff] }
 0x186   : > { %v1664_v21 = vmul.f32 %v3726_v28, %v4052_v47  ;;  %v4151_v54 = vld [vmem:[#allocation2 + $0x61] sm:$0xff]  ;;  %v1370_v63 = vadd.f32 %v1338_v61, %v1303_v45  ;;  %v2347_v59 = vmax.f32 %v2315_v35, 0.0  ;;  %v2310_v6 = vadd.f32 %v4045_v32, %v5144_v34 }
 0x187   : > { %1174 = vst [vmem:[#allocation2 + $0x70] sm:$0xff] %v4144_v3  ;;  %v1699_v22 = vmul.f32 %v3729_v8, %v4144_v3  ;;  %v1371_v50 = vadd.f32 %v1339_v24, %v1304_v60  ;;  %v2024_v25 = vadd.f32 %v1992_v36, %v1957_v0  ;;  %v2245_v23 = vmul.f32 %v5145_v44, %v2021_v12  ;;  %v5146_v24 = vld [vmem:[#allocation31_spill] sm:$0xff]  ;;  %v5150_v34 = vld [vmem:[#allocation58_spill] sm:$0xff] }
 0x188   : > { %v1764_v1 = vmul.f32 %v3734_v55, %v4144_v3  ;;  %v2346_v47 = vmax.f32 %v2314_v42, 0.0  ;;  %v2276_v53 = vadd.f32 %v2244_v62, %v1821_v41  ;;  %v2343_v14 = vmax.f32 %v2311_v5, 0.0  ;;  %v4184_v41 = vld [vmem:[#allocation2 + $0x67] sm:$0xff] }
 0x189   : > { %v4161_v45 = vadd.f32 %v1699_v22, %v1664_v21  ;;  %v1958_v52 = vadd.f32 %v1926_v15, %v1891_v19  ;;  %v1993_v46 = vmul.f32 %v3829_v29, %v4151_v54  ;;  %v1822_v61 = vadd.f32 %v4008_v56, %v1591_v26  ;;  %v5148_v15 = vld [vmem:[#allocation33_spill] sm:$0xff]  ;;  %v5149_v21 = vld [vmem:[#allocation38_spill] sm:$0xff] }
 0x18a   : > { %v1075_v60 = vpop.f32.mrf.mxu1  ;;  %v4169_v2 = vadd.f32 %v1764_v1, %v4078_v43  ;;  %v1594_v36 = vmul.f32 %v5146_v24, %v1370_v63  ;;  %v4172_v35 = vpack.c.bf16 %v2347_v59, %v2346_v47  ;;  %v2342_v42 = vmax.f32 %v2310_v6, 0.0 }
 0x18b   : > { %v1076_v12 = vadd.f32 %v3697_v33, %v1075_v60  ;;  %v1595_v19 = vmul.f32 %v5147_v16, %v1371_v50  ;;  %v2025_v62 = vadd.f32 %v1993_v46, %v1958_v52  ;;  %v2277_v5 = vadd.f32 %v2245_v23, %v1822_v61 }
 0x18c   : > { %v2248_v0 = vmul.f32 %v5148_v15, %v2024_v25  ;;  %v2312_v56 = vadd.f32 %v4045_v32, %v2276_v53  ;;  %v4178_v26 = vpack.c.bf16 %v2343_v14, %v2342_v42  ;;  %v1259_v43 = vmul.f32 %v3780_v4, %v4166_v37 }
 0x18d   : > { %v4182_v27 = vmax.f32 %v1076_v12, 0.0  ;;  %v2249_v63 = vmul.f32 %v5149_v21, %v2025_v62  ;;  %v2313_v59 = vadd.f32 %v4045_v32, %v2277_v5  ;;  %v1294_v6 = vmul.f32 %v3789_v57, %v5150_v34 }
 0x18e   : > { %v1238_v22 = vmul.f32 %v3780_v4, %v4014_v17  ;;  %v1273_v50 = vmul.f32 %v3789_v57, %v4107_v20  ;;  %v1274_v25 = vmul.f32 %v3789_v57, %v4115_v51  ;;  %v1825_v44 = vadd.f32 %v4040_v38, %v1594_v36  ;;  %v4198_v23 = vld [vmem:[#allocation2 + $0x6f] sm:$0xff] }
 0x18f   : > { %1175 = vst [vmem:[#allocation2 + $0x78] sm:$0xff] %v4182_v27  ;;  %v1239_v1 = vmul.f32 %v3780_v4, %v4024_v13  ;;  %v1892_v47 = vmul.f32 %v3807_v9, %v4026_v7  ;;  %v1927_v17 = vmul.f32 %v3802_v10, %v4117_v31  ;;  %v1826_v53 = vadd.f32 %v4086_v18, %v1595_v19  ;;  %v4207_v14 = vld [vmem:[#allocation2 + $0x69] sm:$0xff] }
 0x190   : > { %v1765_v38 = vmul.f32 %v3734_v55, %v4182_v27  ;;  %v1340_v52 = vmul.f32 %v3796_v48, %v4184_v41  ;;  %v2280_v46 = vadd.f32 %v2248_v0, %v1825_v44  ;;  %v2344_v61 = vmax.f32 %v2312_v56, 0.0  ;;  %v4215_v36 = vld [vmem:[#allocation2 + $0xf0] sm:$0xff] }
 0x191   : > { %v2281_v60 = vadd.f32 %v2249_v63, %v1826_v53  ;;  %v2345_v13 = vmax.f32 %v2313_v59, 0.0  ;;  %v1326_v24 = vadd.f32 %v1294_v6, %v1259_v43  ;;  %v1361_v7 = vmul.f32 %v3796_v48, %v3973_v58  ;;  %v5151_v43 = vld [vmem:[#allocation53_spill] sm:$0xff] }
 0x192   : > { %v1077_v42 = vpop.f32.mrf.mxu1  ;;  %v4218_v18 = vadd.f32 %v1765_v38, %v4123_v40  ;;  %v1305_v12 = vadd.f32 %v1273_v50, %v1238_v22  ;;  %v1306_v16 = vadd.f32 %v1274_v25, %v1239_v1  ;;  %v1341_v19 = vmul.f32 %v3796_v48, %v4198_v23 }
 0x193   : > { %v1078_v62 = vadd.f32 %v3697_v33, %v1077_v42  ;;  %v1994_v5 = vmul.f32 %v3829_v29, %v4207_v14  ;;  %v2317_v15 = vadd.f32 %v4045_v32, %v2281_v60  ;;  %v4226_v0 = vpack.c.bf16 %v2345_v13, %v2344_v61  ;;  %v4250_v42 = vld [vmem:[#allocation2 + $0xf1] sm:$0xff] }
 0x194   : > { %v1959_v58 = vadd.f32 %v1927_v17, %v1892_v47  ;;  %v2316_v56 = vadd.f32 %v4045_v32, %v2280_v46  ;;  %v1682_v40 = vmul.f32 %v3726_v28, %v4215_v36  ;;  %v1717_v21 = vmul.f32 %v3729_v8, %v5151_v43  ;;  %v5152_v17 = vld [vmem:[#allocation56_spill] sm:$0xff]  ;;  %v5153_v46 = vld [vmem:[#allocation21_spill] sm:$0xff] }
 0x195   : > { %v4233_v63 = vmax.f32 %v1078_v62, 0.0  ;;  %v1372_v59 = vadd.f32 %v1340_v52, %v1305_v12  ;;  %v1928_v34 = vmul.f32 %v3802_v10, %v4151_v54  ;;  %v1393_v6 = vadd.f32 %v1361_v7, %v1326_v24  ;;  %v5154_v24 = vld [vmem:[#allocation10_spill] sm:$0xff] }
 0x196   : > { %v4237_v22 = vld [vmem:[#allocation2 + $0x71] sm:$0xff]  ;;  %v1373_v50 = vadd.f32 %v1341_v19, %v1306_v16  ;;  %v2349_v25 = vmax.f32 %v2317_v15, 0.0  ;;  %v1893_v44 = vmul.f32 %v3807_v9, %v4067_v30  ;;  %v2026_v1 = vadd.f32 %v1994_v5, %v1959_v58  ;;  %v5155_v19 = vld [vmem:[#allocation26_spill] sm:$0xff] }
 0x197   : > { %1176 = vst [vmem:[#allocation2 + $0x80] sm:$0xff] %v4233_v63  ;;  %v1749_v47 = vadd.f32 %v1717_v21, %v1682_v40  ;;  %v1784_v53 = vmul.f32 %v3734_v55, %v5152_v17  ;;  %v2348_v38 = vmax.f32 %v2316_v56, 0.0  ;;  %v4244_v52 = vld [vmem:[#allocation2 + $0x77] sm:$0xff]  ;;  %v1596_v61 = vmul.f32 %v5153_v46, %v1372_v59  ;;  %v5156_v56 = vld [vmem:[#allocation29_spill] sm:$0xff] }
 0x198   : > { %v1960_v60 = vadd.f32 %v1928_v34, %v1893_v44  ;;  %v1995_v13 = vmul.f32 %v3829_v29, %v4237_v22  ;;  %v1617_v7 = vmul.f32 %v5154_v24, %v1393_v6  ;;  %v1240_v30 = vmul.f32 %v3780_v4, %v4107_v20  ;;  %v5157_v34 = vld [vmem:[#allocation62_spill] sm:$0xff] }
 0x199   : > { %v1275_v16 = vmul.f32 %v3789_v57, %v4184_v41  ;;  %v1597_v62 = vmul.f32 %v5155_v19, %v1373_v50  ;;  %v4257_v5 = vpack.c.bf16 %v2349_v25, %v2348_v38  ;;  %v2250_v40 = vmul.f32 %v5156_v56, %v2026_v1  ;;  %v5158_v25 = vld [vmem:[#allocation28_spill] sm:$0xff] }
 0x19a   : > { %v1080_v12 = vpop.f32.mrf.mxu1  ;;  %v2027_v58 = vadd.f32 %v1995_v13, %v1960_v60  ;;  %v1816_v43 = vadd.f32 %v1784_v53, %v1749_v47  ;;  %v1342_v21 = vmul.f32 %v3796_v48, %v4244_v52  ;;  %v1929_v59 = vmul.f32 %v3802_v10, %v4207_v14 }
 0x19b   : > { %v1081_v15 = vadd.f32 %v3697_v33, %v1080_v12  ;;  %v1913_v20 = vmul.f32 %v3807_v9, %v4250_v42  ;;  %v1948_v6 = vmul.f32 %v3802_v10, %v5157_v34  ;;  %v1827_v33 = vadd.f32 %v4129_v49, %v1596_v61 }
 0x19c   : > { %v2251_v44 = vmul.f32 %v5158_v25, %v2027_v58  ;;  %v1848_v1 = vadd.f32 %v1816_v43, %v1617_v7  ;;  %v1276_v53 = vmul.f32 %v3789_v57, %v4198_v23  ;;  %v1307_v38 = vadd.f32 %v1275_v16, %v1240_v30 }
 0x19d   : > { %v4269_v50 = vmax.f32 %v1081_v15, 0.0  ;;  %v1894_v46 = vmul.f32 %v3807_v9, %v4117_v31  ;;  %v1241_v60 = vmul.f32 %v3780_v4, %v4115_v51  ;;  %v1828_v49 = vadd.f32 %v4169_v2, %v1597_v62  ;;  %v4294_v51 = vld [vmem:[%s5047_s6] ss:$0 sm:$0xff] }
 0x19e   : > { %v4273_v47 = vld [vmem:[#allocation2 + $0x7f] sm:$0xff]  ;;  %v2282_v61 = vadd.f32 %v2250_v40, %v1827_v33  ;;  %v1980_v13 = vadd.f32 %v1948_v6, %v1913_v20  ;;  %v1374_v7 = vadd.f32 %v1342_v21, %v1307_v38  ;;  %v2015_v31 = vmul.f32 %v3829_v29, %v3987_v39 }
 0x19f   : > { %v4275_v17 = vld [vmem:[#allocation2 + $0x79] sm:$0xff]  ;;  %1177 = vst [vmem:[#allocation2 + $0x88] sm:$0xff] %v4269_v50  ;;  %v1343_v24 = vmul.f32 %v3796_v48, %v4273_v47  ;;  %v1961_v12 = vadd.f32 %v1929_v59, %v1894_v46  ;;  %v2283_v16 = vadd.f32 %v2251_v44, %v1828_v49  ;;  %v1308_v15 = vadd.f32 %v1276_v53, %v1241_v60  ;;  %v5160_v44 = vld [vmem:[#allocation19_spill] sm:$0xff] }
 0x1a0   : > { %v1996_v30 = vmul.f32 %v3829_v29, %v4275_v17  ;;  %v2318_v62 = vadd.f32 %v4045_v32, %v2282_v61  ;;  %v2047_v40 = vadd.f32 %v2015_v31, %v1980_v13  ;;  %v5159_v21 = vld [vmem:[#allocation17_spill] sm:$0xff]  ;;  %v1930_v39 = vmul.f32 %v3802_v10, %v4237_v22  ;;  %v5161_v46 = vld [vmem:[#allocation12_spill] sm:$0xff] }
 0x1a1   : > { %v2319_v56 = vadd.f32 %v4045_v32, %v2283_v16  ;;  %v1375_v43 = vadd.f32 %v1343_v24, %v1308_v15  ;;  %v1598_v59 = vmul.f32 %v5159_v21, %v1374_v7  ;;  %v1766_v33 = vmul.f32 %v3734_v55, %v4233_v63  ;;  %v5162_v49 = vld [vmem:[#allocation16_spill] sm:$0xff] }
 0x1a2   : > { %v1082_v19 = vpop.f32.mrf.mxu1  ;;  %v2028_v58 = vadd.f32 %v1996_v30, %v1961_v12  ;;  %v1895_v25 = vmul.f32 %v3807_v9, %v4151_v54  ;;  %v2350_v38 = vmax.f32 %v2318_v62, 0.0  ;;  %v2271_v60 = vmul.f32 %v5161_v46, %v2047_v40 }
 0x1a3   : > { %v1083_v2 = vadd.f32 %v4294_v51, %v1082_v19  ;;  %v2351_v34 = vmax.f32 %v2319_v56, 0.0  ;;  %v1599_v61 = vmul.f32 %v5162_v49, %v1375_v43  ;;  %v1829_v13 = vadd.f32 %v4218_v18, %v1598_v59  ;;  %v5163_v43 = vld [vmem:[#allocation18_spill] sm:$0xff] }
 0x1a4   : > { %v2252_v53 = vmul.f32 %v5160_v44, %v2028_v58  ;;  %v1962_v24 = vadd.f32 %v1930_v39, %v1895_v25  ;;  %v1277_v16 = vmul.f32 %v3789_v57, %v4244_v52  ;;  %v1798_v31 = vadd.f32 %v1766_v33, %v4161_v45 }
 0x1a5   : > { %v4302_v20 = vmax.f32 %v1083_v2, 0.0  ;;  %v4319_v30 = vpack.c.bf16 %v2351_v34, %v2350_v38  ;;  %v1931_v18 = vmul.f32 %v3802_v10, %v4275_v17  ;;  %v4327_v2 = vadd.f32 %v2271_v60, %v1848_v1 }
 0x1a6   : > { %v4304_v6 = vld [vmem:[#allocation2 + $0x81] sm:$0xff]  ;;  %v2284_v15 = vadd.f32 %v2252_v53, %v1829_v13  ;;  %v1242_v62 = vmul.f32 %v3780_v4, %v4184_v41  ;;  %v1830_v40 = vadd.f32 %v1798_v31, %v1599_v61  ;;  %v1896_v45 = vmul.f32 %v3807_v9, %v4207_v14 }
 0x1a7   : > { %1178 = vst [vmem:[#allocation2 + $0x90] sm:$0xff] %v4302_v20  ;;  %v1997_v7 = vmul.f32 %v3829_v29, %v4304_v6  ;;  %v4317_v12 = vld [vmem:[#allocation2 + $0x87] sm:$0xff]  ;;  %v1278_v1 = vmul.f32 %v3789_v57, %v4273_v47  ;;  %v1243_v44 = vmul.f32 %v3780_v4, %v4198_v23  ;;  %v1700_v53 = vmul.f32 %v3729_v8, %v4182_v27 }
 0x1a8   : > { %v1344_v56 = vmul.f32 %v3796_v48, %v4317_v12  ;;  %v1309_v33 = vadd.f32 %v1277_v16, %v1242_v62  ;;  %v2320_v25 = vadd.f32 %v4045_v32, %v2284_v15  ;;  %v1963_v14 = vadd.f32 %v1931_v18, %v1896_v45  ;;  %v5164_v18 = vld [vmem:[#allocation8_spill] sm:$0xff] }
 0x1a9   : > { %v2029_v19 = vadd.f32 %v1997_v7, %v1962_v24  ;;  %v1665_v61 = vmul.f32 %v3726_v28, %v4094_v11  ;;  %v1767_v13 = vmul.f32 %v3734_v55, %v4269_v50  ;;  %v1310_v24 = vadd.f32 %v1278_v1, %v1243_v44 }
 0x1aa   : > { %v1085_v54 = vpop.f32.mrf.mxu1  ;;  %v1376_v46 = vadd.f32 %v1344_v56, %v1309_v33  ;;  %v1932_v11 = vmul.f32 %v3802_v10, %v4304_v6  ;;  %v1768_v45 = vmul.f32 %v3734_v55, %v4302_v20  ;;  %v1897_v33 = vmul.f32 %v3807_v9, %v4237_v22 }
 0x1ab   : > { %v1086_v58 = vadd.f32 %v4294_v51, %v1085_v54  ;;  %v2253_v21 = vmul.f32 %v5163_v43, %v2029_v19  ;;  %v2352_v54 = vmax.f32 %v2320_v25, 0.0  ;;  %v1701_v19 = vmul.f32 %v3729_v8, %v4233_v63 }
 0x1ac   : > { %v1732_v15 = vadd.f32 %v1700_v53, %v1665_v61  ;;  %v1600_v62 = vmul.f32 %v5164_v18, %v1376_v46  ;;  %v1666_v43 = vmul.f32 %v3726_v28, %v4144_v3  ;;  %v1964_v3 = vadd.f32 %v1932_v11, %v1897_v33 }
 0x1ad   : > { %v4334_v59 = vmax.f32 %v1086_v58, 0.0  ;;  %v2285_v41 = vadd.f32 %v2253_v21, %v1830_v40  ;;  %v1702_v11 = vmul.f32 %v3729_v8, %v4269_v50 }
 0x1ae   : > { %v4338_v39 = vld [vmem:[#allocation2 + $0x8f] sm:$0xff]  ;;  %v1799_v1 = vadd.f32 %v1767_v13, %v1732_v15  ;;  %v1733_v44 = vadd.f32 %v1701_v19, %v1666_v43 }
 0x1af   : > { %v4340_v34 = vld [vmem:[#allocation2 + $0x89] sm:$0xff]  ;;  %1179 = vst [vmem:[#allocation2 + $0x98] sm:$0xff] %v4334_v59  ;;  %v1345_v38 = vmul.f32 %v3796_v48, %v4338_v39  ;;  %v2321_v49 = vadd.f32 %v4045_v32, %v2285_v41  ;;  %v5165_v41 = vld [vmem:[#allocation9_spill] sm:$0xff]  ;;  %v1280_v18 = vmul.f32 %v3789_v57, %v4338_v39 }
 0x1b0   : > { %v1998_v60 = vmul.f32 %v3829_v29, %v4340_v34  ;;  %v1831_v46 = vadd.f32 %v1799_v1, %v1600_v62  ;;  %v1800_v13 = vadd.f32 %v1768_v45, %v1733_v44  ;;  %v5167_v19 = vld [vmem:[#allocation14_spill] sm:$0xff]  ;;  %v1898_v45 = vmul.f32 %v3807_v9, %v4275_v17 }
 0x1b1   : > { %v2353_v16 = vmax.f32 %v2321_v49, 0.0  ;;  %v1377_v58 = vadd.f32 %v1345_v38, %v1310_v24  ;;  %v1279_v49 = vmul.f32 %v3789_v57, %v4317_v12 }
 0x1b2   : > { %v1087_v23 = vpop.f32.mrf.mxu1  ;;  %v2030_v7 = vadd.f32 %v1998_v60, %v1963_v14  ;;  %v5166_v14 = vld [vmem:[#allocation7_spill] sm:$0xff] }
 0x1b3   : > { %v1088_v31 = vadd.f32 %v4294_v51, %v1087_v23  ;;  %v4365_v56 = vpack.c.bf16 %v2353_v16, %v2352_v54  ;;  %v1601_v38 = vmul.f32 %v5166_v14, %v1377_v58  ;;  %v1933_v16 = vmul.f32 %v3802_v10, %v4340_v34 }
 0x1b4   : > { %v2254_v25 = vmul.f32 %v5165_v41, %v2030_v7  ;;  %v1244_v7 = vmul.f32 %v3780_v4, %v4244_v52  ;;  %v1245_v41 = vmul.f32 %v3780_v4, %v4273_v47  ;;  %v1667_v14 = vmul.f32 %v3726_v28, %v4182_v27 }
 0x1b5   : > { %v4367_v40 = vmax.f32 %v1088_v31, 0.0  ;;  %v1832_v31 = vadd.f32 %v1800_v13, %v1601_v38  ;;  %v1965_v38 = vadd.f32 %v1933_v16, %v1898_v45  ;;  %v1703_v47 = vmul.f32 %v3729_v8, %v4302_v20 }
 0x1b6   : > { %v4371_v21 = vld [vmem:[#allocation2 + $0x91] sm:$0xff]  ;;  %v2286_v23 = vadd.f32 %v2254_v25, %v1831_v46  ;;  %v1311_v62 = vadd.f32 %v1279_v49, %v1244_v7  ;;  %v1769_v49 = vmul.f32 %v3734_v55, %v4334_v59  ;;  %v1668_v16 = vmul.f32 %v3726_v28, %v4233_v63 }
 0x1b7   : > { %1180 = vst [vmem:[#allocation2 + $0xa0] sm:$0xff] %v4367_v40  ;;  %v4379_v53 = vld [vmem:[#allocation2 + $0x97] sm:$0xff]  ;;  %v1999_v60 = vmul.f32 %v3829_v29, %v4371_v21  ;;  %v1704_v45 = vmul.f32 %v3729_v8, %v4334_v59 }
 0x1b8   : > { %v1346_v54 = vmul.f32 %v3796_v48, %v4379_v53  ;;  %v2322_v33 = vadd.f32 %v4045_v32, %v2286_v23  ;;  %v5168_v7 = vld [vmem:[#allocation3_spill] sm:$0xff] }
 0x1b9   : > { %v2031_v22 = vadd.f32 %v1999_v60, %v1964_v3  ;;  %v1312_v3 = vadd.f32 %v1280_v18, %v1245_v41  ;;  %v1734_v60 = vadd.f32 %v1702_v11, %v1667_v14  ;;  %v5170_v41 = vld [vmem:[#allocation4_spill] sm:$0xff] }
 0x1ba   : > { %v1090_v61 = vpop.f32.mrf.mxu1  ;;  %v1378_v44 = vadd.f32 %v1346_v54, %v1311_v62  ;;  %v5169_v62 = vld [vmem:[#allocation5_spill] sm:$0xff] }
 0x1bb   : > { %v1091_v24 = vadd.f32 %v4294_v51, %v1090_v61  ;;  %v2255_v15 = vmul.f32 %v5167_v19, %v2031_v22  ;;  %v2354_v22 = vmax.f32 %v2322_v33, 0.0  ;;  %v1801_v18 = vadd.f32 %v1769_v49, %v1734_v60 }
 0x1bc   : > { %v1602_v54 = vmul.f32 %v5168_v7, %v1378_v44  ;;  %v1281_v7 = vmul.f32 %v3789_v57, %v4379_v53 }
 0x1bd   : > { %v1143_v58 = vmax.f32 %v1091_v24, 0.0  ;;  %v2287_v1 = vadd.f32 %v2255_v15, %v1832_v31  ;;  %v1899_v31 = vmul.f32 %v3807_v9, %v4304_v6  ;;  %v4437_v6 = vld [vmem:[%s5048_s7 + $0x8] ss:$0 sm:$0xff] }
 0x1be   : > { %v4398_v43 = vld [vmem:[#allocation2 + $0x9f] sm:$0xff] }
 0x1bf   : > { %v4400_v52 = vld [vmem:[#allocation2 + $0x99] sm:$0xff]  ;;  %1181 = vst [vmem:[#allocation2 + $0xa8] sm:$0xff] %v1143_v58  ;;  %v1347_v25 = vmul.f32 %v3796_v48, %v4398_v43  ;;  %v2323_v17 = vadd.f32 %v4045_v32, %v2287_v1  ;;  %v1770_v58 = vmul.f32 %v3734_v55, %v4367_v40  ;;  %v1735_v1 = vadd.f32 %v1703_v47, %v1668_v16 }
 0x1c0   : > { %v2000_v46 = vmul.f32 %v3829_v29, %v4400_v52  ;;  %v1934_v29 = vmul.f32 %v3802_v10, %v4371_v21  ;;  %v1246_v16 = vmul.f32 %v3780_v4, %v4317_v12  ;;  %v1648_v12 = vld [vmem:[#allocation2 + $0xe8] sm:$0xff] }
 0x1c1   : > { %v2355_v23 = vmax.f32 %v2323_v17, 0.0  ;;  %v1379_v24 = vadd.f32 %v1347_v25, %v1312_v3  ;;  %v1833_v25 = vadd.f32 %v1801_v18, %v1602_v54 }
 0x1c2   : > { %v1092_v61 = vpop.f32.mrf.mxu1  ;;  %v2032_v13 = vadd.f32 %v2000_v46, %v1965_v38  ;;  %v1966_v44 = vadd.f32 %v1934_v29, %v1899_v31  ;;  %v1669_v38 = vmul.f32 %v3726_v28, %v4269_v50  ;;  %v1802_v46 = vadd.f32 %v1770_v58, %v1735_v1  ;;  %v4453_v29 = vld [vmem:[#allocation2 + $0xe9] sm:$0xff] }
 0x1c3   : > { %v1093_v27 = vadd.f32 %v4294_v51, %v1092_v61  ;;  %v2388_v19 = vpack.c.bf16 %v2355_v23, %v2354_v22  ;;  %v1603_v63 = vmul.f32 %v5170_v41, %v1379_v24  ;;  %v1705_v50 = vmul.f32 %v3729_v8, %v4367_v40 }
 0x1c4   : > { %v2256_v11 = vmul.f32 %v5169_v62, %v2032_v13  ;;  %v4443_v49 = vadd.f32 %v1704_v45, %v1669_v38  ;;  %v5171_v13 = vld [vmem:[#allocation6_spill] sm:$0xff]  ;;  %v1670_v31 = vmul.f32 %v3726_v28, %v4302_v20  ;;  %v1313_v62 = vadd.f32 %v1281_v7, %v1246_v16 }
 0x1c5   : > { %v1144_v15 = vmax.f32 %v1093_v27, 0.0  ;;  %v1834_v47 = vadd.f32 %v1802_v46, %v1603_v63  ;;  %v1912_v41 = vmul.f32 %v3807_v9, %v4453_v29  ;;  %v5172_v63 = vld [vmem:[#allocation59_spill] sm:$0xff]  ;;  %v1282_v46 = vmul.f32 %v3789_v57, %v4398_v43 }
 0x1c6   : > { %v4431_v33 = vld [vmem:[#allocation2 + $0xa1] sm:$0xff]  ;;  %v2288_v3 = vadd.f32 %v2256_v11, %v1833_v25  ;;  %v4459_v11 = vadd.f32 %v1705_v50, %v1670_v31  ;;  %v1947_v25 = vmul.f32 %v3802_v10, %v5172_v63  ;;  %v4515_v63 = vmul.f32 %v3807_v9, %v4400_v52 }
 0x1c7   : > { %1182 = vst [vmem:[#allocation2 + $0xb0] sm:$0xff] %v1144_v15  ;;  %v2001_v14 = vmul.f32 %v4437_v6, %v4431_v33  ;;  %v1217_v7 = vld [vmem:[#allocation2 + $0xa7] sm:$0xff] }
 0x1c8   : > { %v2324_v24 = vadd.f32 %v4045_v32, %v2288_v3  ;;  %v1979_v20 = vadd.f32 %v1947_v25, %v1912_v41  ;;  %v1681_v3 = vmul.f32 %v3726_v28, %v1648_v12  ;;  %v1640_v50 = vld [vmem:[#allocation2 + $0xa8] sm:$0xff]  ;;  %v4519_v25 = vmul.f32 %v3807_v9, %v4431_v33 }
 0x1c9   : > { %v2033_v17 = vadd.f32 %v2001_v14, %v1966_v44  ;;  %v5173_v14 = vld [vmem:[#allocation64_spill] sm:$0xff]  ;;  %v1771_v41 = vmul.f32 %v3734_v55, %v1640_v50 }
 0x1ca   : > { %v1095_v60 = vpop.f32.mrf.mxu1  ;;  %v2356_v15 = vmax.f32 %v2324_v24, 0.0  ;;  %v2014_v38 = vmul.f32 %v4437_v6, %v5173_v14 }
 0x1cb   : > { %v1096_v61 = vadd.f32 %v4294_v51, %v1095_v60  ;;  %v2257_v22 = vmul.f32 %v5171_v13, %v2033_v17  ;;  %v1935_v17 = vmul.f32 %v3802_v10, %v4400_v52  ;;  %v4473_v60 = vld [vmem:[#allocation2 + $0xf8] sm:$0xff] }
 0x1cd   : > { %v1145_v23 = vmax.f32 %v1096_v61, 0.0  ;;  %v2289_v27 = vadd.f32 %v2257_v22, %v1834_v47  ;;  %v1716_v61 = vmul.f32 %v4473_v60, %v3729_v8  ;;  %v1247_v47 = vmul.f32 %v3780_v4, %v4338_v39 }
 0x1ce   : > { %v2046_v22 = vadd.f32 %v2014_v38, %v1979_v20  ;;  %v1936_v39 = vmul.f32 %v3802_v10, %v4431_v33  ;;  %v4537_v33 = vmul.f32 %v3729_v8, %v1648_v12 }
 0x1cf   : > { %1183 = vst [vmem:[#allocation2 + $0xb8] sm:$0xff] %v1145_v23  ;;  %v2325_v54 = vadd.f32 %v4045_v32, %v2289_v27  ;;  %v4481_v23 = vadd.f32 %v4045_v32, %v4327_v2  ;;  %v1900_v27 = vmul.f32 %v3807_v9, %v4340_v34  ;;  %v4486_v24 = vadd.f32 %v1282_v46, %v1247_v47  ;;  %v3212_v2 = vld [vmem:[#allocation2 + $0x108] sm:$0xff]  ;;  %v5176_v47 = vld [vmem:[#allocation60_spill] sm:$0xff] }
 0x1d0   : > { %v1748_v32 = vadd.f32 %v1716_v61, %v1681_v3  ;;  %v1783_v31 = vmul.f32 %v3212_v2, %v3734_v55  ;;  %v1248_v34 = vmul.f32 %v3780_v4, %v4379_v53  ;;  %v1901_v53 = vmul.f32 %v3807_v9, %v4371_v21  ;;  %v1641_v3 = vld [vmem:[#allocation2 + $0xb0] sm:$0xff]  ;;  %v1516_v2 = vpop.permute.xlu2 %1515 }
 0x1d1   : > { %v2357_v58 = vmax.f32 %v2325_v54, 0.0  ;;  %5174 = vst [vmem:[#allocation41_spill] sm:$0xff] %v4481_v23  ;;  %v4489_v54 = vadd.f32 %v1935_v17, %v1900_v27  ;;  %v4529_v21 = vmul.f32 %v3789_v57, %v4166_v37  ;;  %v4545_v46 = vmul.f32 %v3802_v10, %v4453_v29 }
 0x1d2   : > { %v1097_v18 = vpop.f32.mrf.mxu1  ;;  %v4525_v20 = vadd.f32 %v1783_v31, %v1748_v32  ;;  %v4531_v14 = vadd.f32 %v1936_v39, %v1901_v53  ;;  %v1283_v61 = vmul.f32 %v3789_v57, %v1217_v7  ;;  %v4554_v27 = vmul.f32 %v3802_v10, %v4250_v42 }
 0x1d3   : > { %v1098_v45 = vadd.f32 %v4294_v51, %v1097_v18  ;;  %v2389_v1 = vpack.c.bf16 %v2357_v58, %v2356_v15  ;;  %v1671_v15 = vmul.f32 %v3726_v28, %v4334_v59  ;;  %v1249_v59 = vmul.f32 %v3780_v4, %v4398_v43 }
 0x1d4   : > { %v4561_v39 = vmul.f32 %v3734_v55, %v1648_v12  ;;  %v1706_v32 = vmul.f32 %v3729_v8, %v1640_v50  ;;  %v1250_v12 = vmul.f32 %v3780_v4, %v1217_v7  ;;  %v1707_v53 = vmul.f32 %v3729_v8, %v1641_v3 }
 0x1d5   : > { %v1146_v44 = vmax.f32 %v1098_v45, 0.0  ;;  %2438 = vmatpush.bf16.msra.mxu2 %v2389_v1  ;;  %v1672_v45 = vmul.f32 %v3726_v28, %v4367_v40  ;;  %v1348_v1 = vmul.f32 %v3796_v48, %v1217_v7  ;;  %v3213_v40 = vld [vmem:[#allocation2 + $0xf7] sm:$0xff]  ;;  %v4593_v7 = vmul.f32 %v4473_v60, %v3734_v55 }
 0x1d6   : > { %v4534_v38 = vmul.f32 %v3213_v40, %v3796_v48 }
 0x1d7   : > { %1184 = vst [vmem:[#allocation2 + $0xc0] sm:$0xff] %v1146_v44  ;;  %v4523_v44 = vmul.f32 %v3213_v40, %v3789_v57  ;;  %v1380_v43 = vadd.f32 %v1348_v1, %v1313_v62  ;;  %v1218_v62 = vld [vmem:[#allocation2 + $0xaf] sm:$0xff]  ;;  %v1315_v40 = vadd.f32 %v1283_v61, %v1248_v34  ;;  %v1219_v34 = vld [vmem:[#allocation2 + $0xb7] sm:$0xff] }
 0x1d8   : > { %v1642_v61 = vld [vmem:[#allocation2 + $0xb8] sm:$0xff] }
 0x1d9   : > { %2439 = vmatpush.bf16.msra.mxu2 %v2388_v19 }
 0x1da   : > { %v1100_v13 = vpop.f32.mrf.mxu1 }
 0x1db   : > { %v1101_v19 = vadd.f32 %v4294_v51, %v1100_v13  ;;  %v1604_v13 = vmul.f32 %v5176_v47, %v1380_v43  ;;  %v1772_v43 = vmul.f32 %v3734_v55, %v1641_v3 }
 0x1dd   : > { %2440 = vmatpush.bf16.msra.mxu2 %v4365_v56  ;;  %v4493_v16 = vmax.f32 %v1101_v19, 0.0  ;;  %v5175_v56 = vld [vmem:[#allocation13_spill] sm:$0xff]  ;;  %v4558_v19 = vmul.f32 %v3796_v48, %v4166_v37  ;;  %v4578_v37 = vmul.f32 %v4437_v6, %v4250_v42 }
 0x1de   : > { %v4501_v58 = vmul.f32 %v5175_v56, %v2046_v22  ;;  %v1803_v22 = vadd.f32 %v1771_v41, %v4443_v49  ;;  %v4568_v49 = vmul.f32 %v3734_v55, %v4215_v36  ;;  %v1871_v56 = vld [vmem:[#allocation2 + $0xa9] sm:$0xff]  ;;  %v1284_v41 = vmul.f32 %v3789_v57, %v1218_v62 }
 0x1df   : > { %1185 = vst [vmem:[#allocation2 + $0xc8] sm:$0xff] %v4493_v16  ;;  %v2002_v47 = vmul.f32 %v4437_v6, %v1871_v56  ;;  %v4607_v60 = vmul.f32 %v3807_v9, %v1871_v56 }
 0x1e0   : > { %v4574_v1 = vadd.f32 %v1803_v22, %v1604_v13  ;;  %v3215_v13 = vld [vmem:[#allocation2 + $0x100] sm:$0xff]  ;;  %v4600_v22 = vmul.f32 %v3780_v4, %v1218_v62 }
 0x1e1   : > { %2441 = vmatpush.bf16.msra.mxu2 %v4319_v30  ;;  %v4541_v30 = vmul.f32 %v3729_v8, %v4215_v36  ;;  %v1673_v36 = vmul.f32 %v3726_v28, %v1640_v50  ;;  %v4597_v50 = vmul.f32 %v3215_v13, %v3734_v55  ;;  %5178 = vst [vmem:[#allocation43_spill] sm:$0xff] %v4607_v60 }
 0x1e2   : > { %v1102_v52 = vpop.f32.mrf.mxu1  ;;  %5177 = vst [vmem:[#allocation40_spill] sm:$0xff] %v4574_v1  ;;  %v1937_v13 = vmul.f32 %v3802_v10, %v1871_v56  ;;  %v2034_v56 = vadd.f32 %v2002_v47, %v4489_v54  ;;  %v1675_v47 = vmul.f32 %v3726_v28, %v1642_v61 }
 0x1e3   : > { %v1103_v17 = vadd.f32 %v4294_v51, %v1102_v52  ;;  %v3214_v52 = vld [vmem:[#allocation2 + $0x107] sm:$0xff] }
 0x1e4   : > { %v4589_v42 = vmul.f32 %v3214_v52, %v3796_v48  ;;  %v4639_v54 = vadd.f32 %v1937_v13, %v4515_v63 }
 0x1e5   : > { %2442 = vmatpush.bf16.msra.mxu2 %v4257_v5  ;;  %v4564_v31 = vmax.f32 %v1103_v17, 0.0  ;;  %v4572_v5 = vmul.f32 %v4437_v6, %v4453_v29  ;;  %v1349_v29 = vmul.f32 %v3796_v48, %v1218_v62  ;;  %v1738_v17 = vadd.f32 %v1706_v32, %v1671_v15 }
 0x1e6   : > { %v4609_v15 = vadd.f32 %v1284_v41, %v1249_v59  ;;  %v4611_v32 = vadd.f32 %v1707_v53, %v1672_v45  ;;  %v1350_v62 = vmul.f32 %v3796_v48, %v1219_v34  ;;  %v1285_v59 = vmul.f32 %v3789_v57, %v1219_v34  ;;  %v1872_v41 = vld [vmem:[#allocation2 + $0xb1] sm:$0xff]  ;;  %5182 = vst [vmem:[#allocation52_spill] sm:$0xff] %v4639_v54  ;;  %v4662_v54 = vld [vmem:[#allocation2 + $0xb9] sm:$0xff] }
 0x1e7   : > { %1186 = vst [vmem:[#allocation2 + $0xd0] sm:$0xff] %v4564_v31  ;;  %v1381_v52 = vadd.f32 %v1349_v29, %v4486_v24  ;;  %v3216_v24 = vld [vmem:[#allocation2 + $0xff] sm:$0xff]  ;;  %v1708_v45 = vmul.f32 %v3729_v8, %v1642_v61 }
 0x1e8   : > { %5179 = vst [vmem:[#allocation55_spill] sm:$0xff] %v4609_v15  ;;  %v4619_v29 = vmul.f32 %v3216_v24, %v3796_v48  ;;  %v4636_v24 = vmul.f32 %v3780_v4, %v1219_v34  ;;  %v4649_v34 = vadd.f32 %v1285_v59, %v1250_v12 }
 0x1e9   : > { %2443 = vmatpush.bf16.msra.mxu2 %v4172_v35  ;;  %v4603_v35 = vmul.f32 %v3726_v28, %v1641_v3  ;;  %5180 = vst [vmem:[#allocation63_spill] sm:$0xff] %v4611_v32  ;;  %v1605_v23 = vmul.f32 %v1516_v2, %v1381_v52  ;;  %v1804_v3 = vadd.f32 %v1772_v43, %v4459_v11  ;;  %v3218_v43 = vld [vmem:[#allocation2 + $0x101] sm:$0xff] }
 0x1ea   : > { %v1105_v18 = vpop.f32.mrf.mxu1  ;;  %v1773_v11 = vmul.f32 %v3734_v55, %v1642_v61  ;;  %v4633_v52 = vmul.f32 %v3218_v43, %v4437_v6  ;;  %v1382_v32 = vadd.f32 %v1350_v62, %v1315_v40  ;;  %5184 = vst [vmem:[#allocation57_spill] sm:$0xff] %v4649_v34  ;;  %v1740_v40 = vadd.f32 %v1708_v45, %v1673_v36  ;;  %v5185_v62 = vld [vmem:[#allocation48_spill] sm:$0xff] }
 0x1eb   : > { %v1106_v1 = vadd.f32 %v4294_v51, %v1105_v18  ;;  %v3217_v18 = vld [vmem:[#allocation2 + $0xf9] sm:$0xff]  ;;  %5190 = vst [vmem:[#allocation38_spill] sm:$0xff] %v4662_v54 }
 0x1ec   : > { %v4627_v2 = vmul.f32 %v3217_v18, %v4437_v6  ;;  %v4644_v18 = vmul.f32 %v3807_v9, %v1872_v41  ;;  %v4652_v63 = vmul.f32 %v5185_v62, %v1382_v32  ;;  %v4658_v43 = vld [vmem:[#allocation2 + $0xbf] sm:$0xff]  ;;  %v1677_v32 = vmul.f32 %v3726_v28, %v4493_v16 }
 0x1ed   : > { %2444 = vmatpush.bf16.msra.mxu2 %v4226_v0  ;;  %v4624_v53 = vmax.f32 %v1106_v1, 0.0  ;;  %v4630_v0 = vadd.f32 %v1804_v3, %v1605_v23  ;;  %v2165_v1 = vpop.permute.xlu2 %2164  ;;  %v1938_v23 = vmul.f32 %v3802_v10, %v1872_v41  ;;  %v2003_v3 = vmul.f32 %v4437_v6, %v1872_v41  ;;  %5188 = vst [vmem:[#allocation30_spill] sm:$0xff] %v4658_v43 }
 0x1ee   : > { %5183 = vst [vmem:[#allocation61_spill] sm:$0xff] %v4644_v18  ;;  %v4654_v13 = vmul.f32 %v2165_v1, %v2034_v56  ;;  %v4664_v41 = vadd.f32 %v1773_v11, %v1738_v17  ;;  %v1253_v59 = vmul.f32 %v3780_v4, %v4658_v43  ;;  %v1710_v17 = vmul.f32 %v3729_v8, %v4493_v16 }
 0x1ef   : > { %5181 = vst [vmem:[#allocation49_spill] sm:$0xff] %v4630_v0  ;;  %v1679_v61 = vmul.f32 %v3726_v28, %v4624_v53  ;;  %v4660_v0 = vld [vmem:[#allocation2 + $0xc0] sm:$0xff]  ;;  %v4670_v12 = vadd.f32 %v2003_v3, %v4531_v14  ;;  %v4684_v14 = vmul.f32 %v3807_v9, %v4662_v54  ;;  %v1286_v11 = vmul.f32 %v3789_v57, %v4658_v43 }
 0x1f0   : > { %1187 = vst [vmem:[#allocation2 + $0xd8] sm:$0xff] %v4624_v53  ;;  %v1676_v45 = vmul.f32 %v3726_v28, %v4660_v0  ;;  %v1742_v1 = vadd.f32 %v1710_v17, %v1675_v47  ;;  %v1775_v3 = vmul.f32 %v3734_v55, %v4493_v16  ;;  %v4694_v62 = vmul.f32 %v3802_v10, %v4662_v54  ;;  %v4703_v17 = vld [vmem:[#allocation2 + $0xc9] sm:$0xff] }
 0x1f1   : > { %2445 = vmatpush.bf16.msra.mxu2 %v4178_v26  ;;  %5186 = vst [vmem:[#allocation51_spill] sm:$0xff] %v4652_v63  ;;  %v4667_v26 = vadd.f32 %v1938_v23, %v4519_v25  ;;  %v1746_v25 = vadd.f32 %v4537_v33, %v1679_v61  ;;  %v1709_v23 = vmul.f32 %v3729_v8, %v4660_v0  ;;  %v1221_v61 = vld [vmem:[#allocation2 + $0xc7] sm:$0xff] }
 0x1f2   : > { %5187 = vst [vmem:[#allocation31_spill] sm:$0xff] %v4654_v13  ;;  %v1107_v36 = vpop.f32.mrf.mxu1  ;;  %v1678_v13 = vmul.f32 %v3726_v28, %v4564_v31  ;;  %v1712_v47 = vmul.f32 %v3729_v8, %v4624_v53  ;;  %v1254_v16 = vmul.f32 %v3780_v4, %v1221_v61 }
 0x1f3   : > { %5189 = vst [vmem:[#allocation33_spill] sm:$0xff] %v4660_v0  ;;  %v1108_v56 = vadd.f32 %v4294_v51, %v1107_v36  ;;  %v4697_v33 = vadd.f32 %v4593_v7, %v1746_v25  ;;  %v1222_v36 = vld [vmem:[#allocation2 + $0xcf] sm:$0xff]  ;;  %v4711_v7 = vmul.f32 %v3807_v9, %v4703_v17  ;;  %v4725_v18 = vadd.f32 %v1709_v23, %v4603_v35 }
 0x1f4   : > { %5191 = vst [vmem:[#allocation58_spill] sm:$0xff] %v4664_v41  ;;  %v1744_v0 = vadd.f32 %v1712_v47, %v1677_v32  ;;  %v1288_v32 = vmul.f32 %v3789_v57, %v1222_v36  ;;  %v1711_v35 = vmul.f32 %v3729_v8, %v4564_v31 }
 0x1f5   : > { %5192 = vst [vmem:[#allocation53_spill] sm:$0xff] %v4667_v26  ;;  %v1150_v51 = vmax.f32 %v1108_v56, 0.0  ;;  %v4714_v56 = vadd.f32 %v1286_v11, %v4600_v22 }
 0x1f6   : > { %5193 = vst [vmem:[#allocation56_spill] sm:$0xff] %v4670_v12  ;;  %v1255_v12 = vmul.f32 %v3780_v4, %v1222_v36  ;;  %v1811_v34 = vadd.f32 %v4561_v39, %v1744_v0 }
 0x1f7   : > { %5194 = vst [vmem:[#allocation21_spill] sm:$0xff] %v4694_v62  ;;  %v1223_v26 = vld [vmem:[#allocation2 + $0xd7] sm:$0xff]  ;;  %v1680_v15 = vmul.f32 %v3726_v28, %v1150_v51  ;;  %v1713_v63 = vmul.f32 %v3729_v8, %v1150_v51  ;;  %v4727_v62 = vadd.f32 %v1775_v3, %v1740_v40  ;;  %v1287_v28 = vmul.f32 %v3789_v57, %v1221_v61 }
 0x1f8   : > { %v4707_v54 = vld [vmem:[#allocation2 + $0xd1] sm:$0xff]  ;;  %5196 = vst [vmem:[#allocation26_spill] sm:$0xff] %v4714_v56  ;;  %v1256_v25 = vmul.f32 %v3780_v4, %v1223_v26  ;;  %v1289_v41 = vmul.f32 %v3789_v57, %v1223_v26  ;;  %v4731_v56 = vld [vmem:[#allocation2 + $0xc1] sm:$0xff]  ;;  %v1354_v47 = vmul.f32 %v3796_v48, %v1223_v26  ;;  %v1778_v39 = vmul.f32 %v3734_v55, %v1150_v51 }
 0x1f9   : > { %5195 = vst [vmem:[#allocation10_spill] sm:$0xff] %v4707_v54  ;;  %v4722_v43 = vmul.f32 %v3807_v9, %v4707_v54  ;;  %v1747_v22 = vadd.f32 %v4541_v30, %v1680_v15  ;;  %v1745_v60 = vadd.f32 %v1713_v63, %v1678_v13  ;;  %v1319_v30 = vadd.f32 %v1287_v28, %v4636_v24 }
 0x1fa   : > { %1188 = vst [vmem:[#allocation2 + $0xe0] sm:$0xff] %v1150_v51  ;;  %v1321_v11 = vadd.f32 %v1289_v41, %v1254_v16  ;;  %v1777_v15 = vmul.f32 %v3734_v55, %v4624_v53  ;;  %v1320_v63 = vadd.f32 %v1288_v32, %v1253_v59  ;;  %v1743_v13 = vadd.f32 %v1711_v35, %v1676_v45 }
 0x1fb   : > { %v1814_v40 = vadd.f32 %v4597_v50, %v1747_v22  ;;  %v1812_v23 = vadd.f32 %v4568_v49, %v1745_v60  ;;  %v4746_v0 = vmul.f32 %v3807_v9, %v4731_v56  ;;  %v1386_v41 = vadd.f32 %v1354_v47, %v1319_v30 }
 0x1fc   : > { %v1809_v26 = vadd.f32 %v1777_v15, %v1742_v1  ;;  %v1941_v8 = vmul.f32 %v3802_v10, %v4703_v17  ;;  %v4752_v49 = vmul.f32 %v3802_v10, %v4707_v54  ;;  %v4754_v24 = vadd.f32 %v1778_v39, %v1743_v13 }
 0x1fd   : > { %v4757_v59 = vmul.f32 %v3796_v48, %v1221_v61  ;;  %v4760_v45 = vmul.f32 %v3796_v48, %v1222_v36  ;;  %v4764_v1 = vmul.f32 %v3734_v55, %v4564_v31 }
 0x201   : > { %v1225_v50 = vld [vmem:[#allocation2 + $0xe7] sm:$0xff]  ;;  %v1224_v60 = vld [vmem:[#allocation2 + $0xdf] sm:$0xff] }
 0x202   : > { %v1877_v53 = vld [vmem:[#allocation2 + $0xd9] sm:$0xff]  ;;  %v1258_v3 = vmul.f32 %v3780_v4, %v1225_v50  ;;  %v1257_v51 = vmul.f32 %v3780_v4, %v1224_v60  ;;  %v1291_v16 = vmul.f32 %v3789_v57, %v1225_v50  ;;  %v1878_v22 = vld [vmem:[#allocation2 + $0xe1] sm:$0xff]  ;;  %v1290_v61 = vmul.f32 %v3789_v57, %v1224_v60 }
 0x203   : > { %v1910_v28 = vmul.f32 %v3807_v9, %v1877_v53  ;;  %v1911_v32 = vmul.f32 %v3807_v9, %v1878_v22  ;;  %v1356_v36 = vmul.f32 %v3796_v48, %v1225_v50  ;;  %v1943_v47 = vmul.f32 %v3802_v10, %v1877_v53 }
 0x204   : > { %v1325_v31 = vadd.f32 %v4523_v44, %v1258_v3  ;;  %v1323_v35 = vadd.f32 %v1291_v16, %v1256_v25  ;;  %v1324_v30 = vadd.f32 %v4529_v21, %v1257_v51  ;;  %v1322_v13 = vadd.f32 %v1290_v61, %v1255_v12  ;;  %v5197_v25 = vld [vmem:[#allocation25_spill] sm:$0xff]  ;;  %v5198_v12 = vld [vmem:[#allocation11_spill] sm:$0xff]  ;;  %v5200_v16 = vld [vmem:[#allocation20_spill] sm:$0xff] }
 0x205   : > { %v1977_v4 = vadd.f32 %v4545_v46, %v1910_v28  ;;  %v1978_v15 = vadd.f32 %v4554_v27, %v1911_v32  ;;  %v1388_v39 = vadd.f32 %v1356_v36, %v1321_v11  ;;  %v1944_v55 = vmul.f32 %v3802_v10, %v1878_v22  ;;  %v5199_v3 = vld [vmem:[#allocation15_spill] sm:$0xff]  ;;  %v5202_v32 = vld [vmem:[#allocation22_spill] sm:$0xff]  ;;  %v5203_v61 = vld [vmem:[#allocation24_spill] sm:$0xff] }
 0x206   : > { %v1392_v9 = vadd.f32 %v4589_v42, %v1325_v31  ;;  %v1390_v57 = vadd.f32 %v4534_v38, %v1323_v35  ;;  %v1391_v50 = vadd.f32 %v4619_v29, %v1324_v30  ;;  %v1389_v21 = vadd.f32 %v4558_v19, %v1322_v13  ;;  %v5201_v28 = vld [vmem:[#allocation23_spill] sm:$0xff] }
 0x207   : > { %v2044_v54 = vadd.f32 %v4627_v2, %v1977_v4  ;;  %v2045_v44 = vadd.f32 %v4633_v52, %v1978_v15  ;;  %v1612_v46 = vmul.f32 %v5197_v25, %v1388_v39  ;;  %v1975_v27 = vadd.f32 %v1943_v47, %v4711_v7 }
 0x208   : > { %v1616_v11 = vmul.f32 %v5198_v12, %v1392_v9  ;;  %v1614_v51 = vmul.f32 %v5199_v3, %v1390_v57  ;;  %v1615_v42 = vmul.f32 %v5200_v16, %v1391_v50  ;;  %v1613_v2 = vmul.f32 %v5203_v61, %v1389_v21  ;;  %v5205_v9 = vld [vmem:[#allocation27_spill] sm:$0xff]  ;;  %v5207_v50 = vld [vmem:[#allocation34_spill] sm:$0xff]  ;;  %v5208_v3 = vld [vmem:[#allocation41_spill] sm:$0xff] }
 0x209   : > { %v2268_v38 = vmul.f32 %v5201_v28, %v2044_v54  ;;  %v2269_v29 = vmul.f32 %v5202_v32, %v2045_v44  ;;  %v1843_v36 = vadd.f32 %v1811_v34, %v1612_v46  ;;  %v1976_v52 = vadd.f32 %v1944_v55, %v4722_v43  ;;  %v5204_v54 = vld [vmem:[#allocation35_spill] sm:$0xff]  ;;  %v5206_v43 = vld [vmem:[#allocation32_spill] sm:$0xff]  ;;  %v5211_v32 = vld [vmem:[#allocation37_spill] sm:$0xff] }
 0x20a   : > { %v1847_v19 = vadd.f32 %v4525_v20, %v1616_v11  ;;  %v1845_v31 = vadd.f32 %v4697_v33, %v1614_v51  ;;  %v1846_v7 = vadd.f32 %v1814_v40, %v1615_v42  ;;  %v2042_v47 = vadd.f32 %v4572_v5, %v1975_v27  ;;  %v4807_v5 = vld [vmem:[%s5049_s8] ss:$0 sm:$0xff]  ;;  %v5212_v61 = vld [vmem:[#allocation26_spill] sm:$0xff] }
 0x20b   : > { %v1844_v35 = vadd.f32 %v1812_v23, %v1613_v2  ;;  %v2043_v30 = vadd.f32 %v4578_v37, %v1976_v52  ;;  %v1355_v4 = vmul.f32 %v3796_v48, %v1224_v60  ;;  %v1610_v15 = vmul.f32 %v5204_v54, %v1386_v41 }
 0x20c   : > { %v2302_v13 = vadd.f32 %v4501_v58, %v1847_v19  ;;  %v2300_v39 = vadd.f32 %v2268_v38, %v1845_v31  ;;  %v2301_v34 = vadd.f32 %v2269_v29, %v1846_v7  ;;  %v2266_v55 = vmul.f32 %v5205_v9, %v2042_v47  ;;  %v5214_v19 = vld [vmem:[#allocation43_spill] sm:$0xff]  ;;  %v5215_v31 = vld [vmem:[#allocation21_spill] sm:$0xff]  ;;  %v5216_v47 = vld [vmem:[#allocation36_spill] sm:$0xff] }
 0x20d   : > { %v2267_v20 = vmul.f32 %v5206_v43, %v2043_v30  ;;  %v1387_v57 = vadd.f32 %v1355_v4, %v1320_v63  ;;  %v1841_v33 = vadd.f32 %v1809_v26, %v1610_v15  ;;  %v1973_v40 = vadd.f32 %v1941_v8, %v4684_v14  ;;  %v5217_v4 = vld [vmem:[#allocation42_spill] sm:$0xff]  ;;  %v5218_v15 = vld [vmem:[#allocation61_spill] sm:$0xff] }
 0x20e   : > { %v2338_v37 = vadd.f32 %v4807_v5, %v2302_v13  ;;  %v2336_v23 = vadd.f32 %v4807_v5, %v2300_v39  ;;  %v2337_v58 = vadd.f32 %v4807_v5, %v2301_v34  ;;  %v2298_v41 = vadd.f32 %v2266_v55, %v1843_v36  ;;  %v5220_v55 = vld [vmem:[#allocation30_spill] sm:$0xff] }
 0x20f   : > { %v2299_v60 = vadd.f32 %v2267_v20, %v1844_v35  ;;  %v1611_v44 = vmul.f32 %v5207_v50, %v1387_v57  ;;  %v1974_v63 = vadd.f32 %v4752_v49, %v4746_v0  ;;  %v2008_v14 = vmul.f32 %v4437_v6, %v1877_v53  ;;  %v5210_v0 = vld [vmem:[#allocation57_spill] sm:$0xff] }
 0x210   : > { %v2370_v26 = vmax.f32 %v2338_v37, 0.0  ;;  %v2368_v8 = vmax.f32 %v2336_v23, 0.0  ;;  %v2369_v21 = vmax.f32 %v2337_v58, 0.0  ;;  %v2334_v25 = vadd.f32 %v4807_v5, %v2298_v41  ;;  %v5223_v37 = vld [vmem:[#allocation51_spill] sm:$0xff]  ;;  %v5224_v23 = vld [vmem:[#allocation58_spill] sm:$0xff] }
 0x211   : > { %v2335_v46 = vadd.f32 %v4807_v5, %v2299_v60  ;;  %v1842_v27 = vadd.f32 %v4754_v24, %v1611_v44  ;;  %v2009_v12 = vmul.f32 %v4437_v6, %v1878_v22  ;;  %v2040_v11 = vadd.f32 %v2008_v14, %v1973_v40  ;;  %v5213_v24 = vld [vmem:[#allocation39_spill] sm:$0xff]  ;;  %v5226_v44 = vld [vmem:[#allocation38_spill] sm:$0xff]  ;;  %v2170_v14 = vpop.permute.xlu0 %2169 }
 0x212   : > { %v5209_v51 = vmax.f32 %v5208_v3, 0.0  ;;  %v2395_v42 = vpack.c.bf16 %v2369_v21, %v2368_v8  ;;  %v2366_v28 = vmax.f32 %v2334_v25, 0.0  ;;  %v1384_v49 = vadd.f32 %v4757_v59, %v5210_v0  ;;  %v5225_v60 = vld [vmem:[#allocation55_spill] sm:$0xff]  ;;  %v5228_v8 = vld [vmem:[#allocation44_spill] sm:$0xff] }
 0x213   : > { %v2367_v53 = vmax.f32 %v2335_v46, 0.0  ;;  %v2041_v38 = vadd.f32 %v2009_v12, %v1974_v63  ;;  %v2264_v29 = vmul.f32 %v5211_v32, %v2040_v11  ;;  %v1385_v2 = vadd.f32 %v4760_v45, %v5212_v61  ;;  %v5229_v25 = vld [vmem:[#allocation63_spill] sm:$0xff]  ;;  %v5234_v32 = vld [vmem:[#allocation40_spill] sm:$0xff] }
 0x214   : > { %v2396_v16 = vpack.c.bf16 %v5209_v51, %v2370_v26  ;;  %v1608_v36 = vmul.f32 %v5213_v24, %v1384_v49  ;;  %v1808_v22 = vadd.f32 %v4764_v1, %v4725_v18  ;;  %v1940_v52 = vmul.f32 %v3802_v10, %v4731_v56  ;;  %v5219_v18 = vld [vmem:[#allocation10_spill] sm:$0xff]  ;;  %v5230_v11 = vld [vmem:[#allocation47_spill] sm:$0xff]  ;;  %v5231_v51 = vld [vmem:[#allocation52_spill] sm:$0xff] }
 0x215   : > { %v1971_v7 = vadd.f32 %v5215_v31, %v5214_v19  ;;  %v2394_v59 = vpack.c.bf16 %v2367_v53, %v2366_v28  ;;  %v2265_v35 = vmul.f32 %v5216_v47, %v2041_v38  ;;  %v2296_v30 = vadd.f32 %v2264_v29, %v1841_v33  ;;  %v5221_v33 = vld [vmem:[#allocation33_spill] sm:$0xff]  ;;  %v5227_v26 = vld [vmem:[#allocation46_spill] sm:$0xff]  ;;  %v5235_v29 = vld [vmem:[#allocation31_spill] sm:$0xff] }
 0x216   : > { %2468 = vmatpush.bf16.msra.mxu3 %v2396_v16  ;;  %v1609_v54 = vmul.f32 %v5217_v4, %v1385_v2  ;;  %v1839_v45 = vadd.f32 %v4727_v62, %v1608_v36  ;;  %v1972_v13 = vadd.f32 %v1940_v52, %v5218_v15  ;;  %v2006_v39 = vmul.f32 %v4437_v6, %v4703_v17  ;;  %v5222_v62 = vld [vmem:[#allocation45_spill] sm:$0xff]  ;;  %v5236_v36 = vld [vmem:[#allocation50_spill] sm:$0xff] }
 0x217   : > { %v2007_v1 = vmul.f32 %v4437_v6, %v5219_v18  ;;  %v2297_v10 = vadd.f32 %v2265_v35, %v1842_v27  ;;  %v2332_v34 = vadd.f32 %v4807_v5, %v2296_v30  ;;  %v1351_v43 = vmul.f32 %v3796_v48, %v5220_v55  ;;  %v5233_v53 = vld [vmem:[#allocation53_spill] sm:$0xff] }
 0x218   : > { %v1840_v9 = vadd.f32 %v1808_v22, %v1609_v54  ;;  %v2038_v20 = vadd.f32 %v2006_v39, %v1971_v7  ;;  %v1774_v40 = vmul.f32 %v5222_v62, %v5221_v33  ;;  %v1837_v58 = vadd.f32 %v5224_v23, %v5223_v37  ;;  %v2980_v2 = vld [vmem:[%s5050_s9] sm:$0xf]  ;;  %v2982_v33 = vld [vmem:[%s5050_s9 + $0x8] sm:$0xf0]  ;;  %v2988_v62 = vld [vmem:[%s5050_s9 + $0x10] sm:$0xf] }
 0x219   : > { %v2039_v57 = vadd.f32 %v2007_v1, %v1972_v13  ;;  %v2333_v17 = vadd.f32 %v4807_v5, %v2297_v10  ;;  %v2364_v41 = vmax.f32 %v2332_v34, 0.0  ;;  %v1383_v50 = vadd.f32 %v1351_v43, %v5225_v60  ;;  %v5237_v52 = vld [vmem:[#allocation49_spill] sm:$0xff]  ;;  %v3131_v23 = vld [vmem:[%s5050_s9 + $0x14] sm:$0xf] }
 0x21a   : > { %2469 = vmatpush.bf16.msra.mxu3 %v2395_v42  ;;  %v2004_v63 = vmul.f32 %v4437_v6, %v5226_v44  ;;  %v2262_v48 = vmul.f32 %v5227_v26, %v2038_v20  ;;  %v1806_v46 = vadd.f32 %v1774_v40, %v5229_v25  ;;  %v2005_v27 = vmul.f32 %v4437_v6, %v4731_v56  ;;  %v5232_v42 = vld [vmem:[#allocation56_spill] sm:$0xff]  ;;  %v3130_v6 = vld [vmem:[%s5050_s9 + $0x4] sm:$0xf0]  ;;  %v3133_v44 = vld [vmem:[%s5050_s9 + $0x24] sm:$0xf] }
 0x21b   : > { %v2263_v21 = vmul.f32 %v5228_v8, %v2039_v57  ;;  %v2365_v12 = vmax.f32 %v2333_v17, 0.0  ;;  %v1607_v3 = vmul.f32 %v5230_v11, %v1383_v50  ;;  %v2259_v28 = vmul.f32 %v2170_v14, %v5232_v42  ;;  %v3129_v57 = vld [vmem:[%s5050_s9 + $0x4] sm:$0xf]  ;;  %v2996_v17 = vld [vmem:[%s5050_s9 + $0x20] sm:$0xf] }
 0x21c   : > { %v2036_v16 = vadd.f32 %v2004_v63, %v5231_v51  ;;  %v2294_v0 = vadd.f32 %v2262_v48, %v1839_v45  ;;  %v2037_v38 = vadd.f32 %v2005_v27, %v5233_v53  ;;  %v2290_v61 = vadd.f32 %v5235_v29, %v5234_v32  ;;  %v2998_v63 = vld [vmem:[%s5050_s9 + $0x28] sm:$0xf0]  ;;  %v3004_v14 = vld [vmem:[%s5050_s9 + $0x30] sm:$0xf]  ;;  %v3136_v26 = vld [vmem:[%s5050_s9 + $0x34] sm:$0xf0] }
 0x21d   : > { %v2295_v49 = vadd.f32 %v2263_v21, %v1840_v9  ;;  %v2393_v56 = vpack.c.bf16 %v2365_v12, %v2364_v41  ;;  %v1838_v24 = vadd.f32 %v1806_v46, %v1607_v3  ;;  %v2291_v19 = vadd.f32 %v2259_v28, %v5237_v52  ;;  %v3134_v41 = vld [vmem:[%s5050_s9 + $0x24] sm:$0xf0]  ;;  %v3135_v21 = vld [vmem:[%s5050_s9 + $0x34] sm:$0xf]  ;;  %v3006_v25 = vld [vmem:[%s5050_s9 + $0x38] sm:$0xf0] }
 0x21e   : > { %2470 = vmatpush.bf16.msra.mxu3 %v2394_v59  ;;  %v2260_v22 = vmul.f32 %v5236_v36, %v2036_v16  ;;  %v2330_v31 = vadd.f32 %v4807_v5, %v2294_v0  ;;  %v5238_v59 = vld [vmem:[#allocation54_spill] sm:$0xff]  ;;  %v2326_v35 = vadd.f32 %v4807_v5, %v2290_v61  ;;  %v2981_v54 = vor.u32 %v3130_v6, %v2980_v2  ;;  %v3144_v12 = vld [vmem:[%s5051_s10 + $0x38] sm:$0xff]  ;;  %v3143_v51 = vld [vmem:[%s5051_s10 + $0x30] sm:$0xff] }
 0x21f   : > { %v2331_v7 = vadd.f32 %v4807_v5, %v2295_v49  ;;  %v2261_v47 = vmul.f32 %v5238_v59, %v2037_v38  ;;  %v2327_v4 = vadd.f32 %v4807_v5, %v2291_v19  ;;  %v2985_v40 = vor.u32 %v3129_v57, %v2982_v33  ;;  %2583 = vmatpush.bf16.msrb.mxu2 %v3144_v12  ;;  %v3142_v28 = vld [vmem:[%s5051_s10 + $0x28] sm:$0xff]  ;;  %v3141_v53 = vld [vmem:[%s5051_s10 + $0x20] sm:$0xff]  ;;  %v3140_v61 = vld [vmem:[%s5051_s10 + $0x18] sm:$0xff] }
 0x220   : > { %v2292_v30 = vadd.f32 %v2260_v22, %v1837_v58  ;;  %v2362_v45 = vmax.f32 %v2330_v31, 0.0  ;;  %v2358_v18 = vmax.f32 %v2326_v35, 0.0  ;;  %2446 = vmatmul.bf16.vlgmr.msra.gmra.mxu2 %v2981_v54  ;;  %v2990_v58 = vld [vmem:[%s5050_s9 + $0x18] sm:$0xf0]  ;;  %v2997_v50 = vor.u32 %v3134_v41, %v2996_v17  ;;  %v3139_v6 = vld [vmem:[%s5051_s10 + $0x10] sm:$0xff]  ;;  %v3137_v19 = vld [vmem:[%s5051_s10] sm:$0xff] }
 0x221   : > { %v2363_v15 = vmax.f32 %v2331_v7, 0.0  ;;  %v2293_v13 = vadd.f32 %v2261_v47, %v1838_v24  ;;  %v2359_v1 = vmax.f32 %v2327_v4, 0.0  ;;  %v2993_v60 = vor.u32 %v3131_v23, %v2990_v58  ;;  %v3138_v24 = vld [vmem:[%s5051_s10 + $0x8] sm:$0xff]  ;;  %v3152_v7 = vld [vmem:[%s5053_s12 + $0x38] sm:$0xff]  ;;  %v3147_v17 = vld [vmem:[%s5053_s12 + $0x10] sm:$0xff] }
 0x222   : > { %2471 = vmatpush.bf16.msra.mxu3 %v2393_v56  ;;  %v2328_v39 = vadd.f32 %v4807_v5, %v2292_v30  ;;  %v3001_v48 = vor.u32 %v3133_v44, %v2998_v63  ;;  %v3005_v8 = vor.u32 %v3136_v26, %v3004_v14  ;;  %v3009_v46 = vor.u32 %v3135_v21, %v3006_v25  ;;  %v3151_v30 = vld [vmem:[%s5053_s12 + $0x30] sm:$0xff]  ;;  %v3145_v21 = vld [vmem:[%s5053_s12] sm:$0xff]  ;;  %v3160_v25 = vld [vmem:[%s5055_s14 + $0x38] sm:$0xff] }
 0x223   : > { %v2392_v10 = vpack.c.bf16 %v2363_v15, %v2362_v45  ;;  %v2329_v34 = vadd.f32 %v4807_v5, %v2293_v13  ;;  %v2390_v9 = vpack.c.bf16 %v2359_v1, %v2358_v18  ;;  %v3132_v5 = vld [vmem:[%s5050_s9 + $0x14] sm:$0xf0]  ;;  %2584 = vmatpush.bf16.msrb.mxu2 %v3143_v51  ;;  %v3231_v31 = vmov 64.0   ;;  %v3150_v18 = vld [vmem:[%s5053_s12 + $0x28] sm:$0xff]  ;;  %v3157_v12 = vld [vmem:[%s5055_s14 + $0x20] sm:$0xff] }
 0x224   : > { %v2360_v55 = vmax.f32 %v2328_v39, 0.0  ;;  %v2989_v37 = vor.u32 %v3132_v5, %v2988_v62  ;;  %3207 = vrcp.f32 %v3231_v31 }
 0x225   : > { %v2361_v43 = vmax.f32 %v2329_v34, 0.0 }
 0x226   : > { %2472 = vmatpush.bf16.msra.mxu3 %v2392_v10 }
 0x227   : > { %v2391_v20 = vpack.c.bf16 %v2361_v43, %v2360_v55  ;;  %2585 = vmatpush.bf16.msrb.mxu2 %v3142_v28  ;;  %v3149_v55 = vld [vmem:[%s5053_s12 + $0x20] sm:$0xff] }
 0x22a   : > { %2473 = vmatpush.bf16.msra.mxu3 %v2391_v20  ;;  %v3208_v15 = vpop.eup %3207 }
 0x22b   : > { %2586 = vmatpush.bf16.msrb.mxu2 %v3141_v53  ;;  %v2510_v34 = vmul.f32 64.0, %v3208_v15  ;;  %vm2514_vm4 = vweird.f32 %v3208_v15  ;;  %v3154_v53 = vld [vmem:[%s5055_s14 + $0x8] sm:$0xff] }
 0x22d   : > { %v2511_v62 = vsub.f32 1.0, %v2510_v34 }
 0x22e   : > { %2474 = vmatpush.bf16.msra.mxu3 %v2390_v9 }
 0x22f   : > { %2587 = vmatpush.bf16.msrb.mxu2 %v3140_v61  ;;  %v2512_v23 = vmul.f32 %v3208_v15, %v2511_v62 }
 0x230   : > { %2451 = vmatmul.bf16.gmra.mxu2 %v2989_v37 }
 0x231   : > { %2475 = vmatmul.bf16.vlgmr.msra.gmra.mxu3 %v2985_v40  ;;  %v3148_v40 = vld [vmem:[%s5053_s12 + $0x18] sm:$0xff] }
 0x232   : > { %2663 = vmatpush.bf16.msrb.mxu3 %v3152_v7 }
 0x233   : > { %2588 = vmatpush.bf16.msrb.mxu2 %v3139_v6 }
 0x236   : > { %2664 = vmatpush.bf16.msrb.mxu3 %v3151_v30 }
 0x237   : > { %2589 = vmatpush.bf16.msrb.mxu2 %v3138_v24 }
 0x23a   : > { %2665 = vmatpush.bf16.msrb.mxu3 %v3150_v18 }
 0x23b   : > { %2590 = vmatpush.bf16.msrb.mxu2 %v3137_v19 }
 0x23e   : > { %2666 = vmatpush.bf16.msrb.mxu3 %v3149_v55 }
 0x23f   : > { %2761 = vmatpush.bf16.msra.mxu2 %v3160_v25 }
 0x240   : > { %2456 = vmatmul.bf16.gmra.mxu2 %v2997_v50 }
 0x241   : > { %2480 = vmatmul.bf16.gmra.mxu3 %v2993_v60  ;;  %v2513_v60 = vadd.f32 %v3208_v15, %v2512_v23 }
 0x242   : > { %2667 = vmatpush.bf16.msrb.mxu3 %v3148_v40 }
 0x243   : > { %v2515_v63 = vsel %vm2514_vm4, %v3208_v15, %v2513_v60 }
 0x246   : > { %2668 = vmatpush.bf16.msrb.mxu3 %v3147_v17 }
 0x250   : > { %2461 = vmatmul.bf16.gmra.mxu2 %v3005_v8  ;;  %v3146_v8 = vld [vmem:[%s5053_s12 + $0x8] sm:$0xff] }
 0x251   : > { %2485 = vmatmul.bf16.gmra.mxu3 %v3001_v48 }
 0x252   : > { %2669 = vmatpush.bf16.msrb.mxu3 %v3146_v8 }
 0x256   : > { %2670 = vmatpush.bf16.msrb.mxu3 %v3145_v21 }
 0x261   : > { %2490 = vmatmul.bf16.gmra.mxu3 %v3009_v46  ;;  %v3159_v46 = vld [vmem:[%s5055_s14 + $0x30] sm:$0xff] }
 0x262   : > { %2762 = vmatpush.bf16.msra.mxu2 %v3159_v46 }
 0x2a3   : > { %v2447_v27 = vpop.f32.mrf.mxu2 }
 0x2ab   : > { %v2449_v11 = vpop.f32.mrf.mxu2 }
 0x2b3   : > { %v2452_v16 = vpop.f32.mrf.mxu2 }
 0x2b4   : > { %v2476_v3 = vpop.f32.mrf.mxu3 }
 0x2b5   : > { %v4944_v22 = vadd.f32 %v2476_v3, %v2447_v27  ;;  %v3158_v27 = vld [vmem:[%s5055_s14 + $0x28] sm:$0xff] }
 0x2b6   : > { %2763 = vmatpush.bf16.msra.mxu2 %v3158_v27 }
 0x2ba   : > { %2764 = vmatpush.bf16.msra.mxu2 %v3157_v12 }
 0x2bb   : > { %v2454_v49 = vpop.f32.mrf.mxu2 }
 0x2bc   : > { %v2478_v42 = vpop.f32.mrf.mxu3 }
 0x2bd   : > { %v4942_v36 = vadd.f32 %v2478_v42, %v2449_v11  ;;  %v2534_v11 = vld [vmem:[%s5052_s11] sm:$0x1] }
 0x2bf   : > { %v2496_v47 = vadd.f32 %v4942_v36, %v4944_v22 }
 0x2c3   : > { %v2457_v32 = vpop.f32.mrf.mxu2 }
 0x2c4   : > { %v2481_v0 = vpop.f32.mrf.mxu3 }
 0x2c5   : > { %v4946_v52 = vadd.f32 %v2481_v0, %v2452_v16  ;;  %v3156_v0 = vld [vmem:[%s5055_s14 + $0x18] sm:$0xff] }
 0x2c6   : > { %2765 = vmatpush.bf16.msra.mxu2 %v3156_v0 }
 0x2c7   : > { %v2497_v54 = vadd.f32 %v2496_v47, %v4946_v52 }
 0x2cb   : > { %v2459_v2 = vpop.f32.mrf.mxu2 }
 0x2cc   : > { %v2483_v38 = vpop.f32.mrf.mxu3 }
 0x2cd   : > { %v4956_v35 = vadd.f32 %v2483_v38, %v2454_v49  ;;  %v3155_v49 = vld [vmem:[%s5055_s14 + $0x10] sm:$0xff]  ;;  %v3153_v38 = vld [vmem:[%s5055_s14] sm:$0xff] }
 0x2ce   : > { %2766 = vmatpush.bf16.msra.mxu2 %v3155_v49 }
 0x2cf   : > { %v2498_v13 = vadd.f32 %v2497_v54, %v4956_v35 }
 0x2d2   : > { %2767 = vmatpush.bf16.msra.mxu2 %v3154_v53 }
 0x2d3   : > { %v2462_v59 = vpop.f32.mrf.mxu2 }
 0x2d4   : > { %v2486_v29 = vpop.f32.mrf.mxu3 }
 0x2d5   : > { %v4962_v45 = vadd.f32 %v2486_v29, %v2457_v32  ;;  %v2614_v32 = vld [vmem:[%s5054_s13] sm:$0x1] }
 0x2d6   : > { %2768 = vmatpush.bf16.msra.mxu2 %v3153_v38 }
 0x2d7   : > { %v2499_v1 = vadd.f32 %v2498_v13, %v4962_v45 }
 0x2db   : > { %v2464_v43 = vpop.f32.mrf.mxu2 }
 0x2dc   : > { %v2488_v56 = vpop.f32.mrf.mxu3 }
 0x2dd   : > { %v4965_v39 = vadd.f32 %v2488_v56, %v2459_v2 }
 0x2df   : > { %v2500_v9 = vadd.f32 %v2499_v1, %v4965_v39 }
 0x2e4   : > { %v2491_v4 = vpop.f32.mrf.mxu3 }
 0x2e5   : > { %v4971_v10 = vadd.f32 %v2491_v4, %v2462_v59 }
 0x2e7   : > { %v2501_v57 = vadd.f32 %v2500_v9, %v4971_v10 }
 0x2ec   : > { %v2493_v20 = vpop.f32.mrf.mxu3 }
 0x2ed   : > { %v4978_v33 = vadd.f32 %v2493_v20, %v2464_v43 }
 0x2ef   : > { %v2502_v5 = vadd.f32 %v2501_v57, %v4978_v33 }
 0x2f1   : > { %v2503_v37 = vrot.slane %v2502_v5, 4 }
 0x2f3   : > { %v2504_v58 = vadd.f32 %v2503_v37, %v2502_v5 }
 0x2f5   : > { %v2505_v41 = vrot.slane %v2504_v58, 2 }
 0x2f7   : > { %v2506_v50 = vadd.f32 %v2505_v41, %v2504_v58 }
 0x2f9   : > { %v2507_v44 = vrot.slane %v2506_v50, 1 }
 0x2fb   : > { %v2508_v14 = vadd.f32 %v2507_v44, %v2506_v50 }
 0x2fd   : > { %v2516_v26 = vmul.f32 %v2515_v63, %v2508_v14 }
 0x2ff   : > { %v2517_v48 = vpack.c.bf16 %v2516_v26, %v2516_v26 }
 0x301   : > { %2591 = vmatmul.bf16.vlgmr.msrb.gmra.mxu2 %v2517_v48 }
 0x384   : > { %v2592_v3 = vpop.f32.mrf.mxu2 }
 0x385   : > { %v2593_v51 = vadd.f32 %v2592_v3, %v2534_v11 }
 0x387   : > { %v2596_v16 = vmax.f32 %v2593_v51, 0.0 }
 0x389   : > { %v2597_v42 = vpack.c.bf16 %v2596_v16, %v2596_v16 }
 0x38b   : > { %2671 = vmatmul.bf16.vlgmr.msrb.gmra.mxu3 %v2597_v42 }
 0x38c   : > { %v2594_v28 = vpop.f32.mrf.mxu2 }
 0x40e   : > { %v2672_v29 = vpop.f32.mrf.mxu3 }
 0x40f   : > { %v2673_v61 = vadd.f32 %v2672_v29, %v2614_v32 }
 0x411   : > { %v2676_v2 = vadd.f32 3.0, %v2673_v61 }
 0x413   : > { %v2677_v6 = vmax.f32 %v2676_v2, 0.0 }
 0x415   : > { %v2678_v56 = vmin.f32 %v2677_v6, 6.0 }
 0x416   : > { %v2674_v24 = vpop.f32.mrf.mxu3 }
 0x417   : > { %v2679_v19 = vmul.f32 0.16666667, %v2678_v56 }
 0x419   : > { %v2680_v31 = vperm.slane %v2679_v19, 0 }
 0x41b   : > { %v2681_v7 = vmul.f32 %v2680_v31, %v4944_v22  ;;  %v2682_v59 = vmul.f32 %v2680_v31, %v4942_v36  ;;  %v2683_v30 = vmul.f32 %v2680_v31, %v4946_v52  ;;  %v2684_v4 = vmul.f32 %v2680_v31, %v4956_v35  ;;  %v3206_v52 = vld [vmem:[%s5056_s15] ss:$0 sm:$0xff] }
 0x41c   : > { %v2685_v15 = vmul.f32 %v2680_v31, %v4962_v45  ;;  %v2686_v13 = vmul.f32 %v2680_v31, %v4965_v39  ;;  %v2687_v1 = vmul.f32 %v2680_v31, %v4971_v10  ;;  %v2688_v22 = vmul.f32 %v2680_v31, %v4978_v33 }
 0x41d   : > { %v2689_v47 = vpack.c.bf16 %v2682_v59, %v2681_v7  ;;  %v2690_v54 = vpack.c.bf16 %v2684_v4, %v2683_v30 }
 0x41e   : > { %v2691_v18 = vpack.c.bf16 %v2686_v13, %v2685_v15  ;;  %v2692_v36 = vpack.c.bf16 %v2688_v22, %v2687_v1 }
 0x41f   : > { %2769 = vmatmul.bf16.vlgmr.msra.gmra.mxu2 %v2689_v47 }
 0x42f   : > { %2774 = vmatmul.bf16.gmra.mxu2 %v2690_v54 }
 0x43f   : > { %2779 = vmatmul.bf16.gmra.mxu2 %v2691_v18 }
 0x44f   : > { %2784 = vmatmul.bf16.gmra.mxu2 %v2692_v36 }
 0x4a2   : > { %v2770_v34 = vpop.f32.mrf.mxu2 }
 0x4a3   : > { %v2771_v9 = vadd.f32 %v3206_v52, %v2770_v34 }
 0x4aa   : > { %v2772_v35 = vpop.f32.mrf.mxu2 }
 0x4ab   : > { %v2773_v55 = vadd.f32 %v3206_v52, %v2772_v35 }
 0x4ad   : > { %v3164_v45 = vpack.c.bf16 %v2773_v55, %v2771_v9 }
 0x4af   : > { %3165 = vst [vmem:[%s521_s0] sm:$0xff] %v3164_v45  }
 0x4b2   : > { %v2775_v39 = vpop.f32.mrf.mxu2 }
 0x4b3   : > { %v2776_v43 = vadd.f32 %v3206_v52, %v2775_v39 }
 0x4ba   : > { %v2777_v10 = vpop.f32.mrf.mxu2 }
 0x4bb   : > { %v2778_v20 = vadd.f32 %v3206_v52, %v2777_v10 }
 0x4bd   : > { %v3169_v57 = vpack.c.bf16 %v2778_v20, %v2776_v43 }
 0x4bf   : > { %3181 = vst [vmem:[%s521_s0 + $0x8] sm:$0xff] %v3169_v57  }
 0x4c2   : > { %v2780_v33 = vpop.f32.mrf.mxu2 }
 0x4c3   : > { %v2781_v5 = vadd.f32 %v3206_v52, %v2780_v33 }
 0x4ca   : > { %v2782_v62 = vpop.f32.mrf.mxu2 }
 0x4cb   : > { %v2783_v40 = vadd.f32 %v3206_v52, %v2782_v62 }
 0x4cd   : > { %v3174_v37 = vpack.c.bf16 %v2783_v40, %v2781_v5 }
 0x4cf   : > { %3182 = vst [vmem:[%s521_s0 + $0x10] sm:$0xff] %v3174_v37  }
 0x4d2   : > { %v2785_v23 = vpop.f32.mrf.mxu2 }
 0x4d3   : > { %v2786_v17 = vadd.f32 %v3206_v52, %v2785_v23 }
 0x4da   : > { %v2787_v58 = vpop.f32.mrf.mxu2 }
 0x4db   : > { %v2788_v41 = vadd.f32 %v3206_v52, %v2787_v58 }
 0x4dd   : > { %v3179_v60 = vpack.c.bf16 %v2788_v41, %v2786_v17 }
 0x4df   : > { %3183 = vst [vmem:[%s521_s0 + $0x18] sm:$0xff] %v3179_v60  }
 0x4e0 PF: > { %s26_s21 = sadd.s32 1, %s3226_s21  }
 0x4e1   : > { %p23_p4 = scmp.ge.s32.totalorder %s26_s21, 4  }
 0x4e3   :  { %25 = sbr.rel (!%p23_p4) target bundleno = 2 (0x2), region = 114 }

// kernel: lraspp_forward.7
= control target key start
LH: loop header
LB: loop body
LE: loop exit
PB: predicated region body
PF: predicated region fallthrough
CT: control target
= control target key end

     0   :  { %s1600_s29 = smov 0   ;;  %s1602_s30 = smov 0   ;;  %s1891_s0 = inlined_call_operand.vmem [shape: bf16[2,128,4], index: 0, kind: input, shape index: {}]   ;;  %s1892_s1 = inlined_call_operand.vmem [shape: bf16[96,128], index: 1, kind: input, shape index: {}]   ;;  %s1893_s2 = inlined_call_operand.vmem [shape: f32[96,1], index: 2, kind: input, shape index: {}]   ;;  %s1894_s3 = inlined_call_operand.vmem [shape: bf16[4,576], index: 3, kind: input, shape index: {}]   ;;  %s1895_s4 = inlined_call_operand.vmem [shape: bf16[32,96], index: 4, kind: input, shape index: {}]   ;;  %s1896_s5 = inlined_call_operand.vmem [shape: f32[32,1], index: 5, kind: input, shape index: {}]   ;;  %s1897_s6 = inlined_call_operand.vmem [shape: bf16[1,32], index: 6, kind: input, shape index: {}]   ;;  %s1898_s7 = inlined_call_operand.<no memory space> [shape: f32[1,1], index: 7, kind: input, shape index: {}]   ;;  %s1899_s8 = inlined_call_operand.vmem [shape: f32[2,1,576], index: 8, kind: output, shape index: {}]  }
   0x1   :  { %v13_v0 = vstv %s1898_s7  ;;  %s1604_s9 = smov 0  }
   0x2   :  { %14 = vst [vmem:[#allocation3] sm:$0x1] %v13_v0 }
   0x3 LB: > { %s32_s7 = sadd.s32 1, %s1545_s30  ;;  %p1337_p0 = scmp.ge.s32.totalorder %s1549_s9, 1  ;;  %s1549_s9 = sphi %s1604_s9, %s20_s9   ;;  %s1545_s30 = sphi %s1602_s30, %s1901_s30   ;;  %s1541_s29 = sphi %s1600_s29, %s1900_s29  }
   0x4   : > { %p34_p1 = scmp.ge.s32.totalorder %s32_s7, 2  ;;  %p289_p2 = scmp.lt.s32.totalorder %s1549_s9, 3 }
   0x6   : > { %s1903_s7 = smov (%p34_p1, %s32_s7), 0  ;;  %p290_p3 = pnand %p1337_p0, %p289_p2 }
   0x7   : > { %p331_p4 = scmp.lt.s32.totalorder (!%p290_p3), %s1541_s29, 1 }
   0x8   : > { %293 = sbr.rel (%p290_p3) target bundleno = 848 (0x350), region = 52 }
   0xd   : > { %v384_v1 = vld [vmem:[%s1893_s2] sm:$0xff]  ;;  %v386_v2 = vld [vmem:[%s1893_s2 + $0x10] sm:$0xff]  ;;  %v1551_v3 = vmov 0   ;;  %s1905_s29 = smov (!%p331_p4, %s1541_s29), 1  ;;  %v385_v5 = vld [vmem:[%s1893_s2 + $0x8] sm:$0xff]  ;;  %vm737_vm0 = vcmask 1041408  }
   0xe   : > { %1524 = vset.pattern.permute.xlu0 %v1551_v3  ;;  %1525 = vset.pattern.permute.xlu1 %v1551_v3  ;;  %s1475_s14 = sshll.u32 %s1905_s29, 6  ;;  %v387_v6 = vld [vmem:[%s1893_s2 + $0x18] sm:$0xff]  ;;  %v390_v9 = vld [vmem:[%s1893_s2 + $0x30] sm:$0xff]  ;;  %v393_v13 = vld [vmem:[%s1893_s2 + $0x48] sm:$0xff]  ;;  %vm651_vm1 = vcmask 27648   ;;  %vm718_vm2 = vcmask 31744  }
   0xf   : > { %398 = vperm.xlu0 %1524, %v384_v1   ;;  %408 = vperm.xlu1 %1525, %v386_v2   ;;  %s335_s17 = scalar_lea.vmem %s1891_s0, %s1475_s14  ;;  %v391_v10 = vld [vmem:[%s1893_s2 + $0x38] sm:$0xff]  ;;  %v394_v14 = vld [vmem:[%s1893_s2 + $0x50] sm:$0xff]  ;;  %v1476_v20 = vld [vmem:[%s1892_s1] sm:$0xff]  ;;  %vm1011_vm3 = vcmask 785408   ;;  %vm1151_vm4 = vcmask 261120   ;;  %vm1229_vm5 = vcmask 1040384  }
  0x10   : > { %1526 = vset.pattern.permute.xlu2 %v1551_v3  ;;  %v1489_v4 = vld [vmem:[%s335_s17 + $0x38] sm:$0xff]  ;;  %v1488_v7 = vld [vmem:[%s335_s17 + $0x30] sm:$0xff]  ;;  %v1487_v8 = vld [vmem:[%s335_s17 + $0x28] sm:$0xff]  ;;  %s1498_s11 = smul.u32 5, %s1905_s29  ;;  %vm1232_vm6 = vcmask 1043459   ;;  %vm1234_vm7 = vcmask 1042432  }
  0x11   : > { %540 = vmatpush.bf16.msra.mxu0 %v1489_v4  ;;  %v1486_v11 = vld [vmem:[%s335_s17 + $0x20] sm:$0xff]  ;;  %v1485_v12 = vld [vmem:[%s335_s17 + $0x18] sm:$0xff]  ;;  %v1484_v15 = vld [vmem:[%s335_s17 + $0x10] sm:$0xff] }
  0x12   : > { %v1483_v16 = vld [vmem:[%s335_s17 + $0x8] sm:$0xff]  ;;  %v979_v17 = vld [vmem:[%s1896_s5 + $0x10] sm:$0xff]  ;;  %v980_v18 = vld [vmem:[%s1896_s5 + $0x18] sm:$0xff]  ;;  %s349_s14 = scalar_lea.vmem %s1899_s8, %s1498_s11 }
  0x13   : > { %v1482_v19 = vld [vmem:[%s335_s17] sm:$0xff]  ;;  %v978_v21 = vld [vmem:[%s1896_s5 + $0x8] sm:$0xff]  ;;  %v1144_v22 = vld [vmem:[#allocation3] sm:$0x1] }
  0x14   : > { %v388_v23 = vld [vmem:[%s1893_s2 + $0x20] sm:$0xff]  ;;  %v389_v24 = vld [vmem:[%s1893_s2 + $0x28] sm:$0xff]  ;;  %v395_v27 = vld [vmem:[%s1893_s2 + $0x58] sm:$0xff] }
  0x15   : > { %541 = vmatpush.bf16.msra.mxu0 %v1488_v7  ;;  %418 = vperm.xlu2 %1526, %v388_v23   ;;  %v1477_v25 = vld [vmem:[%s1892_s1 + $0x8] sm:$0xff]  ;;  %v392_v26 = vld [vmem:[%s1893_s2 + $0x40] sm:$0xff]  ;;  %v1478_v28 = vld [vmem:[%s1892_s1 + $0x10] sm:$0xff] }
  0x16   : > { %v977_v29 = vld [vmem:[%s1896_s5] sm:$0xff]  ;;  %v1479_v30 = vld [vmem:[%s1892_s1 + $0x18] sm:$0xff]  ;;  %v1481_v32 = vld [vmem:[%s1892_s1 + $0x28] sm:$0xff] }
  0x17   : > { %403 = vperm.xlu0 %1524, %v385_v5   ;;  %413 = vperm.xlu1 %1525, %v387_v6   ;;  %v1480_v31 = vld [vmem:[%s1892_s1 + $0x20] sm:$0xff] }
  0x18   : > { %v676_v33 = vld [vmem:[%s1894_s3] sm:$0xff] }
  0x19   : > { %542 = vmatpush.bf16.msra.mxu0 %v1487_v8  ;;  %709 = vst [vmem:[#allocation1] ss:$4 sm:$0xff] %v676_v33 }
  0x1d   : > { %543 = vmatpush.bf16.msra.mxu0 %v1486_v11  ;;  %423 = vperm.xlu2 %1526, %v389_v24  }
  0x1f   : > { %428 = vperm.xlu0 %1524, %v390_v9   ;;  %433 = vperm.xlu1 %1525, %v391_v10  }
  0x20   : > { %v713_v34 = vld.sshfl [vmem:[#allocation1] sm:$0xff pattern:$0x73625140]  ;;  %v714_v36 = vld.sshfl [vmem:[#allocation1 + $0x8] sm:$0xff pattern:$0x73625140] }
  0x21   : > { %544 = vmatpush.bf16.msra.mxu0 %v1485_v12  ;;  %v738_v35 = vsel %vm737_vm0, %v713_v34, 0  ;;  %v740_v37 = vsel %vm737_vm0, %v714_v36, 0  ;;  %v715_v38 = vld.sshfl [vmem:[#allocation1 + $0x10] sm:$0xff pattern:$0x73625140] }
  0x22   : > { %755 = vmatpush.bf16.msra.mxu1 %v738_v35  ;;  %794 = vmatpush.bf16.msra.mxu2 %v740_v37  ;;  %v742_v40 = vsel %vm737_vm0, %v715_v38, 0 }
  0x23   : > { %833 = vmatpush.bf16.msra.mxu3 %v742_v40 }
  0x25   : > { %545 = vmatpush.bf16.msra.mxu0 %v1484_v15  ;;  %438 = vperm.xlu2 %1526, %v392_v26  }
  0x27   : > { %443 = vperm.xlu0 %1524, %v393_v13   ;;  %448 = vperm.xlu1 %1525, %v394_v14  }
  0x29   : > { %546 = vmatpush.bf16.msra.mxu0 %v1483_v16 }
  0x2d   : > { %547 = vmatpush.bf16.msra.mxu0 %v1482_v19  ;;  %453 = vperm.xlu2 %1526, %v395_v27  }
  0x2f   : > { %993 = vperm.xlu0 %1524, %v979_v17   ;;  %998 = vperm.xlu1 %1525, %v980_v18  }
  0x30   : > { %548 = vmatmul.bf16.vlgmr.msra.gmra.mxu0 %v1476_v20 }
  0x35   : > { %983 = vperm.xlu2 %1526, %v977_v29   ;;  %v677_v29 = vld [vmem:[%s1894_s3 + $0x8] sm:$0x3] }
  0x36   : > { %712 = vst [vmem:[#allocation1 + $0x20] ss:$4 sm:$0xff] %v677_v29 }
  0x37   : > { %988 = vperm.xlu0 %1524, %v978_v21   ;;  %1147 = vperm.xlu1 %1525, %v1144_v22  }
  0x40   : > { %553 = vmatmul.bf16.gmra.mxu0 %v1477_v25 }
  0x50   : > { %558 = vmatmul.bf16.gmra.mxu0 %v1478_v28 }
  0x60   : > { %563 = vmatmul.bf16.gmra.mxu0 %v1479_v30 }
  0x6f   : > { %v419_v8 = vpop.permute.xlu2 %418 }
  0x70   : > { %568 = vmatmul.bf16.gmra.mxu0 %v1480_v31 }
  0x77   : > { %v424_v19 = vpop.permute.xlu2 %423 }
  0x80   : > { %573 = vmatmul.bf16.gmra.mxu0 %v1481_v32 }
  0x81   : > { %v399_v39 = vpop.permute.xlu0 %398  ;;  %v409_v54 = vpop.permute.xlu1 %408 }
  0x89   : > { %v404_v46 = vpop.permute.xlu0 %403  ;;  %v414_v0 = vpop.permute.xlu1 %413 }
  0x91   : > { %v429_v30 = vpop.permute.xlu0 %428  ;;  %v434_v40 = vpop.permute.xlu1 %433 }
  0xad   : > { %v549_v41 = vpop.f32.mrf.mxu0 }
  0xae   : > { %v550_v42 = vadd.f32 %v549_v41, %v399_v39  ;;  %v717_v39 = vld.sshfl [vmem:[#allocation1 + $0x20] sm:$0xff pattern:$0x73625140] }
  0xb0   : > { %v579_v43 = vadd.f32 3.0, %v550_v42 }
  0xb2   : > { %v591_v44 = vmax.f32 %v579_v43, 0.0  ;;  %v716_v43 = vld.sshfl [vmem:[#allocation1 + $0x18] sm:$0xff pattern:$0x73625140] }
  0xb4   : > { %v603_v45 = vmin.f32 %v591_v44, 6.0 }
  0xb5   : > { %v551_v47 = vpop.f32.mrf.mxu0 }
  0xb6   : > { %v615_v48 = vmul.f32 %v603_v45, %v550_v42  ;;  %v552_v49 = vadd.f32 %v551_v47, %v404_v46  ;;  %v746_v42 = vsel %vm737_vm0, %v717_v39, 0  ;;  %v744_v46 = vsel %vm737_vm0, %v716_v43, 0 }
  0xb7   : > { %911 = vmatpush.bf16.msrb.mxu2 %v746_v42  ;;  %872 = vmatpush.bf16.msrb.mxu1 %v744_v46 }
  0xb8   : > { %v627_v50 = vmul.f32 0.16666667, %v615_v48  ;;  %v580_v51 = vadd.f32 3.0, %v552_v49 }
  0xba   : > { %v639_v52 = vpack.c.bf16 %v627_v50, %v627_v50  ;;  %v592_v53 = vmax.f32 %v580_v51, 0.0 }
  0xbc   : > { %652 = vst.msk [vmem:[#allocation2] sm:$0xf] %vm651_vm1, %v639_v52  ;;  %v604_v55 = vmin.f32 %v592_v53, 6.0  ;;  %v439_v53 = vpop.permute.xlu2 %438 }
  0xbd   : > { %v554_v56 = vpop.f32.mrf.mxu0 }
  0xbe   : > { %v616_v57 = vmul.f32 %v604_v55, %v552_v49  ;;  %v555_v58 = vadd.f32 %v554_v56, %v409_v54 }
  0xc0   : > { %v628_v59 = vmul.f32 0.16666667, %v616_v57  ;;  %v581_v60 = vadd.f32 3.0, %v555_v58 }
  0xc2   : > { %v640_v61 = vpack.c.bf16 %v628_v59, %v628_v59  ;;  %v593_v62 = vmax.f32 %v581_v60, 0.0 }
  0xc4   : > { %653 = vst.msk [vmem:[#allocation2 + $0x4] sm:$0xf] %vm651_vm1, %v640_v61  ;;  %v605_v63 = vmin.f32 %v593_v62, 6.0  ;;  %v444_v62 = vpop.permute.xlu0 %443 }
  0xc5   : > { %v556_v1 = vpop.f32.mrf.mxu0 }
  0xc6   : > { %v617_v2 = vmul.f32 %v605_v63, %v555_v58  ;;  %v557_v3 = vadd.f32 %v556_v1, %v414_v0 }
  0xc8   : > { %v629_v4 = vmul.f32 0.16666667, %v617_v2  ;;  %v582_v5 = vadd.f32 3.0, %v557_v3 }
  0xca   : > { %v641_v6 = vpack.c.bf16 %v629_v4, %v629_v4  ;;  %v594_v7 = vmax.f32 %v582_v5, 0.0 }
  0xcb   : > { %v1698_v9 = vld [vmem:[#allocation2] sm:$0xff] }
  0xcc   : > { %654 = vst.msk [vmem:[#allocation2 + $0x8] sm:$0xf] %vm651_vm1, %v641_v6  ;;  %v606_v10 = vmin.f32 %v594_v7, 6.0  ;;  %1420 = vmatmul.msk.bf16.vlgmr.msra.gmra.mxu1 %vm718_vm2, %v1698_v9  ;;  %1426 = vmatmul.msk.bf16.vlgmr.msra.gmra.mxu2 %vm718_vm2, %v1698_v9 }
  0xcd   : > { %v559_v11 = vpop.f32.mrf.mxu0  ;;  %1432 = vmatmul.msk.bf16.vlgmr.msra.gmra.mxu3 %vm718_vm2, %v1698_v9 }
  0xce   : > { %v618_v12 = vmul.f32 %v606_v10, %v557_v3  ;;  %v560_v13 = vadd.f32 %v559_v11, %v419_v8  ;;  %v449_v8 = vpop.permute.xlu1 %448 }
  0xd0   : > { %v630_v14 = vmul.f32 0.16666667, %v618_v12  ;;  %v583_v15 = vadd.f32 3.0, %v560_v13 }
  0xd2   : > { %v642_v16 = vpack.c.bf16 %v630_v14, %v630_v14  ;;  %v595_v17 = vmax.f32 %v583_v15, 0.0 }
  0xd4   : > { %655 = vst.msk [vmem:[#allocation2 + $0xc] sm:$0xf] %vm651_vm1, %v642_v16  ;;  %v607_v18 = vmin.f32 %v595_v17, 6.0 }
  0xd5   : > { %v561_v20 = vpop.f32.mrf.mxu0 }
  0xd6   : > { %v619_v21 = vmul.f32 %v607_v18, %v560_v13  ;;  %v562_v22 = vadd.f32 %v561_v20, %v424_v19  ;;  %v454_v18 = vpop.permute.xlu2 %453 }
  0xd8   : > { %v631_v23 = vmul.f32 0.16666667, %v619_v21  ;;  %v584_v24 = vadd.f32 3.0, %v562_v22 }
  0xda   : > { %v643_v25 = vpack.c.bf16 %v631_v23, %v631_v23  ;;  %v596_v26 = vmax.f32 %v584_v24, 0.0 }
  0xdb   : > { %v1708_v27 = vld [vmem:[#allocation2 + $0x8] sm:$0xff] }
  0xdc   : > { %656 = vst.msk [vmem:[#allocation2 + $0x10] sm:$0xf] %vm651_vm1, %v643_v25  ;;  %v608_v28 = vmin.f32 %v596_v26, 6.0  ;;  %1421 = vmatmul.msk.bf16.gmra.mxu1 %vm718_vm2, %v1708_v27  ;;  %1427 = vmatmul.msk.bf16.gmra.mxu2 %vm718_vm2, %v1708_v27 }
  0xdd   : > { %v564_v31 = vpop.f32.mrf.mxu0  ;;  %1433 = vmatmul.msk.bf16.gmra.mxu3 %vm718_vm2, %v1708_v27 }
  0xde   : > { %v620_v32 = vmul.f32 %v608_v28, %v562_v22  ;;  %v565_v33 = vadd.f32 %v564_v31, %v429_v30 }
  0xe0   : > { %v632_v34 = vmul.f32 0.16666667, %v620_v32  ;;  %v585_v35 = vadd.f32 3.0, %v565_v33 }
  0xe2   : > { %v644_v36 = vpack.c.bf16 %v632_v34, %v632_v34  ;;  %v597_v37 = vmax.f32 %v585_v35, 0.0 }
  0xe4   : > { %657 = vst.msk [vmem:[#allocation2 + $0x14] sm:$0xf] %vm651_vm1, %v644_v36  ;;  %v609_v38 = vmin.f32 %v597_v37, 6.0 }
  0xe5   : > { %v566_v41 = vpop.f32.mrf.mxu0 }
  0xe6   : > { %v621_v44 = vmul.f32 %v609_v38, %v565_v33  ;;  %v567_v45 = vadd.f32 %v566_v41, %v434_v40 }
  0xe8   : > { %v633_v47 = vmul.f32 0.16666667, %v621_v44  ;;  %v586_v48 = vadd.f32 3.0, %v567_v45 }
  0xea   : > { %v645_v49 = vpack.c.bf16 %v633_v47, %v633_v47  ;;  %v598_v50 = vmax.f32 %v586_v48, 0.0 }
  0xeb   : > { %v1723_v51 = vld [vmem:[#allocation2 + $0x10] sm:$0xff] }
  0xec   : > { %658 = vst.msk [vmem:[#allocation2 + $0x18] sm:$0xf] %vm651_vm1, %v645_v49  ;;  %v610_v52 = vmin.f32 %v598_v50, 6.0  ;;  %1422 = vmatmul.msk.bf16.gmra.mxu1 %vm718_vm2, %v1723_v51  ;;  %1428 = vmatmul.msk.bf16.gmra.mxu2 %vm718_vm2, %v1723_v51 }
  0xed   : > { %v569_v54 = vpop.f32.mrf.mxu0  ;;  %1434 = vmatmul.msk.bf16.gmra.mxu3 %vm718_vm2, %v1723_v51 }
  0xee   : > { %v622_v55 = vmul.f32 %v610_v52, %v567_v45  ;;  %v570_v56 = vadd.f32 %v569_v54, %v439_v53 }
  0xf0   : > { %v634_v57 = vmul.f32 0.16666667, %v622_v55  ;;  %v587_v58 = vadd.f32 3.0, %v570_v56 }
  0xf2   : > { %v646_v59 = vpack.c.bf16 %v634_v57, %v634_v57  ;;  %v599_v60 = vmax.f32 %v587_v58, 0.0 }
  0xf4   : > { %659 = vst.msk [vmem:[#allocation2 + $0x1c] sm:$0xf] %vm651_vm1, %v646_v59  ;;  %v611_v61 = vmin.f32 %v599_v60, 6.0 }
  0xf5   : > { %v571_v63 = vpop.f32.mrf.mxu0 }
  0xf6   : > { %v623_v0 = vmul.f32 %v611_v61, %v570_v56  ;;  %v572_v1 = vadd.f32 %v571_v63, %v444_v62 }
  0xf8   : > { %v635_v2 = vmul.f32 0.16666667, %v623_v0  ;;  %v588_v3 = vadd.f32 3.0, %v572_v1 }
  0xfa   : > { %v647_v4 = vpack.c.bf16 %v635_v2, %v635_v2  ;;  %v600_v5 = vmax.f32 %v588_v3, 0.0 }
  0xfb   : > { %v1493_v6 = vld [vmem:[#allocation2 + $0x18] sm:$0xff] }
  0xfc   : > { %660 = vst.msk [vmem:[#allocation2 + $0x20] sm:$0xf] %vm651_vm1, %v647_v4  ;;  %v612_v7 = vmin.f32 %v600_v5, 6.0  ;;  %1423 = vmatmul.msk.bf16.gmra.mxu1 %vm718_vm2, %v1493_v6  ;;  %1429 = vmatmul.msk.bf16.gmra.mxu2 %vm718_vm2, %v1493_v6 }
  0xfd   : > { %v574_v10 = vpop.f32.mrf.mxu0  ;;  %1435 = vmatmul.msk.bf16.gmra.mxu3 %vm718_vm2, %v1493_v6 }
  0xfe   : > { %v624_v11 = vmul.f32 %v612_v7, %v572_v1  ;;  %v575_v12 = vadd.f32 %v574_v10, %v449_v8 }
 0x100   : > { %v636_v13 = vmul.f32 0.16666667, %v624_v11  ;;  %v589_v14 = vadd.f32 3.0, %v575_v12 }
 0x102   : > { %v648_v15 = vpack.c.bf16 %v636_v13, %v636_v13  ;;  %v601_v16 = vmax.f32 %v589_v14, 0.0 }
 0x104   : > { %661 = vst.msk [vmem:[#allocation2 + $0x24] sm:$0xf] %vm651_vm1, %v648_v15  ;;  %v613_v17 = vmin.f32 %v601_v16, 6.0 }
 0x105   : > { %v576_v19 = vpop.f32.mrf.mxu0 }
 0x106   : > { %v625_v20 = vmul.f32 %v613_v17, %v575_v12  ;;  %v577_v21 = vadd.f32 %v576_v19, %v454_v18 }
 0x108   : > { %v637_v22 = vmul.f32 0.16666667, %v625_v20  ;;  %v590_v23 = vadd.f32 3.0, %v577_v21 }
 0x10a   : > { %v649_v24 = vpack.c.bf16 %v637_v22, %v637_v22  ;;  %v602_v25 = vmax.f32 %v590_v23, 0.0  ;;  %v1804_v22 = vld [vmem:[%s1895_s4] sm:$0xff] }
 0x10b   : > { %v1494_v26 = vld [vmem:[#allocation2 + $0x20] sm:$0xff] }
 0x10c   : > { %662 = vst.msk [vmem:[#allocation2 + $0x28] sm:$0xf] %vm651_vm1, %v649_v24  ;;  %v614_v28 = vmin.f32 %v602_v25, 6.0  ;;  %1424 = vmatmul.msk.bf16.gmra.mxu1 %vm718_vm2, %v1494_v26  ;;  %1430 = vmatmul.msk.bf16.gmra.mxu2 %vm718_vm2, %v1494_v26 }
 0x10d   : > { %1436 = vmatmul.msk.bf16.gmra.mxu3 %vm718_vm2, %v1494_v26 }
 0x10e   : > { %v626_v29 = vmul.f32 %v614_v28, %v577_v21 }
 0x110   : > { %v638_v30 = vmul.f32 0.16666667, %v626_v29 }
 0x112   : > { %v650_v31 = vpack.c.bf16 %v638_v30, %v638_v30 }
 0x114   : > { %663 = vst.msk [vmem:[#allocation2 + $0x2c] sm:$0xf] %vm651_vm1, %v650_v31 }
 0x11b   : > { %v1495_v32 = vld [vmem:[#allocation2 + $0x28] sm:$0xff] }
 0x11c   : > { %1425 = vmatmul.msk.bf16.gmra.mxu1 %vm718_vm2, %v1495_v32  ;;  %1431 = vmatmul.msk.bf16.gmra.mxu2 %vm718_vm2, %v1495_v32 }
 0x11d   : > { %1437 = vmatmul.msk.bf16.gmra.mxu3 %vm718_vm2, %v1495_v32 }
 0x12c   : > { %1438 = vmatmul.msk.bf16.vlgmr.msrb.gmra.mxu1 %vm718_vm2, %v1698_v9  ;;  %1444 = vmatmul.msk.bf16.vlgmr.msrb.gmra.mxu2 %vm718_vm2, %v1698_v9 }
 0x13c   : > { %1439 = vmatmul.msk.bf16.gmra.mxu1 %vm718_vm2, %v1708_v27  ;;  %1445 = vmatmul.msk.bf16.gmra.mxu2 %vm718_vm2, %v1708_v27 }
 0x149   : > { %v1754_v33 = vpop.f32.mrf.mxu1 }
 0x14c   : > { %1440 = vmatmul.msk.bf16.gmra.mxu1 %vm718_vm2, %v1723_v51  ;;  %1446 = vmatmul.msk.bf16.gmra.mxu2 %vm718_vm2, %v1723_v51 }
 0x14f   : > { %v1760_v34 = vpop.f32.mrf.mxu2 }
 0x150   : > { %v1762_v35 = vpop.f32.mrf.mxu3 }
 0x151   : > { %v1764_v36 = vpop.f32.mrf.mxu1 }
 0x152   : > { %v947_v19 = vpack.c.bf16 %v1764_v36, %v1754_v33  ;;  %v1497_v36 = vld [vmem:[%s1895_s4 + $0x8] sm:$0xff] }
 0x157   : > { %v1766_v9 = vpop.f32.mrf.mxu2 }
 0x158   : > { %v1768_v37 = vpop.f32.mrf.mxu3 }
 0x159   : > { %v762_v38 = vpop.f32.mrf.mxu1 }
 0x15c   : > { %1441 = vmatmul.msk.bf16.gmra.mxu1 %vm718_vm2, %v1493_v6  ;;  %1447 = vmatmul.msk.bf16.gmra.mxu2 %vm718_vm2, %v1493_v6 }
 0x15f   : > { %v1772_v27 = vpop.f32.mrf.mxu2 }
 0x160   : > { %v1774_v39 = vpop.f32.mrf.mxu3 }
 0x161   : > { %v764_v40 = vpop.f32.mrf.mxu1 }
 0x162   : > { %v952_v41 = vpack.c.bf16 %v764_v40, %v762_v38  ;;  %v949_v38 = vpack.c.bf16 %v1768_v37, %v1762_v35 }
 0x167   : > { %v803_v42 = vpop.f32.mrf.mxu2 }
 0x168   : > { %v953_v43 = vpack.c.bf16 %v803_v42, %v1772_v27  ;;  %v1777_v44 = vpop.f32.mrf.mxu3 }
 0x169   : > { %v954_v45 = vpack.c.bf16 %v1777_v44, %v1774_v39  ;;  %v767_v46 = vpop.f32.mrf.mxu1 }
 0x16c   : > { %1442 = vmatmul.msk.bf16.gmra.mxu1 %vm718_vm2, %v1494_v26  ;;  %1448 = vmatmul.msk.bf16.gmra.mxu2 %vm718_vm2, %v1494_v26  ;;  %v948_v26 = vpack.c.bf16 %v1766_v9, %v1760_v34 }
 0x16f   : > { %v806_v47 = vpop.f32.mrf.mxu2 }
 0x170   : > { %v1783_v48 = vpop.f32.mrf.mxu3 }
 0x171   : > { %v769_v49 = vpop.f32.mrf.mxu1 }
 0x172   : > { %v957_v12 = vpack.c.bf16 %v769_v49, %v767_v46 }
 0x177   : > { %v808_v50 = vpop.f32.mrf.mxu2 }
 0x178   : > { %v1785_v51 = vpop.f32.mrf.mxu3  ;;  %v958_v17 = vpack.c.bf16 %v808_v50, %v806_v47 }
 0x179   : > { %v772_v52 = vpop.f32.mrf.mxu1 }
 0x17c   : > { %1443 = vmatmul.msk.bf16.gmra.mxu1 %vm718_vm2, %v1495_v32  ;;  %1449 = vmatmul.msk.bf16.gmra.mxu2 %vm718_vm2, %v1495_v32  ;;  %v959_v32 = vpack.c.bf16 %v1785_v51, %v1783_v48 }
 0x17f   : > { %v811_v53 = vpop.f32.mrf.mxu2 }
 0x180   : > { %v850_v55 = vpop.f32.mrf.mxu3 }
 0x181   : > { %v774_v54 = vpop.f32.mrf.mxu1 }
 0x182   : > { %v962_v8 = vpack.c.bf16 %v774_v54, %v772_v52 }
 0x187   : > { %v813_v56 = vpop.f32.mrf.mxu2 }
 0x188   : > { %v852_v58 = vpop.f32.mrf.mxu3  ;;  %v963_v14 = vpack.c.bf16 %v813_v56, %v811_v53 }
 0x189   : > { %v777_v57 = vpop.f32.mrf.mxu1  ;;  %v964_v28 = vpack.c.bf16 %v852_v58, %v850_v55 }
 0x18f   : > { %v816_v59 = vpop.f32.mrf.mxu2 }
 0x190   : > { %v855_v61 = vpop.f32.mrf.mxu3 }
 0x191   : > { %v779_v60 = vpop.f32.mrf.mxu1 }
 0x192   : > { %v967_v4 = vpack.c.bf16 %v779_v60, %v777_v57 }
 0x197   : > { %v818_v62 = vpop.f32.mrf.mxu2 }
 0x198   : > { %v857_v1 = vpop.f32.mrf.mxu3  ;;  %v968_v11 = vpack.c.bf16 %v818_v62, %v816_v59 }
 0x199   : > { %v782_v63 = vpop.f32.mrf.mxu1  ;;  %v969_v25 = vpack.c.bf16 %v857_v1, %v855_v61 }
 0x19f   : > { %v821_v0 = vpop.f32.mrf.mxu2 }
 0x1a0   : > { %v860_v10 = vpop.f32.mrf.mxu3 }
 0x1a1   : > { %v784_v2 = vpop.f32.mrf.mxu1 }
 0x1a2   : > { %v972_v3 = vpack.c.bf16 %v784_v2, %v782_v63  ;;  %v1841_v63 = vpop.permute.xlu0 %993 }
 0x1a4   : > { %1020 = vmatpush.bf16.msrb.mxu3 %v972_v3  ;;  %v1845_v3 = vpop.permute.xlu1 %998 }
 0x1a7   : > { %v823_v5 = vpop.f32.mrf.mxu2 }
 0x1a8   : > { %v973_v6 = vpack.c.bf16 %v823_v5, %v821_v0  ;;  %1021 = vmatpush.bf16.msrb.mxu3 %v967_v4  ;;  %v862_v18 = vpop.f32.mrf.mxu3 }
 0x1a9   : > { %v1789_v7 = vpop.f32.mrf.mxu1  ;;  %v974_v20 = vpack.c.bf16 %v862_v18, %v860_v10 }
 0x1aa   : > { %1039 = vmatpush.bf16.msrb.mxu0 %v973_v6  ;;  %v1843_v2 = vpop.permute.xlu0 %988 }
 0x1ac   : > { %1022 = vmatpush.bf16.msrb.mxu3 %v962_v8  ;;  %v1849_v8 = vpop.permute.xlu2 %983 }
 0x1ae   : > { %1040 = vmatpush.bf16.msrb.mxu0 %v968_v11 }
 0x1af   : > { %v1791_v13 = vpop.f32.mrf.mxu2 }
 0x1b0   : > { %1023 = vmatpush.bf16.msrb.mxu3 %v957_v12 }
 0x1b1   : > { %v1793_v15 = vpop.f32.mrf.mxu1 }
 0x1b2   : > { %v950_v16 = vpack.c.bf16 %v1793_v15, %v1789_v7  ;;  %1041 = vmatpush.bf16.msrb.mxu0 %v963_v14 }
 0x1b4   : > { %1024 = vmatpush.bf16.msrb.mxu3 %v952_v41 }
 0x1b6   : > { %1042 = vmatpush.bf16.msrb.mxu0 %v958_v17 }
 0x1b7   : > { %v1799_v21 = vpop.f32.mrf.mxu2 }
 0x1b8   : > { %v951_v23 = vpack.c.bf16 %v1799_v21, %v1791_v13  ;;  %1025 = vmatpush.bf16.msrb.mxu3 %v947_v19 }
 0x1b9   : > { %v879_v24 = vpop.f32.mrf.mxu1 }
 0x1ba   : > { %1043 = vmatpush.bf16.msrb.mxu0 %v953_v43 }
 0x1bb   : > { %1458 = vmatmul.msk.bf16.vlgmr.msrb.gmra.mxu3 %vm1011_vm3, %v1804_v22 }
 0x1bc   : > { %1058 = vmatpush.bf16.msra.mxu3 %v974_v20 }
 0x1be   : > { %1044 = vmatpush.bf16.msrb.mxu0 %v948_v26 }
 0x1bf   : > { %v918_v29 = vpop.f32.mrf.mxu2 }
 0x1c0   : > { %1059 = vmatpush.bf16.msra.mxu3 %v969_v25 }
 0x1c1   : > { %v881_v30 = vpop.f32.mrf.mxu1  ;;  %1460 = vmatmul.msk.bf16.vlgmr.msrb.gmra.mxu0 %vm1011_vm3, %v1804_v22 }
 0x1c2   : > { %v955_v31 = vpack.c.bf16 %v881_v30, %v879_v24  ;;  %v1133_v30 = vld [vmem:[%s1897_s6] sm:$0x1] }
 0x1c4   : > { %1060 = vmatpush.bf16.msra.mxu3 %v964_v28 }
 0x1c7   : > { %v920_v33 = vpop.f32.mrf.mxu2 }
 0x1c8   : > { %1061 = vmatpush.bf16.msra.mxu3 %v959_v32  ;;  %v956_v34 = vpack.c.bf16 %v920_v33, %v918_v29 }
 0x1c9   : > { %v884_v9 = vpop.f32.mrf.mxu1 }
 0x1cb   : > { %1459 = vmatmul.msk.bf16.gmra.mxu3 %vm1011_vm3, %v1497_v36 }
 0x1cc   : > { %1062 = vmatpush.bf16.msra.mxu3 %v954_v45 }
 0x1cf   : > { %v923_v27 = vpop.f32.mrf.mxu2 }
 0x1d0   : > { %1063 = vmatpush.bf16.msra.mxu3 %v949_v38 }
 0x1d1   : > { %v886_v40 = vpop.f32.mrf.mxu1  ;;  %1461 = vmatmul.msk.bf16.gmra.mxu0 %vm1011_vm3, %v1497_v36 }
 0x1d2   : > { %v960_v56 = vpack.c.bf16 %v886_v40, %v884_v9 }
 0x1d7   : > { %v925_v41 = vpop.f32.mrf.mxu2 }
 0x1d8   : > { %v961_v58 = vpack.c.bf16 %v925_v41, %v923_v27 }
 0x1d9   : > { %v889_v42 = vpop.f32.mrf.mxu1 }
 0x1db   : > { %1462 = vmatmul.msk.bf16.vlgmr.msra.gmra.mxu3 %vm1011_vm3, %v1804_v22 }
 0x1df   : > { %v928_v43 = vpop.f32.mrf.mxu2 }
 0x1e1   : > { %v891_v46 = vpop.f32.mrf.mxu1 }
 0x1e2   : > { %v965_v54 = vpack.c.bf16 %v891_v46, %v889_v42 }
 0x1e7   : > { %v930_v47 = vpop.f32.mrf.mxu2 }
 0x1e8   : > { %v966_v57 = vpack.c.bf16 %v930_v47, %v928_v43 }
 0x1e9   : > { %v894_v39 = vpop.f32.mrf.mxu1 }
 0x1eb   : > { %1463 = vmatmul.msk.bf16.gmra.mxu3 %vm1011_vm3, %v1497_v36 }
 0x1ef   : > { %v933_v44 = vpop.f32.mrf.mxu2 }
 0x1f1   : > { %v896_v35 = vpop.f32.mrf.mxu1 }
 0x1f2   : > { %v970_v51 = vpack.c.bf16 %v896_v35, %v894_v39 }
 0x1f7   : > { %v935_v37 = vpop.f32.mrf.mxu2 }
 0x1f8   : > { %v971_v55 = vpack.c.bf16 %v935_v37, %v933_v44 }
 0x1f9   : > { %v899_v45 = vpop.f32.mrf.mxu1 }
 0x1ff   : > { %v938_v48 = vpop.f32.mrf.mxu2 }
 0x201   : > { %v901_v49 = vpop.f32.mrf.mxu1 }
 0x202   : > { %v975_v50 = vpack.c.bf16 %v901_v49, %v899_v45 }
 0x204   : > { %1077 = vmatpush.bf16.msra.mxu0 %v975_v50 }
 0x207   : > { %v940_v52 = vpop.f32.mrf.mxu2 }
 0x208   : > { %v976_v53 = vpack.c.bf16 %v940_v52, %v938_v48  ;;  %1078 = vmatpush.bf16.msra.mxu0 %v970_v51 }
 0x20a   : > { %1096 = vmatpush.bf16.msrb.mxu3 %v976_v53 }
 0x20c   : > { %1079 = vmatpush.bf16.msra.mxu0 %v965_v54 }
 0x20e   : > { %1097 = vmatpush.bf16.msrb.mxu3 %v971_v55 }
 0x210   : > { %1080 = vmatpush.bf16.msra.mxu0 %v960_v56 }
 0x212   : > { %1098 = vmatpush.bf16.msrb.mxu3 %v966_v57 }
 0x214   : > { %1081 = vmatpush.bf16.msra.mxu0 %v955_v31 }
 0x216   : > { %1099 = vmatpush.bf16.msrb.mxu3 %v961_v58 }
 0x218   : > { %1082 = vmatpush.bf16.msra.mxu0 %v950_v16 }
 0x21a   : > { %1100 = vmatpush.bf16.msrb.mxu3 %v956_v34 }
 0x21b   : > { %1464 = vmatmul.msk.bf16.vlgmr.msra.gmra.mxu0 %vm1011_vm3, %v1804_v22 }
 0x21e   : > { %1101 = vmatpush.bf16.msrb.mxu3 %v951_v23 }
 0x221   : > { %1466 = vmatmul.msk.bf16.vlgmr.msrb.gmra.mxu3 %vm1011_vm3, %v1804_v22 }
 0x22b   : > { %1465 = vmatmul.msk.bf16.gmra.mxu0 %vm1011_vm3, %v1497_v36 }
 0x231   : > { %1467 = vmatmul.msk.bf16.gmra.mxu3 %vm1011_vm3, %v1497_v36 }
 0x23e   : > { %v1027_v59 = vpop.f32.mrf.mxu3  ;;  %v1046_v60 = vpop.f32.mrf.mxu0 }
 0x23f   : > { %v1028_v14 = vadd.f32 %v1027_v59, %v1849_v8  ;;  %v1047_v15 = vadd.f32 %v1046_v60, %v1849_v8 }
 0x241   : > { %v1113_v24 = vmax.f32 %v1028_v14, 0.0  ;;  %v1114_v25 = vmax.f32 %v1047_v15, 0.0 }
 0x246   : > { %v1029_v61 = vpop.f32.mrf.mxu3  ;;  %v1048_v62 = vpop.f32.mrf.mxu0 }
 0x247   : > { %v1030_v10 = vadd.f32 %v1029_v61, %v1843_v2  ;;  %v1049_v11 = vadd.f32 %v1048_v62, %v1843_v2 }
 0x249   : > { %v1118_v20 = vmax.f32 %v1030_v10, 0.0  ;;  %v1119_v21 = vmax.f32 %v1049_v11, 0.0 }
 0x24b   : > { %v1134_v28 = vpack.c.bf16 %v1118_v20, %v1113_v24  ;;  %v1135_v29 = vpack.c.bf16 %v1119_v21, %v1114_v25  ;;  %v1237_v25 = vlaneseq }
 0x24d   : > { %vm1239_vm8 = vcmp.lt.s32.totalorder %v1237_v25, 576 }
 0x24e   : > { %v1032_v0 = vpop.f32.mrf.mxu3  ;;  %v1051_v1 = vpop.f32.mrf.mxu0 }
 0x24f   : > { %v1033_v4 = vadd.f32 %v1032_v0, %v1841_v63  ;;  %v1052_v5 = vadd.f32 %v1051_v1, %v1841_v63 }
 0x251   : > { %v1123_v16 = vmax.f32 %v1033_v4, 0.0  ;;  %v1124_v17 = vmax.f32 %v1052_v5, 0.0 }
 0x256   : > { %v1034_v6 = vpop.f32.mrf.mxu3  ;;  %v1053_v7 = vpop.f32.mrf.mxu0 }
 0x257   : > { %v1035_v12 = vadd.f32 %v1034_v6, %v1845_v3  ;;  %v1054_v13 = vadd.f32 %v1053_v7, %v1845_v3 }
 0x259   : > { %v1128_v18 = vmax.f32 %v1035_v12, 0.0  ;;  %v1129_v19 = vmax.f32 %v1054_v13, 0.0 }
 0x25b   : > { %v1139_v22 = vpack.c.bf16 %v1128_v18, %v1123_v16  ;;  %v1140_v23 = vpack.c.bf16 %v1129_v19, %v1124_v17 }
 0x25d   : > { %1161 = vmatpush.bf16.msrb.mxu0 %v1139_v22  ;;  %1174 = vmatpush.bf16.msra.mxu1 %v1140_v23 }
 0x25e   : > { %v1065_v26 = vpop.f32.mrf.mxu3 }
 0x25f   : > { %v1066_v38 = vadd.f32 %v1065_v26, %v1849_v8 }
 0x261   : > { %1162 = vmatpush.bf16.msrb.mxu0 %v1134_v28  ;;  %1175 = vmatpush.bf16.msra.mxu1 %v1135_v29  ;;  %v1115_v43 = vmax.f32 %v1066_v38, 0.0 }
 0x264   : > { %1468 = vmatmul.msk.bf16.vlgmr.msrb.gmra.mxu0 %vm1151_vm4, %v1133_v30  ;;  %1469 = vmatmul.msk.bf16.vlgmr.msra.gmra.mxu1 %vm1151_vm4, %v1133_v30 }
 0x266   : > { %v1067_v31 = vpop.f32.mrf.mxu3 }
 0x267   : > { %v1068_v34 = vadd.f32 %v1067_v31, %v1843_v2 }
 0x269   : > { %v1120_v41 = vmax.f32 %v1068_v34, 0.0 }
 0x26b   : > { %v1136_v46 = vpack.c.bf16 %v1120_v41, %v1115_v43 }
 0x26e   : > { %v1070_v32 = vpop.f32.mrf.mxu3 }
 0x26f   : > { %v1071_v33 = vadd.f32 %v1070_v32, %v1841_v63 }
 0x271   : > { %v1125_v27 = vmax.f32 %v1071_v33, 0.0 }
 0x276   : > { %v1072_v36 = vpop.f32.mrf.mxu3 }
 0x277   : > { %v1073_v9 = vadd.f32 %v1072_v36, %v1845_v3 }
 0x279   : > { %v1130_v40 = vmax.f32 %v1073_v9, 0.0 }
 0x27b   : > { %v1141_v42 = vpack.c.bf16 %v1130_v40, %v1125_v27 }
 0x27d   : > { %1187 = vmatpush.bf16.msra.mxu2 %v1141_v42 }
 0x281   : > { %1188 = vmatpush.bf16.msra.mxu2 %v1136_v46 }
 0x284   : > { %1470 = vmatmul.msk.bf16.vlgmr.msra.gmra.mxu2 %vm1151_vm4, %v1133_v30 }
 0x298   : > { %v1084_v47 = vpop.f32.mrf.mxu0 }
 0x299   : > { %v1085_v51 = vadd.f32 %v1084_v47, %v1849_v8 }
 0x29b   : > { %v1116_v57 = vmax.f32 %v1085_v51, 0.0 }
 0x2a0   : > { %v1086_v39 = vpop.f32.mrf.mxu0 }
 0x2a1   : > { %v1087_v49 = vadd.f32 %v1086_v39, %v1843_v2 }
 0x2a3   : > { %v1121_v55 = vmax.f32 %v1087_v49, 0.0 }
 0x2a4   : > { %v1103_v44 = vpop.f32.mrf.mxu3 }
 0x2a5   : > { %v1137_v58 = vpack.c.bf16 %v1121_v55, %v1116_v57  ;;  %v1104_v0 = vadd.f32 %v1103_v44, %v1849_v8 }
 0x2a7   : > { %v1117_v7 = vmax.f32 %v1104_v0, 0.0 }
 0x2a8   : > { %v1089_v35 = vpop.f32.mrf.mxu0 }
 0x2a9   : > { %v1090_v45 = vadd.f32 %v1089_v35, %v1841_v63 }
 0x2ab   : > { %v1126_v52 = vmax.f32 %v1090_v45, 0.0 }
 0x2ac   : > { %v1105_v37 = vpop.f32.mrf.mxu3 }
 0x2ad   : > { %v1106_v61 = vadd.f32 %v1105_v37, %v1843_v2 }
 0x2af   : > { %v1122_v5 = vmax.f32 %v1106_v61, 0.0 }
 0x2b0   : > { %v1091_v48 = vpop.f32.mrf.mxu0 }
 0x2b1   : > { %v1092_v50 = vadd.f32 %v1091_v48, %v1845_v3  ;;  %v1138_v10 = vpack.c.bf16 %v1122_v5, %v1117_v7 }
 0x2b3   : > { %v1131_v53 = vmax.f32 %v1092_v50, 0.0 }
 0x2b4   : > { %v1108_v54 = vpop.f32.mrf.mxu3 }
 0x2b5   : > { %v1142_v56 = vpack.c.bf16 %v1131_v53, %v1126_v52  ;;  %v1109_v59 = vadd.f32 %v1108_v54, %v1841_v63  ;;  %v1148_v63 = vpop.permute.xlu1 %1147 }
 0x2b6   : > { %v1150_v11 = vperm.slane %v1148_v63, 0 }
 0x2b7   : > { %1200 = vmatpush.bf16.msra.mxu3 %v1142_v56  ;;  %v1127_v1 = vmax.f32 %v1109_v59, 0.0 }
 0x2bb   : > { %1201 = vmatpush.bf16.msra.mxu3 %v1137_v58 }
 0x2bc   : > { %v1110_v60 = vpop.f32.mrf.mxu3 }
 0x2bd   : > { %v1111_v62 = vadd.f32 %v1110_v60, %v1845_v3 }
 0x2be   : > { %1471 = vmatmul.msk.bf16.vlgmr.msra.gmra.mxu3 %vm1151_vm4, %v1133_v30 }
 0x2bf   : > { %v1132_v4 = vmax.f32 %v1111_v62, 0.0 }
 0x2c1   : > { %v1143_v6 = vpack.c.bf16 %v1132_v4, %v1127_v1 }
 0x2c3   : > { %1213 = vmatpush.bf16.msra.mxu0 %v1143_v6 }
 0x2c7   : > { %1214 = vmatpush.bf16.msra.mxu0 %v1138_v10 }
 0x2ca   : > { %1472 = vmatmul.msk.bf16.vlgmr.msra.gmra.mxu0 %vm1151_vm4, %v1133_v30 }
 0x2e1   : > { %v1164_v12 = vpop.f32.mrf.mxu0  ;;  %v1177_v2 = vpop.f32.mrf.mxu1 }
 0x2e2   : > { %v1178_v3 = vadd.f32 %v1177_v2, %v1150_v11  ;;  %v1165_v13 = vadd.f32 %v1164_v12, %v1150_v11 }
 0x2e4   : > { %v1225_v14 = vrot.slane %v1178_v3, 7 }
 0x2e6   : > { %v1230_v8 = vsel %vm1229_vm5, %v1165_v13, %v1225_v14 }
 0x2e9   : > { %v1166_v15 = vpop.f32.mrf.mxu0  ;;  %v1179_v16 = vpop.f32.mrf.mxu1 }
 0x307   : > { %v1190_v17 = vpop.f32.mrf.mxu2 }
 0x308   : > { %v1191_v18 = vadd.f32 %v1190_v17, %v1150_v11 }
 0x30a   : > { %v1226_v19 = vrot.slane %v1191_v18, 6 }
 0x30c   : > { %v1231_v20 = vsel %vm737_vm0, %v1230_v8, %v1226_v19 }
 0x30f   : > { %v1192_v21 = vpop.f32.mrf.mxu2 }
 0x341   : > { %v1203_v22 = vpop.f32.mrf.mxu3 }
 0x342   : > { %v1204_v23 = vadd.f32 %v1203_v22, %v1150_v11 }
 0x344   : > { %v1227_v29 = vrot.slane %v1204_v23, 5 }
 0x347   : > { %v1216_v24 = vpop.f32.mrf.mxu0 }
 0x348   : > { %v1217_v26 = vadd.f32 %v1216_v24, %v1150_v11 }
 0x349   : > { %v1205_v28 = vpop.f32.mrf.mxu3 }
 0x34a   : > { %v1228_v30 = vrot.slane %v1217_v26, 4 }
 0x34c   : > { %v1233_v31 = vsel %vm1232_vm6, %v1227_v29, %v1228_v30 }
 0x34d   : > { %v1235_v32 = vsel %vm1234_vm7, %v1231_v20, %v1233_v31 }
 0x34e   : > { %1241 = vst.msk [vmem:[%s349_s14] sm:$0x1f] %vm1239_vm8, %v1235_v32 }
 0x34f   : > { %v1218_v33 = vpop.f32.mrf.mxu0 }
 0x350 PF: > { %s20_s9 = sadd.s32 1, %s1549_s9   ;;  %s1900_s29 = smov %s1545_s30 }
 0x351   : > { %p17_p5 = scmp.ge.s32.totalorder %s20_s9, 4   ;;  %s1901_s30 = smov %s1903_s7 }
 0x353   :  { %19 = sbr.rel (!%p17_p5) target bundleno = 3 (0x3), region = 90 }

</bundles_post_ra>
